<compile_context>
chip_gen: v5e
topology: v5e:2x2
jax: 0.10.0
libtpu: 0.0.40
codegen_flags: <defaults>
</compile_context>

<pallas_src>
import jax
import jax.numpy as jnp
import numpy as np
from jax.experimental import pallas as pl
from jax.experimental.pallas import tpu as pltpu

# ----- model hyperparameters (small, consistent with the module's constructor) -----
EMBED = 128
HEADS = 8
HEAD_DIM = EMBED // HEADS          # 16
FF_DIM = 4 * EMBED                 # forward_expansion = 4
NUM_CLASSES = 2
OUT_PAD = 128                      # lane-dense padded classifier width
BATCH = 8
SEQ = 8
B_TILE = 4                         # sequences per grid step -> grid = (2,)


def _layer_norm(x, gamma, beta, eps=1e-5):
    mu = jnp.mean(x, axis=-1, keepdims=True)
    var = jnp.mean((x - mu) ** 2, axis=-1, keepdims=True)
    return (x - mu) * jax.lax.rsqrt(var + eps) * gamma + beta


def transformer_kernel(v_ref, k_ref, q_ref, mask_ref,
                       wv_ref, wk_ref, wq_ref,            # (E,E) block-diag, pre-transposed; scale in wq
                       wo_ref, bo_ref,                     # (H,HD,E) per-head rows of wo.T ; (1,E)
                       g1_ref, beta1_ref, g2_ref, beta2_ref,
                       w1_ref, b1_ref, w2_ref, b2_ref,     # pre-transposed FF weights
                       wc_ref, bc_ref,                     # (E,OUT_PAD) padded ; (1,OUT_PAD)
                       out_ref):
    bt = v_ref.shape[0]
    n_tok = bt * SEQ

    v2 = v_ref[...].reshape(n_tok, EMBED)
    k2 = k_ref[...].reshape(n_tok, EMBED)
    q2 = q_ref[...].reshape(n_tok, EMBED)

    # --- all-head V/K/Q projections: one MXU matmul each (block-diagonal weights) ---
    vp = jnp.dot(v2.astype(jnp.bfloat16), wv_ref[...], preferred_element_type=jnp.float32)
    kp = jnp.dot(k2.astype(jnp.bfloat16), wk_ref[...], preferred_element_type=jnp.float32)
    qp = jnp.dot(q2.astype(jnp.bfloat16), wq_ref[...], preferred_element_type=jnp.float32)

    vp3 = vp.reshape(bt, SEQ, EMBED).astype(jnp.bfloat16)
    kp3 = kp.reshape(bt, SEQ, EMBED).astype(jnp.bfloat16)
    qp3 = qp.reshape(bt, SEQ, EMBED).astype(jnp.bfloat16)

    # additive mask, computed once (hoisted out of the head loop)
    addmask = jnp.where(mask_ref[...] == 0.0, jnp.float32(-1e20), jnp.float32(0.0))  # (bt,S,S)

    # per-head scores via 3-D batched matmuls over the batch tile, then ONE softmax
    # (mask-add, row-max, exp, row-sum, reciprocal) over the stacked (H*bt,S,S) tensor.
    energies = []
    for h in range(HEADS):
        sl = slice(h * HEAD_DIM, (h + 1) * HEAD_DIM)
        energies.append(jnp.einsum('bqd,bkd->bqk', qp3[:, :, sl], kp3[:, :, sl],
                                   preferred_element_type=jnp.float32))
    e = jnp.concatenate(energies, axis=0)                        # (H*bt, S, S), scale already folded in
    e = e + jnp.concatenate([addmask] * HEADS, axis=0)
    m = jnp.max(e, axis=-1, keepdims=True)
    p = jnp.exp(e - m)
    att = p * pl.reciprocal(jnp.sum(p, axis=-1, keepdims=True), approx=True)
    att = att.astype(jnp.bfloat16)

    # context + output projection; wo folded per head (no lane-wise concat of head outputs)
    attn = jnp.zeros((n_tok, EMBED), jnp.float32)
    for h in range(HEADS):
        sl = slice(h * HEAD_DIM, (h + 1) * HEAD_DIM)
        att_h = att[h * bt:(h + 1) * bt]                          # (bt, S, S)
        ctx = jnp.einsum('bqk,bkd->bqd', att_h, vp3[:, :, sl],
                         preferred_element_type=jnp.float32)      # (bt, S, HD)
        attn = attn + jnp.dot(ctx.reshape(n_tok, HEAD_DIM).astype(jnp.bfloat16),
                              wo_ref[h], preferred_element_type=jnp.float32)
    attn = attn + bo_ref[...]

    # norm1(attention + query); dropout = identity (eval mode)
    x = _layer_norm(attn + q2, g1_ref[...], beta1_ref[...])

    # feed-forward
    ff = jnp.dot(x.astype(jnp.bfloat16), w1_ref[...],
                 preferred_element_type=jnp.float32) + b1_ref[...]
    ff = jnp.maximum(ff, 0.0)
    ff = jnp.dot(ff.astype(jnp.bfloat16), w2_ref[...],
                 preferred_element_type=jnp.float32) + b2_ref[...]

    # norm2(forward + x); dropout = identity
    y = _layer_norm(ff + x, g2_ref[...], beta2_ref[...])

    # classifier into a lane-dense 128-wide slab (sliced to NUM_CLASSES in the wrapper)
    logits = jnp.dot(y.astype(jnp.bfloat16), wc_ref[...],
                     preferred_element_type=jnp.float32) + bc_ref[...]
    out_ref[...] = logits.reshape(bt, SEQ, OUT_PAD)


def _prepare_kernel_params(p):
    """Host-side weight prep: block-diagonal V/K/Q weights, pre-transposed matrices,
    scale folded into wq, wo split per head, classifier padded to 128 lanes."""
    scale = 1.0 / np.sqrt(np.float32(EMBED))
    eye = jnp.eye(HEADS, dtype=jnp.float32)
    wv_bd = jnp.kron(eye, p["wv"].T).astype(jnp.bfloat16)                       # (E,E)
    wk_bd = jnp.kron(eye, p["wk"].T).astype(jnp.bfloat16)                       # (E,E)
    wq_bd = (jnp.kron(eye, p["wq"].T) * scale).astype(jnp.bfloat16)             # (E,E), scale folded
    wo_ht = p["wo"].T.reshape(HEADS, HEAD_DIM, EMBED).astype(jnp.bfloat16)      # (H,HD,E)
    w1_t = p["w1"].T.astype(jnp.bfloat16)                                       # (E,4E)
    w2_t = p["w2"].T.astype(jnp.bfloat16)                                       # (4E,E)
    wc_pad = jnp.zeros((EMBED, OUT_PAD), jnp.float32).at[:, :NUM_CLASSES].set(
        p["wc"].T).astype(jnp.bfloat16)                                         # (E,128)
    bc_pad = jnp.zeros((1, OUT_PAD), jnp.float32).at[:, :NUM_CLASSES].set(p["bc"])
    return (wv_bd, wk_bd, wq_bd, wo_ht, p["bo"],
            p["gamma1"], p["beta1"], p["gamma2"], p["beta2"],
            w1_t, p["b1"], w2_t, p["b2"], wc_pad, bc_pad)


def transformer_forward(value, key, query, mask, params):
    n, l, e = value.shape
    assert e == EMBED and l == SEQ and n % B_TILE == 0

    (wv_bd, wk_bd, wq_bd, wo_ht, bo, g1, be1, g2, be2,
     w1_t, b1, w2_t, b2, wc_pad, bc_pad) = _prepare_kernel_params(params)

    seq_spec = pl.BlockSpec((B_TILE, SEQ, EMBED), lambda b: (b, 0, 0))
    mask_spec = pl.BlockSpec((B_TILE, SEQ, SEQ), lambda b: (b, 0, 0))
    out_spec = pl.BlockSpec((B_TILE, SEQ, OUT_PAD), lambda b: (b, 0, 0))

    def full(shape):
        nd = len(shape)
        return pl.BlockSpec(shape, lambda b, _nd=nd: (0,) * _nd)

    in_specs = [
        seq_spec, seq_spec, seq_spec, mask_spec,
        full((EMBED, EMBED)),            # wv_bd
        full((EMBED, EMBED)),            # wk_bd
        full((EMBED, EMBED)),            # wq_bd (scaled)
        full((HEADS, HEAD_DIM, EMBED)),  # wo per-head
        full((1, EMBED)),                # bo
        full((1, EMBED)),                # gamma1
        full((1, EMBED)),                # beta1
        full((1, EMBED)),                # gamma2
        full((1, EMBED)),                # beta2
        full((EMBED, FF_DIM)),           # w1_t
        full((1, FF_DIM)),               # b1
        full((FF_DIM, EMBED)),           # w2_t
        full((1, EMBED)),                # b2
        full((EMBED, OUT_PAD)),          # wc padded
        full((1, OUT_PAD)),              # bc padded
    ]

    out_padded = pl.pallas_call(
        transformer_kernel,
        out_shape=jax.ShapeDtypeStruct((n, SEQ, OUT_PAD), jnp.float32),
        grid=(n // B_TILE,),             # >= 2 steps so both v7x TensorCores get work
        in_specs=in_specs,
        out_specs=out_spec,
        compiler_params=pltpu.CompilerParams(
            dimension_semantics=("parallel",)),
    )(value, key, query, mask,
      wv_bd, wk_bd, wq_bd, wo_ht, bo,
      g1, be1, g2, be2,
      w1_t, b1, w2_t, b2, wc_pad, bc_pad)

    return out_padded[..., :NUM_CLASSES]


# -------------------- pure-JAX f32 reference (same math as the PyTorch module) -----
def reference_forward(value, key, query, mask, p):
    def one(v, k, q, m):
        scale = 1.0 / jnp.sqrt(jnp.float32(EMBED))
        outs = []
        for h in range(HEADS):
            sl = slice(h * HEAD_DIM, (h + 1) * HEAD_DIM)
            vh = v[:, sl] @ p["wv"].T
            kh = k[:, sl] @ p["wk"].T
            qh = q[:, sl] @ p["wq"].T
            energy = qh @ kh.T
            energy = jnp.where(m == 0.0, -1e20, energy)
            att = jax.nn.softmax(energy * scale, axis=-1)
            outs.append(att @ vh)
        attn = jnp.concatenate(outs, axis=-1) @ p["wo"].T + p["bo"]
        x = _layer_norm(attn + q, p["gamma1"], p["beta1"])
        ff = jnp.maximum(x @ p["w1"].T + p["b1"], 0.0) @ p["w2"].T + p["b2"]
        y = _layer_norm(ff + x, p["gamma2"], p["beta2"])
        return y @ p["wc"].T + p["bc"]
    return jax.vmap(one)(value, key, query, mask)


def init_params(rng):
    keys = jax.random.split(rng, 12)
    return {
        "wv": jax.random.normal(keys[0], (HEAD_DIM, HEAD_DIM), jnp.float32) * 0.05,
        "wk": jax.random.normal(keys[1], (HEAD_DIM, HEAD_DIM), jnp.float32) * 0.05,
        "wq": jax.random.normal(keys[2], (HEAD_DIM, HEAD_DIM), jnp.float32) * 0.05,
        "wo": jax.random.normal(keys[3], (EMBED, EMBED), jnp.float32) * 0.05,
        "bo": jax.random.normal(keys[4], (1, EMBED), jnp.float32) * 0.01,
        "gamma1": jnp.ones((1, EMBED), jnp.float32),
        "beta1": jnp.zeros((1, EMBED), jnp.float32),
        "gamma2": jnp.ones((1, EMBED), jnp.float32),
        "beta2": jnp.zeros((1, EMBED), jnp.float32),
        "w1": jax.random.normal(keys[5], (FF_DIM, EMBED), jnp.float32) * 0.05,
        "b1": jax.random.normal(keys[6], (1, FF_DIM), jnp.float32) * 0.01,
        "w2": jax.random.normal(keys[7], (EMBED, FF_DIM), jnp.float32) * 0.05,
        "b2": jax.random.normal(keys[8], (1, EMBED), jnp.float32) * 0.01,
        "wc": jax.random.normal(keys[9], (NUM_CLASSES, EMBED), jnp.float32) * 0.05,
        "bc": jax.random.normal(keys[10], (1, NUM_CLASSES), jnp.float32) * 0.01,
    }


if __name__ == "__main__":
    root = jax.random.PRNGKey(0)
    k_v, k_k, k_q, k_p = jax.random.split(root, 4)

    value = jax.random.normal(k_v, (BATCH, SEQ, EMBED), jnp.float32)
    key = jax.random.normal(k_k, (BATCH, SEQ, EMBED), jnp.float32)
    query = jax.random.normal(k_q, (BATCH, SEQ, EMBED), jnp.float32)

    # mask (N, Lq, Lk): 1.0 = attend, 0.0 = masked (mask out the last key position)
    mask = jnp.ones((BATCH, SEQ, SEQ), jnp.float32).at[:, :, -1].set(0.0)

    params = init_params(k_p)

    out = transformer_forward(value, key, query, mask, params)
    out = jax.block_until_ready(out)

    ref = reference_forward(value, key, query, mask, params)
    # bf16 MXU operands (f32 accumulate) + approx reciprocal -> loosened tolerance
    np.testing.assert_allclose(np.asarray(out), np.asarray(ref), rtol=5e-2, atol=5e-2)

    print("KERNEL_OK")
</pallas_src>

<mosaic_0001>
module attributes {stable_mosaic.version = 11 : i64} {
  func.func @transformer_kernel(%arg0: i32, %arg1: memref<4x8x128xf32, #tpu.memory_space<vmem>>, %arg2: memref<4x8x128xf32, #tpu.memory_space<vmem>>, %arg3: memref<4x8x128xf32, #tpu.memory_space<vmem>>, %arg4: memref<4x8x8xf32, #tpu.memory_space<vmem>>, %arg5: memref<128x128xbf16, #tpu.memory_space<vmem>>, %arg6: memref<128x128xbf16, #tpu.memory_space<vmem>>, %arg7: memref<128x128xbf16, #tpu.memory_space<vmem>>, %arg8: memref<8x16x128xbf16, #tpu.memory_space<vmem>>, %arg9: memref<1x128xf32, #tpu.memory_space<vmem>>, %arg10: memref<1x128xf32, #tpu.memory_space<vmem>>, %arg11: memref<1x128xf32, #tpu.memory_space<vmem>>, %arg12: memref<1x128xf32, #tpu.memory_space<vmem>>, %arg13: memref<1x128xf32, #tpu.memory_space<vmem>>, %arg14: memref<128x512xbf16, #tpu.memory_space<vmem>>, %arg15: memref<1x512xf32, #tpu.memory_space<vmem>>, %arg16: memref<512x128xbf16, #tpu.memory_space<vmem>>, %arg17: memref<1x128xf32, #tpu.memory_space<vmem>>, %arg18: memref<128x128xbf16, #tpu.memory_space<vmem>>, %arg19: memref<1x128xf32, #tpu.memory_space<vmem>>, %arg20: memref<4x8x128xf32, #tpu.memory_space<vmem>>) attributes {dimension_semantics = [#tpu.dimension_semantics<parallel>], iteration_bounds = array<i64: 2>, scalar_prefetch = 0 : i64, scratch_operands = 0 : i64, tpu.core_type = #tpu.core_type<tc>, window_params = [{transform_indices = @transform_0, window_bounds = array<i64: 4, 8, 128>}, {transform_indices = @transform_1, window_bounds = array<i64: 4, 8, 128>}, {transform_indices = @transform_2, window_bounds = array<i64: 4, 8, 128>}, {transform_indices = @transform_3, window_bounds = array<i64: 4, 8, 8>}, {pipeline_mode = #tpu.pipeline_mode<synchronous>, transform_indices = @transform_4, window_bounds = array<i64: 128, 128>}, {pipeline_mode = #tpu.pipeline_mode<synchronous>, transform_indices = @transform_5, window_bounds = array<i64: 128, 128>}, {pipeline_mode = #tpu.pipeline_mode<synchronous>, transform_indices = @transform_6, window_bounds = array<i64: 128, 128>}, {pipeline_mode = #tpu.pipeline_mode<synchronous>, transform_indices = @transform_7, window_bounds = array<i64: 8, 16, 128>}, {pipeline_mode = #tpu.pipeline_mode<synchronous>, transform_indices = @transform_8, window_bounds = array<i64: 1, 128>}, {pipeline_mode = #tpu.pipeline_mode<synchronous>, transform_indices = @transform_9, window_bounds = array<i64: 1, 128>}, {pipeline_mode = #tpu.pipeline_mode<synchronous>, transform_indices = @transform_10, window_bounds = array<i64: 1, 128>}, {pipeline_mode = #tpu.pipeline_mode<synchronous>, transform_indices = @transform_11, window_bounds = array<i64: 1, 128>}, {pipeline_mode = #tpu.pipeline_mode<synchronous>, transform_indices = @transform_12, window_bounds = array<i64: 1, 128>}, {pipeline_mode = #tpu.pipeline_mode<synchronous>, transform_indices = @transform_13, window_bounds = array<i64: 128, 512>}, {pipeline_mode = #tpu.pipeline_mode<synchronous>, transform_indices = @transform_14, window_bounds = array<i64: 1, 512>}, {pipeline_mode = #tpu.pipeline_mode<synchronous>, transform_indices = @transform_15, window_bounds = array<i64: 512, 128>}, {pipeline_mode = #tpu.pipeline_mode<synchronous>, transform_indices = @transform_16, window_bounds = array<i64: 1, 128>}, {pipeline_mode = #tpu.pipeline_mode<synchronous>, transform_indices = @transform_17, window_bounds = array<i64: 128, 128>}, {pipeline_mode = #tpu.pipeline_mode<synchronous>, transform_indices = @transform_18, window_bounds = array<i64: 1, 128>}, {transform_indices = @transform_19, window_bounds = array<i64: 4, 8, 128>}]} {
    %c0 = arith.constant 0 : index
    %c0_0 = arith.constant 0 : index
    %c0_1 = arith.constant 0 : index
    %0 = vector.load %arg1[%c0, %c0_0, %c0_1] : memref<4x8x128xf32, #tpu.memory_space<vmem>>, vector<4x8x128xf32>
    %1 = vector.shape_cast %0 : vector<4x8x128xf32> to vector<32x128xf32>
    %c0_2 = arith.constant 0 : index
    %c0_3 = arith.constant 0 : index
    %c0_4 = arith.constant 0 : index
    %2 = vector.load %arg2[%c0_2, %c0_3, %c0_4] : memref<4x8x128xf32, #tpu.memory_space<vmem>>, vector<4x8x128xf32>
    %3 = vector.shape_cast %2 : vector<4x8x128xf32> to vector<32x128xf32>
    %c0_5 = arith.constant 0 : index
    %c0_6 = arith.constant 0 : index
    %c0_7 = arith.constant 0 : index
    %4 = vector.load %arg3[%c0_5, %c0_6, %c0_7] : memref<4x8x128xf32, #tpu.memory_space<vmem>>, vector<4x8x128xf32>
    %5 = vector.shape_cast %4 : vector<4x8x128xf32> to vector<32x128xf32>
    %6 = arith.truncf %1 : vector<32x128xf32> to vector<32x128xbf16>
    %c0_8 = arith.constant 0 : index
    %c0_9 = arith.constant 0 : index
    %7 = vector.load %arg5[%c0_8, %c0_9] : memref<128x128xbf16, #tpu.memory_space<vmem>>, vector<128x128xbf16>
    %cst = arith.constant dense<0.000000e+00> : vector<32x128xf32>
    %8 = tpu.matmul %6, %7, %cst {dimension_numbers = #tpu.dot_dimension_numbers<[1], [0], [0], [1], [0, 0, 1, 1], [], []>} : vector<32x128xbf16>, vector<128x128xbf16>, vector<32x128xf32> -> vector<32x128xf32>
    %9 = arith.truncf %3 : vector<32x128xf32> to vector<32x128xbf16>
    %c0_10 = arith.constant 0 : index
    %c0_11 = arith.constant 0 : index
    %10 = vector.load %arg6[%c0_10, %c0_11] : memref<128x128xbf16, #tpu.memory_space<vmem>>, vector<128x128xbf16>
    %cst_12 = arith.constant dense<0.000000e+00> : vector<32x128xf32>
    %11 = tpu.matmul %9, %10, %cst_12 {dimension_numbers = #tpu.dot_dimension_numbers<[1], [0], [0], [1], [0, 0, 1, 1], [], []>} : vector<32x128xbf16>, vector<128x128xbf16>, vector<32x128xf32> -> vector<32x128xf32>
    %12 = arith.truncf %5 : vector<32x128xf32> to vector<32x128xbf16>
    %c0_13 = arith.constant 0 : index
    %c0_14 = arith.constant 0 : index
    %13 = vector.load %arg7[%c0_13, %c0_14] : memref<128x128xbf16, #tpu.memory_space<vmem>>, vector<128x128xbf16>
    %cst_15 = arith.constant dense<0.000000e+00> : vector<32x128xf32>
    %14 = tpu.matmul %12, %13, %cst_15 {dimension_numbers = #tpu.dot_dimension_numbers<[1], [0], [0], [1], [0, 0, 1, 1], [], []>} : vector<32x128xbf16>, vector<128x128xbf16>, vector<32x128xf32> -> vector<32x128xf32>
    %15 = vector.shape_cast %8 : vector<32x128xf32> to vector<4x8x128xf32>
    %16 = arith.truncf %15 : vector<4x8x128xf32> to vector<4x8x128xbf16>
    %17 = vector.shape_cast %11 : vector<32x128xf32> to vector<4x8x128xf32>
    %18 = arith.truncf %17 : vector<4x8x128xf32> to vector<4x8x128xbf16>
    %19 = vector.shape_cast %14 : vector<32x128xf32> to vector<4x8x128xf32>
    %20 = arith.truncf %19 : vector<4x8x128xf32> to vector<4x8x128xbf16>
    %c0_16 = arith.constant 0 : index
    %c0_17 = arith.constant 0 : index
    %c0_18 = arith.constant 0 : index
    %21 = vector.load %arg4[%c0_16, %c0_17, %c0_18] : memref<4x8x8xf32, #tpu.memory_space<vmem>>, vector<4x8x8xf32>
    %cst_19 = arith.constant 0.000000e+00 : f32
    %22 = vector.broadcast %cst_19 : f32 to vector<4x8x8xf32>
    %23 = arith.cmpf oeq, %21, %22 : vector<4x8x8xf32>
    %cst_20 = arith.constant -1.000000e+20 : f32
    %cst_21 = arith.constant 0.000000e+00 : f32
    %24 = vector.broadcast %cst_20 : f32 to vector<4x8x8xf32>
    %25 = vector.broadcast %cst_21 : f32 to vector<4x8x8xf32>
    %26 = arith.select %23, %24, %25 : vector<4x8x8xi1>, vector<4x8x8xf32>
    %27 = vector.extract_strided_slice %20 {offsets = [0, 0, 0], sizes = [4, 8, 16], strides = [1, 1, 1]} : vector<4x8x128xbf16> to vector<4x8x16xbf16>
    %28 = vector.extract_strided_slice %18 {offsets = [0, 0, 0], sizes = [4, 8, 16], strides = [1, 1, 1]} : vector<4x8x128xbf16> to vector<4x8x16xbf16>
    "tpu.trace_start"() <{level = 10 : i32, message = "bqd,bkd->bqk"}> : () -> ()
    %cst_22 = arith.constant dense<0.000000e+00> : vector<4x8x8xf32>
    %29 = tpu.matmul %27, %28, %cst_22 {dimension_numbers = #tpu.dot_dimension_numbers<[2], [2], [1], [1], [0, 0, 0, 1, 1, 1], [0], [0]>} : vector<4x8x16xbf16>, vector<4x8x16xbf16>, vector<4x8x8xf32> -> vector<4x8x8xf32>
    "tpu.trace_stop"() : () -> ()
    %30 = vector.extract_strided_slice %20 {offsets = [0, 0, 16], sizes = [4, 8, 16], strides = [1, 1, 1]} : vector<4x8x128xbf16> to vector<4x8x16xbf16>
    %31 = vector.extract_strided_slice %18 {offsets = [0, 0, 16], sizes = [4, 8, 16], strides = [1, 1, 1]} : vector<4x8x128xbf16> to vector<4x8x16xbf16>
    "tpu.trace_start"() <{level = 10 : i32, message = "bqd,bkd->bqk"}> : () -> ()
    %cst_23 = arith.constant dense<0.000000e+00> : vector<4x8x8xf32>
    %32 = tpu.matmul %30, %31, %cst_23 {dimension_numbers = #tpu.dot_dimension_numbers<[2], [2], [1], [1], [0, 0, 0, 1, 1, 1], [0], [0]>} : vector<4x8x16xbf16>, vector<4x8x16xbf16>, vector<4x8x8xf32> -> vector<4x8x8xf32>
    "tpu.trace_stop"() : () -> ()
    %33 = vector.extract_strided_slice %20 {offsets = [0, 0, 32], sizes = [4, 8, 16], strides = [1, 1, 1]} : vector<4x8x128xbf16> to vector<4x8x16xbf16>
    %34 = vector.extract_strided_slice %18 {offsets = [0, 0, 32], sizes = [4, 8, 16], strides = [1, 1, 1]} : vector<4x8x128xbf16> to vector<4x8x16xbf16>
    "tpu.trace_start"() <{level = 10 : i32, message = "bqd,bkd->bqk"}> : () -> ()
    %cst_24 = arith.constant dense<0.000000e+00> : vector<4x8x8xf32>
    %35 = tpu.matmul %33, %34, %cst_24 {dimension_numbers = #tpu.dot_dimension_numbers<[2], [2], [1], [1], [0, 0, 0, 1, 1, 1], [0], [0]>} : vector<4x8x16xbf16>, vector<4x8x16xbf16>, vector<4x8x8xf32> -> vector<4x8x8xf32>
    "tpu.trace_stop"() : () -> ()
    %36 = vector.extract_strided_slice %20 {offsets = [0, 0, 48], sizes = [4, 8, 16], strides = [1, 1, 1]} : vector<4x8x128xbf16> to vector<4x8x16xbf16>
    %37 = vector.extract_strided_slice %18 {offsets = [0, 0, 48], sizes = [4, 8, 16], strides = [1, 1, 1]} : vector<4x8x128xbf16> to vector<4x8x16xbf16>
    "tpu.trace_start"() <{level = 10 : i32, message = "bqd,bkd->bqk"}> : () -> ()
    %cst_25 = arith.constant dense<0.000000e+00> : vector<4x8x8xf32>
    %38 = tpu.matmul %36, %37, %cst_25 {dimension_numbers = #tpu.dot_dimension_numbers<[2], [2], [1], [1], [0, 0, 0, 1, 1, 1], [0], [0]>} : vector<4x8x16xbf16>, vector<4x8x16xbf16>, vector<4x8x8xf32> -> vector<4x8x8xf32>
    "tpu.trace_stop"() : () -> ()
    %39 = vector.extract_strided_slice %20 {offsets = [0, 0, 64], sizes = [4, 8, 16], strides = [1, 1, 1]} : vector<4x8x128xbf16> to vector<4x8x16xbf16>
    %40 = vector.extract_strided_slice %18 {offsets = [0, 0, 64], sizes = [4, 8, 16], strides = [1, 1, 1]} : vector<4x8x128xbf16> to vector<4x8x16xbf16>
    "tpu.trace_start"() <{level = 10 : i32, message = "bqd,bkd->bqk"}> : () -> ()
    %cst_26 = arith.constant dense<0.000000e+00> : vector<4x8x8xf32>
    %41 = tpu.matmul %39, %40, %cst_26 {dimension_numbers = #tpu.dot_dimension_numbers<[2], [2], [1], [1], [0, 0, 0, 1, 1, 1], [0], [0]>} : vector<4x8x16xbf16>, vector<4x8x16xbf16>, vector<4x8x8xf32> -> vector<4x8x8xf32>
    "tpu.trace_stop"() : () -> ()
    %42 = vector.extract_strided_slice %20 {offsets = [0, 0, 80], sizes = [4, 8, 16], strides = [1, 1, 1]} : vector<4x8x128xbf16> to vector<4x8x16xbf16>
    %43 = vector.extract_strided_slice %18 {offsets = [0, 0, 80], sizes = [4, 8, 16], strides = [1, 1, 1]} : vector<4x8x128xbf16> to vector<4x8x16xbf16>
    "tpu.trace_start"() <{level = 10 : i32, message = "bqd,bkd->bqk"}> : () -> ()
    %cst_27 = arith.constant dense<0.000000e+00> : vector<4x8x8xf32>
    %44 = tpu.matmul %42, %43, %cst_27 {dimension_numbers = #tpu.dot_dimension_numbers<[2], [2], [1], [1], [0, 0, 0, 1, 1, 1], [0], [0]>} : vector<4x8x16xbf16>, vector<4x8x16xbf16>, vector<4x8x8xf32> -> vector<4x8x8xf32>
    "tpu.trace_stop"() : () -> ()
    %45 = vector.extract_strided_slice %20 {offsets = [0, 0, 96], sizes = [4, 8, 16], strides = [1, 1, 1]} : vector<4x8x128xbf16> to vector<4x8x16xbf16>
    %46 = vector.extract_strided_slice %18 {offsets = [0, 0, 96], sizes = [4, 8, 16], strides = [1, 1, 1]} : vector<4x8x128xbf16> to vector<4x8x16xbf16>
    "tpu.trace_start"() <{level = 10 : i32, message = "bqd,bkd->bqk"}> : () -> ()
    %cst_28 = arith.constant dense<0.000000e+00> : vector<4x8x8xf32>
    %47 = tpu.matmul %45, %46, %cst_28 {dimension_numbers = #tpu.dot_dimension_numbers<[2], [2], [1], [1], [0, 0, 0, 1, 1, 1], [0], [0]>} : vector<4x8x16xbf16>, vector<4x8x16xbf16>, vector<4x8x8xf32> -> vector<4x8x8xf32>
    "tpu.trace_stop"() : () -> ()
    %48 = vector.extract_strided_slice %20 {offsets = [0, 0, 112], sizes = [4, 8, 16], strides = [1, 1, 1]} : vector<4x8x128xbf16> to vector<4x8x16xbf16>
    %49 = vector.extract_strided_slice %18 {offsets = [0, 0, 112], sizes = [4, 8, 16], strides = [1, 1, 1]} : vector<4x8x128xbf16> to vector<4x8x16xbf16>
    "tpu.trace_start"() <{level = 10 : i32, message = "bqd,bkd->bqk"}> : () -> ()
    %cst_29 = arith.constant dense<0.000000e+00> : vector<4x8x8xf32>
    %50 = tpu.matmul %48, %49, %cst_29 {dimension_numbers = #tpu.dot_dimension_numbers<[2], [2], [1], [1], [0, 0, 0, 1, 1, 1], [0], [0]>} : vector<4x8x16xbf16>, vector<4x8x16xbf16>, vector<4x8x8xf32> -> vector<4x8x8xf32>
    "tpu.trace_stop"() : () -> ()
    %51 = tpu.concatenate %29, %32, %35, %38, %41, %44, %47, %50 in 0 : vector<4x8x8xf32>, vector<4x8x8xf32>, vector<4x8x8xf32>, vector<4x8x8xf32>, vector<4x8x8xf32>, vector<4x8x8xf32>, vector<4x8x8xf32>, vector<4x8x8xf32> -> vector<32x8x8xf32>
    %52 = tpu.concatenate %26, %26, %26, %26, %26, %26, %26, %26 in 0 : vector<4x8x8xf32>, vector<4x8x8xf32>, vector<4x8x8xf32>, vector<4x8x8xf32>, vector<4x8x8xf32>, vector<4x8x8xf32>, vector<4x8x8xf32>, vector<4x8x8xf32> -> vector<32x8x8xf32>
    %53 = arith.addf %51, %52 : vector<32x8x8xf32>
    %cst_30 = arith.constant dense<0xFF800000> : vector<32x8xf32>
    %54 = vector.multi_reduction <maximumf>, %53, %cst_30 [2] : vector<32x8x8xf32> to vector<32x8xf32>
    %55 = vector.shape_cast %54 : vector<32x8xf32> to vector<32x8x1xf32>
    %56 = vector.broadcast %55 : vector<32x8x1xf32> to vector<32x8x8xf32>
    %57 = arith.subf %53, %56 : vector<32x8x8xf32>
    %58 = math.exp %57 : vector<32x8x8xf32>
    %cst_31 = arith.constant dense<0.000000e+00> : vector<32x8xf32>
    %59 = vector.multi_reduction <add>, %58, %cst_31 [2] : vector<32x8x8xf32> to vector<32x8xf32>
    %60 = vector.shape_cast %59 : vector<32x8xf32> to vector<32x8x1xf32>
    %61 = tpu.reciprocal %60 {approx = true} : vector<32x8x1xf32> -> vector<32x8x1xf32>
    %62 = vector.broadcast %61 : vector<32x8x1xf32> to vector<32x8x8xf32>
    %63 = arith.mulf %58, %62 : vector<32x8x8xf32>
    %64 = arith.truncf %63 : vector<32x8x8xf32> to vector<32x8x8xbf16>
    %cst_32 = arith.constant 0.000000e+00 : f32
    %65 = vector.broadcast %cst_32 : f32 to vector<32x128xf32>
    %66 = vector.extract_strided_slice %64 {offsets = [0, 0, 0], sizes = [4, 8, 8], strides = [1, 1, 1]} : vector<32x8x8xbf16> to vector<4x8x8xbf16>
    %67 = vector.extract_strided_slice %16 {offsets = [0, 0, 0], sizes = [4, 8, 16], strides = [1, 1, 1]} : vector<4x8x128xbf16> to vector<4x8x16xbf16>
    "tpu.trace_start"() <{level = 10 : i32, message = "bqk,bkd->bqd"}> : () -> ()
    %cst_33 = arith.constant dense<0.000000e+00> : vector<4x8x16xf32>
    %68 = tpu.matmul %66, %67, %cst_33 {dimension_numbers = #tpu.dot_dimension_numbers<[2], [1], [1], [2], [0, 0, 0, 1, 1, 2], [0], [0]>} : vector<4x8x8xbf16>, vector<4x8x16xbf16>, vector<4x8x16xf32> -> vector<4x8x16xf32>
    "tpu.trace_stop"() : () -> ()
    %69 = vector.shape_cast %68 : vector<4x8x16xf32> to vector<32x16xf32>
    %70 = arith.truncf %69 : vector<32x16xf32> to vector<32x16xbf16>
    %c0_34 = arith.constant 0 : index
    %c0_35 = arith.constant 0 : index
    %c0_36 = arith.constant 0 : index
    %71 = vector.load %arg8[%c0_34, %c0_35, %c0_36] : memref<8x16x128xbf16, #tpu.memory_space<vmem>>, vector<1x16x128xbf16>
    %72 = vector.shape_cast %71 : vector<1x16x128xbf16> to vector<16x128xbf16>
    %cst_37 = arith.constant dense<0.000000e+00> : vector<32x128xf32>
    %73 = tpu.matmul %70, %72, %cst_37 {dimension_numbers = #tpu.dot_dimension_numbers<[1], [0], [0], [1], [0, 0, 1, 1], [], []>} : vector<32x16xbf16>, vector<16x128xbf16>, vector<32x128xf32> -> vector<32x128xf32>
    %74 = arith.addf %65, %73 : vector<32x128xf32>
    %75 = vector.extract_strided_slice %64 {offsets = [4, 0, 0], sizes = [4, 8, 8], strides = [1, 1, 1]} : vector<32x8x8xbf16> to vector<4x8x8xbf16>
    %76 = vector.extract_strided_slice %16 {offsets = [0, 0, 16], sizes = [4, 8, 16], strides = [1, 1, 1]} : vector<4x8x128xbf16> to vector<4x8x16xbf16>
    "tpu.trace_start"() <{level = 10 : i32, message = "bqk,bkd->bqd"}> : () -> ()
    %cst_38 = arith.constant dense<0.000000e+00> : vector<4x8x16xf32>
    %77 = tpu.matmul %75, %76, %cst_38 {dimension_numbers = #tpu.dot_dimension_numbers<[2], [1], [1], [2], [0, 0, 0, 1, 1, 2], [0], [0]>} : vector<4x8x8xbf16>, vector<4x8x16xbf16>, vector<4x8x16xf32> -> vector<4x8x16xf32>
    "tpu.trace_stop"() : () -> ()
    %78 = vector.shape_cast %77 : vector<4x8x16xf32> to vector<32x16xf32>
    %79 = arith.truncf %78 : vector<32x16xf32> to vector<32x16xbf16>
    %c1 = arith.constant 1 : index
    %c0_39 = arith.constant 0 : index
    %c0_40 = arith.constant 0 : index
    %80 = vector.load %arg8[%c1, %c0_39, %c0_40] : memref<8x16x128xbf16, #tpu.memory_space<vmem>>, vector<1x16x128xbf16>
    %81 = vector.shape_cast %80 : vector<1x16x128xbf16> to vector<16x128xbf16>
    %cst_41 = arith.constant dense<0.000000e+00> : vector<32x128xf32>
    %82 = tpu.matmul %79, %81, %cst_41 {dimension_numbers = #tpu.dot_dimension_numbers<[1], [0], [0], [1], [0, 0, 1, 1], [], []>} : vector<32x16xbf16>, vector<16x128xbf16>, vector<32x128xf32> -> vector<32x128xf32>
    %83 = arith.addf %74, %82 : vector<32x128xf32>
    %84 = vector.extract_strided_slice %64 {offsets = [8, 0, 0], sizes = [4, 8, 8], strides = [1, 1, 1]} : vector<32x8x8xbf16> to vector<4x8x8xbf16>
    %85 = vector.extract_strided_slice %16 {offsets = [0, 0, 32], sizes = [4, 8, 16], strides = [1, 1, 1]} : vector<4x8x128xbf16> to vector<4x8x16xbf16>
    "tpu.trace_start"() <{level = 10 : i32, message = "bqk,bkd->bqd"}> : () -> ()
    %cst_42 = arith.constant dense<0.000000e+00> : vector<4x8x16xf32>
    %86 = tpu.matmul %84, %85, %cst_42 {dimension_numbers = #tpu.dot_dimension_numbers<[2], [1], [1], [2], [0, 0, 0, 1, 1, 2], [0], [0]>} : vector<4x8x8xbf16>, vector<4x8x16xbf16>, vector<4x8x16xf32> -> vector<4x8x16xf32>
    "tpu.trace_stop"() : () -> ()
    %87 = vector.shape_cast %86 : vector<4x8x16xf32> to vector<32x16xf32>
    %88 = arith.truncf %87 : vector<32x16xf32> to vector<32x16xbf16>
    %c2 = arith.constant 2 : index
    %c0_43 = arith.constant 0 : index
    %c0_44 = arith.constant 0 : index
    %89 = vector.load %arg8[%c2, %c0_43, %c0_44] : memref<8x16x128xbf16, #tpu.memory_space<vmem>>, vector<1x16x128xbf16>
    %90 = vector.shape_cast %89 : vector<1x16x128xbf16> to vector<16x128xbf16>
    %cst_45 = arith.constant dense<0.000000e+00> : vector<32x128xf32>
    %91 = tpu.matmul %88, %90, %cst_45 {dimension_numbers = #tpu.dot_dimension_numbers<[1], [0], [0], [1], [0, 0, 1, 1], [], []>} : vector<32x16xbf16>, vector<16x128xbf16>, vector<32x128xf32> -> vector<32x128xf32>
    %92 = arith.addf %83, %91 : vector<32x128xf32>
    %93 = vector.extract_strided_slice %64 {offsets = [12, 0, 0], sizes = [4, 8, 8], strides = [1, 1, 1]} : vector<32x8x8xbf16> to vector<4x8x8xbf16>
    %94 = vector.extract_strided_slice %16 {offsets = [0, 0, 48], sizes = [4, 8, 16], strides = [1, 1, 1]} : vector<4x8x128xbf16> to vector<4x8x16xbf16>
    "tpu.trace_start"() <{level = 10 : i32, message = "bqk,bkd->bqd"}> : () -> ()
    %cst_46 = arith.constant dense<0.000000e+00> : vector<4x8x16xf32>
    %95 = tpu.matmul %93, %94, %cst_46 {dimension_numbers = #tpu.dot_dimension_numbers<[2], [1], [1], [2], [0, 0, 0, 1, 1, 2], [0], [0]>} : vector<4x8x8xbf16>, vector<4x8x16xbf16>, vector<4x8x16xf32> -> vector<4x8x16xf32>
    "tpu.trace_stop"() : () -> ()
    %96 = vector.shape_cast %95 : vector<4x8x16xf32> to vector<32x16xf32>
    %97 = arith.truncf %96 : vector<32x16xf32> to vector<32x16xbf16>
    %c3 = arith.constant 3 : index
    %c0_47 = arith.constant 0 : index
    %c0_48 = arith.constant 0 : index
    %98 = vector.load %arg8[%c3, %c0_47, %c0_48] : memref<8x16x128xbf16, #tpu.memory_space<vmem>>, vector<1x16x128xbf16>
    %99 = vector.shape_cast %98 : vector<1x16x128xbf16> to vector<16x128xbf16>
    %cst_49 = arith.constant dense<0.000000e+00> : vector<32x128xf32>
    %100 = tpu.matmul %97, %99, %cst_49 {dimension_numbers = #tpu.dot_dimension_numbers<[1], [0], [0], [1], [0, 0, 1, 1], [], []>} : vector<32x16xbf16>, vector<16x128xbf16>, vector<32x128xf32> -> vector<32x128xf32>
    %101 = arith.addf %92, %100 : vector<32x128xf32>
    %102 = vector.extract_strided_slice %64 {offsets = [16, 0, 0], sizes = [4, 8, 8], strides = [1, 1, 1]} : vector<32x8x8xbf16> to vector<4x8x8xbf16>
    %103 = vector.extract_strided_slice %16 {offsets = [0, 0, 64], sizes = [4, 8, 16], strides = [1, 1, 1]} : vector<4x8x128xbf16> to vector<4x8x16xbf16>
    "tpu.trace_start"() <{level = 10 : i32, message = "bqk,bkd->bqd"}> : () -> ()
    %cst_50 = arith.constant dense<0.000000e+00> : vector<4x8x16xf32>
    %104 = tpu.matmul %102, %103, %cst_50 {dimension_numbers = #tpu.dot_dimension_numbers<[2], [1], [1], [2], [0, 0, 0, 1, 1, 2], [0], [0]>} : vector<4x8x8xbf16>, vector<4x8x16xbf16>, vector<4x8x16xf32> -> vector<4x8x16xf32>
    "tpu.trace_stop"() : () -> ()
    %105 = vector.shape_cast %104 : vector<4x8x16xf32> to vector<32x16xf32>
    %106 = arith.truncf %105 : vector<32x16xf32> to vector<32x16xbf16>
    %c4 = arith.constant 4 : index
    %c0_51 = arith.constant 0 : index
    %c0_52 = arith.constant 0 : index
    %107 = vector.load %arg8[%c4, %c0_51, %c0_52] : memref<8x16x128xbf16, #tpu.memory_space<vmem>>, vector<1x16x128xbf16>
    %108 = vector.shape_cast %107 : vector<1x16x128xbf16> to vector<16x128xbf16>
    %cst_53 = arith.constant dense<0.000000e+00> : vector<32x128xf32>
    %109 = tpu.matmul %106, %108, %cst_53 {dimension_numbers = #tpu.dot_dimension_numbers<[1], [0], [0], [1], [0, 0, 1, 1], [], []>} : vector<32x16xbf16>, vector<16x128xbf16>, vector<32x128xf32> -> vector<32x128xf32>
    %110 = arith.addf %101, %109 : vector<32x128xf32>
    %111 = vector.extract_strided_slice %64 {offsets = [20, 0, 0], sizes = [4, 8, 8], strides = [1, 1, 1]} : vector<32x8x8xbf16> to vector<4x8x8xbf16>
    %112 = vector.extract_strided_slice %16 {offsets = [0, 0, 80], sizes = [4, 8, 16], strides = [1, 1, 1]} : vector<4x8x128xbf16> to vector<4x8x16xbf16>
    "tpu.trace_start"() <{level = 10 : i32, message = "bqk,bkd->bqd"}> : () -> ()
    %cst_54 = arith.constant dense<0.000000e+00> : vector<4x8x16xf32>
    %113 = tpu.matmul %111, %112, %cst_54 {dimension_numbers = #tpu.dot_dimension_numbers<[2], [1], [1], [2], [0, 0, 0, 1, 1, 2], [0], [0]>} : vector<4x8x8xbf16>, vector<4x8x16xbf16>, vector<4x8x16xf32> -> vector<4x8x16xf32>
    "tpu.trace_stop"() : () -> ()
    %114 = vector.shape_cast %113 : vector<4x8x16xf32> to vector<32x16xf32>
    %115 = arith.truncf %114 : vector<32x16xf32> to vector<32x16xbf16>
    %c5 = arith.constant 5 : index
    %c0_55 = arith.constant 0 : index
    %c0_56 = arith.constant 0 : index
    %116 = vector.load %arg8[%c5, %c0_55, %c0_56] : memref<8x16x128xbf16, #tpu.memory_space<vmem>>, vector<1x16x128xbf16>
    %117 = vector.shape_cast %116 : vector<1x16x128xbf16> to vector<16x128xbf16>
    %cst_57 = arith.constant dense<0.000000e+00> : vector<32x128xf32>
    %118 = tpu.matmul %115, %117, %cst_57 {dimension_numbers = #tpu.dot_dimension_numbers<[1], [0], [0], [1], [0, 0, 1, 1], [], []>} : vector<32x16xbf16>, vector<16x128xbf16>, vector<32x128xf32> -> vector<32x128xf32>
    %119 = arith.addf %110, %118 : vector<32x128xf32>
    %120 = vector.extract_strided_slice %64 {offsets = [24, 0, 0], sizes = [4, 8, 8], strides = [1, 1, 1]} : vector<32x8x8xbf16> to vector<4x8x8xbf16>
    %121 = vector.extract_strided_slice %16 {offsets = [0, 0, 96], sizes = [4, 8, 16], strides = [1, 1, 1]} : vector<4x8x128xbf16> to vector<4x8x16xbf16>
    "tpu.trace_start"() <{level = 10 : i32, message = "bqk,bkd->bqd"}> : () -> ()
    %cst_58 = arith.constant dense<0.000000e+00> : vector<4x8x16xf32>
    %122 = tpu.matmul %120, %121, %cst_58 {dimension_numbers = #tpu.dot_dimension_numbers<[2], [1], [1], [2], [0, 0, 0, 1, 1, 2], [0], [0]>} : vector<4x8x8xbf16>, vector<4x8x16xbf16>, vector<4x8x16xf32> -> vector<4x8x16xf32>
    "tpu.trace_stop"() : () -> ()
    %123 = vector.shape_cast %122 : vector<4x8x16xf32> to vector<32x16xf32>
    %124 = arith.truncf %123 : vector<32x16xf32> to vector<32x16xbf16>
    %c6 = arith.constant 6 : index
    %c0_59 = arith.constant 0 : index
    %c0_60 = arith.constant 0 : index
    %125 = vector.load %arg8[%c6, %c0_59, %c0_60] : memref<8x16x128xbf16, #tpu.memory_space<vmem>>, vector<1x16x128xbf16>
    %126 = vector.shape_cast %125 : vector<1x16x128xbf16> to vector<16x128xbf16>
    %cst_61 = arith.constant dense<0.000000e+00> : vector<32x128xf32>
    %127 = tpu.matmul %124, %126, %cst_61 {dimension_numbers = #tpu.dot_dimension_numbers<[1], [0], [0], [1], [0, 0, 1, 1], [], []>} : vector<32x16xbf16>, vector<16x128xbf16>, vector<32x128xf32> -> vector<32x128xf32>
    %128 = arith.addf %119, %127 : vector<32x128xf32>
    %129 = vector.extract_strided_slice %64 {offsets = [28, 0, 0], sizes = [4, 8, 8], strides = [1, 1, 1]} : vector<32x8x8xbf16> to vector<4x8x8xbf16>
    %130 = vector.extract_strided_slice %16 {offsets = [0, 0, 112], sizes = [4, 8, 16], strides = [1, 1, 1]} : vector<4x8x128xbf16> to vector<4x8x16xbf16>
    "tpu.trace_start"() <{level = 10 : i32, message = "bqk,bkd->bqd"}> : () -> ()
    %cst_62 = arith.constant dense<0.000000e+00> : vector<4x8x16xf32>
    %131 = tpu.matmul %129, %130, %cst_62 {dimension_numbers = #tpu.dot_dimension_numbers<[2], [1], [1], [2], [0, 0, 0, 1, 1, 2], [0], [0]>} : vector<4x8x8xbf16>, vector<4x8x16xbf16>, vector<4x8x16xf32> -> vector<4x8x16xf32>
    "tpu.trace_stop"() : () -> ()
    %132 = vector.shape_cast %131 : vector<4x8x16xf32> to vector<32x16xf32>
    %133 = arith.truncf %132 : vector<32x16xf32> to vector<32x16xbf16>
    %c7 = arith.constant 7 : index
    %c0_63 = arith.constant 0 : index
    %c0_64 = arith.constant 0 : index
    %134 = vector.load %arg8[%c7, %c0_63, %c0_64] : memref<8x16x128xbf16, #tpu.memory_space<vmem>>, vector<1x16x128xbf16>
    %135 = vector.shape_cast %134 : vector<1x16x128xbf16> to vector<16x128xbf16>
    %cst_65 = arith.constant dense<0.000000e+00> : vector<32x128xf32>
    %136 = tpu.matmul %133, %135, %cst_65 {dimension_numbers = #tpu.dot_dimension_numbers<[1], [0], [0], [1], [0, 0, 1, 1], [], []>} : vector<32x16xbf16>, vector<16x128xbf16>, vector<32x128xf32> -> vector<32x128xf32>
    %137 = arith.addf %128, %136 : vector<32x128xf32>
    %c0_66 = arith.constant 0 : index
    %c0_67 = arith.constant 0 : index
    %138 = vector.load %arg9[%c0_66, %c0_67] : memref<1x128xf32, #tpu.memory_space<vmem>>, vector<1x128xf32>
    %139 = vector.broadcast %138 : vector<1x128xf32> to vector<32x128xf32>
    %140 = arith.addf %137, %139 : vector<32x128xf32>
    %141 = arith.addf %140, %5 : vector<32x128xf32>
    %c0_68 = arith.constant 0 : index
    %c0_69 = arith.constant 0 : index
    %142 = vector.load %arg10[%c0_68, %c0_69] : memref<1x128xf32, #tpu.memory_space<vmem>>, vector<1x128xf32>
    %c0_70 = arith.constant 0 : index
    %c0_71 = arith.constant 0 : index
    %143 = vector.load %arg11[%c0_70, %c0_71] : memref<1x128xf32, #tpu.memory_space<vmem>>, vector<1x128xf32>
    %cst_72 = arith.constant dense<0.000000e+00> : vector<32xf32>
    %144 = vector.multi_reduction <add>, %141, %cst_72 [1] : vector<32x128xf32> to vector<32xf32>
    %145 = vector.shape_cast %144 : vector<32xf32> to vector<32x1xf32>
    %cst_73 = arith.constant 1.280000e+02 : f32
    %146 = vector.broadcast %cst_73 : f32 to vector<32x1xf32>
    %147 = arith.divf %145, %146 : vector<32x1xf32>
    %148 = vector.broadcast %147 : vector<32x1xf32> to vector<32x128xf32>
    %149 = arith.subf %141, %148 : vector<32x128xf32>
    %150 = arith.mulf %149, %149 : vector<32x128xf32>
    %cst_74 = arith.constant dense<0.000000e+00> : vector<32xf32>
    %151 = vector.multi_reduction <add>, %150, %cst_74 [1] : vector<32x128xf32> to vector<32xf32>
    %152 = vector.shape_cast %151 : vector<32xf32> to vector<32x1xf32>
    %cst_75 = arith.constant 1.280000e+02 : f32
    %153 = vector.broadcast %cst_75 : f32 to vector<32x1xf32>
    %154 = arith.divf %152, %153 : vector<32x1xf32>
    %155 = vector.broadcast %147 : vector<32x1xf32> to vector<32x128xf32>
    %156 = arith.subf %141, %155 : vector<32x128xf32>
    %cst_76 = arith.constant 9.99999974E-6 : f32
    %157 = vector.broadcast %cst_76 : f32 to vector<32x1xf32>
    %158 = arith.addf %154, %157 : vector<32x1xf32>
    %159 = math.rsqrt %158 : vector<32x1xf32>
    %160 = vector.broadcast %159 : vector<32x1xf32> to vector<32x128xf32>
    %161 = arith.mulf %156, %160 : vector<32x128xf32>
    %162 = vector.broadcast %142 : vector<1x128xf32> to vector<32x128xf32>
    %163 = arith.mulf %161, %162 : vector<32x128xf32>
    %164 = vector.broadcast %143 : vector<1x128xf32> to vector<32x128xf32>
    %165 = arith.addf %163, %164 : vector<32x128xf32>
    %166 = arith.truncf %165 : vector<32x128xf32> to vector<32x128xbf16>
    %c0_77 = arith.constant 0 : index
    %c0_78 = arith.constant 0 : index
    %167 = vector.load %arg14[%c0_77, %c0_78] : memref<128x512xbf16, #tpu.memory_space<vmem>>, vector<128x512xbf16>
    %cst_79 = arith.constant dense<0.000000e+00> : vector<32x512xf32>
    %168 = tpu.matmul %166, %167, %cst_79 {dimension_numbers = #tpu.dot_dimension_numbers<[1], [0], [0], [1], [0, 0, 1, 1], [], []>} : vector<32x128xbf16>, vector<128x512xbf16>, vector<32x512xf32> -> vector<32x512xf32>
    %c0_80 = arith.constant 0 : index
    %c0_81 = arith.constant 0 : index
    %169 = vector.load %arg15[%c0_80, %c0_81] : memref<1x512xf32, #tpu.memory_space<vmem>>, vector<1x512xf32>
    %170 = vector.broadcast %169 : vector<1x512xf32> to vector<32x512xf32>
    %171 = arith.addf %168, %170 : vector<32x512xf32>
    %cst_82 = arith.constant 0.000000e+00 : f32
    %172 = vector.broadcast %cst_82 : f32 to vector<32x512xf32>
    %173 = arith.maximumf %171, %172 : vector<32x512xf32>
    %174 = arith.truncf %173 : vector<32x512xf32> to vector<32x512xbf16>
    %c0_83 = arith.constant 0 : index
    %c0_84 = arith.constant 0 : index
    %175 = vector.load %arg16[%c0_83, %c0_84] : memref<512x128xbf16, #tpu.memory_space<vmem>>, vector<512x128xbf16>
    %cst_85 = arith.constant dense<0.000000e+00> : vector<32x128xf32>
    %176 = tpu.matmul %174, %175, %cst_85 {dimension_numbers = #tpu.dot_dimension_numbers<[1], [0], [0], [1], [0, 0, 1, 1], [], []>} : vector<32x512xbf16>, vector<512x128xbf16>, vector<32x128xf32> -> vector<32x128xf32>
    %c0_86 = arith.constant 0 : index
    %c0_87 = arith.constant 0 : index
    %177 = vector.load %arg17[%c0_86, %c0_87] : memref<1x128xf32, #tpu.memory_space<vmem>>, vector<1x128xf32>
    %178 = vector.broadcast %177 : vector<1x128xf32> to vector<32x128xf32>
    %179 = arith.addf %176, %178 : vector<32x128xf32>
    %180 = arith.addf %179, %165 : vector<32x128xf32>
    %c0_88 = arith.constant 0 : index
    %c0_89 = arith.constant 0 : index
    %181 = vector.load %arg12[%c0_88, %c0_89] : memref<1x128xf32, #tpu.memory_space<vmem>>, vector<1x128xf32>
    %c0_90 = arith.constant 0 : index
    %c0_91 = arith.constant 0 : index
    %182 = vector.load %arg13[%c0_90, %c0_91] : memref<1x128xf32, #tpu.memory_space<vmem>>, vector<1x128xf32>
    %cst_92 = arith.constant dense<0.000000e+00> : vector<32xf32>
    %183 = vector.multi_reduction <add>, %180, %cst_92 [1] : vector<32x128xf32> to vector<32xf32>
    %184 = vector.shape_cast %183 : vector<32xf32> to vector<32x1xf32>
    %cst_93 = arith.constant 1.280000e+02 : f32
    %185 = vector.broadcast %cst_93 : f32 to vector<32x1xf32>
    %186 = arith.divf %184, %185 : vector<32x1xf32>
    %187 = vector.broadcast %186 : vector<32x1xf32> to vector<32x128xf32>
    %188 = arith.subf %180, %187 : vector<32x128xf32>
    %189 = arith.mulf %188, %188 : vector<32x128xf32>
    %cst_94 = arith.constant dense<0.000000e+00> : vector<32xf32>
    %190 = vector.multi_reduction <add>, %189, %cst_94 [1] : vector<32x128xf32> to vector<32xf32>
    %191 = vector.shape_cast %190 : vector<32xf32> to vector<32x1xf32>
    %cst_95 = arith.constant 1.280000e+02 : f32
    %192 = vector.broadcast %cst_95 : f32 to vector<32x1xf32>
    %193 = arith.divf %191, %192 : vector<32x1xf32>
    %194 = vector.broadcast %186 : vector<32x1xf32> to vector<32x128xf32>
    %195 = arith.subf %180, %194 : vector<32x128xf32>
    %cst_96 = arith.constant 9.99999974E-6 : f32
    %196 = vector.broadcast %cst_96 : f32 to vector<32x1xf32>
    %197 = arith.addf %193, %196 : vector<32x1xf32>
    %198 = math.rsqrt %197 : vector<32x1xf32>
    %199 = vector.broadcast %198 : vector<32x1xf32> to vector<32x128xf32>
    %200 = arith.mulf %195, %199 : vector<32x128xf32>
    %201 = vector.broadcast %181 : vector<1x128xf32> to vector<32x128xf32>
    %202 = arith.mulf %200, %201 : vector<32x128xf32>
    %203 = vector.broadcast %182 : vector<1x128xf32> to vector<32x128xf32>
    %204 = arith.addf %202, %203 : vector<32x128xf32>
    %205 = arith.truncf %204 : vector<32x128xf32> to vector<32x128xbf16>
    %c0_97 = arith.constant 0 : index
    %c0_98 = arith.constant 0 : index
    %206 = vector.load %arg18[%c0_97, %c0_98] : memref<128x128xbf16, #tpu.memory_space<vmem>>, vector<128x128xbf16>
    %cst_99 = arith.constant dense<0.000000e+00> : vector<32x128xf32>
    %207 = tpu.matmul %205, %206, %cst_99 {dimension_numbers = #tpu.dot_dimension_numbers<[1], [0], [0], [1], [0, 0, 1, 1], [], []>} : vector<32x128xbf16>, vector<128x128xbf16>, vector<32x128xf32> -> vector<32x128xf32>
    %c0_100 = arith.constant 0 : index
    %c0_101 = arith.constant 0 : index
    %208 = vector.load %arg19[%c0_100, %c0_101] : memref<1x128xf32, #tpu.memory_space<vmem>>, vector<1x128xf32>
    %209 = vector.broadcast %208 : vector<1x128xf32> to vector<32x128xf32>
    %210 = arith.addf %207, %209 : vector<32x128xf32>
    %211 = vector.shape_cast %210 : vector<32x128xf32> to vector<4x8x128xf32>
    %c0_102 = arith.constant 0 : index
    %c0_103 = arith.constant 0 : index
    %c0_104 = arith.constant 0 : index
    %212 = vector.load %arg20[%c0_102, %c0_103, %c0_104] : memref<4x8x128xf32, #tpu.memory_space<vmem>>, vector<4x8x128xf32>
    tpu.vector_store %arg20[%c0_102, %c0_103, %c0_104], %211 {strides = array<i32>} : memref<4x8x128xf32, #tpu.memory_space<vmem>>, vector<4x8x128xf32>,
    return
  }
  func.func @transform_0(%arg0: i32) -> (i32, i32, i32) {
    %c0_i32 = arith.constant 0 : i32
    %c0_i32_0 = arith.constant 0 : i32
    %c0_i32_1 = arith.constant 0 : i32
    return %arg0, %c0_i32, %c0_i32_0 : i32, i32, i32
  }
  func.func @transform_1(%arg0: i32) -> (i32, i32, i32) {
    %c0_i32 = arith.constant 0 : i32
    %c0_i32_0 = arith.constant 0 : i32
    %c0_i32_1 = arith.constant 0 : i32
    return %arg0, %c0_i32, %c0_i32_0 : i32, i32, i32
  }
  func.func @transform_2(%arg0: i32) -> (i32, i32, i32) {
    %c0_i32 = arith.constant 0 : i32
    %c0_i32_0 = arith.constant 0 : i32
    %c0_i32_1 = arith.constant 0 : i32
    return %arg0, %c0_i32, %c0_i32_0 : i32, i32, i32
  }
  func.func @transform_3(%arg0: i32) -> (i32, i32, i32) {
    %c0_i32 = arith.constant 0 : i32
    %c0_i32_0 = arith.constant 0 : i32
    %c0_i32_1 = arith.constant 0 : i32
    return %arg0, %c0_i32, %c0_i32_0 : i32, i32, i32
  }
  func.func @transform_4(%arg0: i32) -> (i32, i32) {
    %c0_i32 = arith.constant 0 : i32
    %c0_i32_0 = arith.constant 0 : i32
    %c0_i32_1 = arith.constant 0 : i32
    return %c0_i32, %c0_i32_0 : i32, i32
  }
  func.func @transform_5(%arg0: i32) -> (i32, i32) {
    %c0_i32 = arith.constant 0 : i32
    %c0_i32_0 = arith.constant 0 : i32
    %c0_i32_1 = arith.constant 0 : i32
    return %c0_i32, %c0_i32_0 : i32, i32
  }
  func.func @transform_6(%arg0: i32) -> (i32, i32) {
    %c0_i32 = arith.constant 0 : i32
    %c0_i32_0 = arith.constant 0 : i32
    %c0_i32_1 = arith.constant 0 : i32
    return %c0_i32, %c0_i32_0 : i32, i32
  }
  func.func @transform_7(%arg0: i32) -> (i32, i32, i32) {
    %c0_i32 = arith.constant 0 : i32
    %c0_i32_0 = arith.constant 0 : i32
    %c0_i32_1 = arith.constant 0 : i32
    %c0_i32_2 = arith.constant 0 : i32
    return %c0_i32, %c0_i32_0, %c0_i32_1 : i32, i32, i32
  }
  func.func @transform_8(%arg0: i32) -> (i32, i32) {
    %c0_i32 = arith.constant 0 : i32
    %c0_i32_0 = arith.constant 0 : i32
    %c0_i32_1 = arith.constant 0 : i32
    return %c0_i32, %c0_i32_0 : i32, i32
  }
  func.func @transform_9(%arg0: i32) -> (i32, i32) {
    %c0_i32 = arith.constant 0 : i32
    %c0_i32_0 = arith.constant 0 : i32
    %c0_i32_1 = arith.constant 0 : i32
    return %c0_i32, %c0_i32_0 : i32, i32
  }
  func.func @transform_10(%arg0: i32) -> (i32, i32) {
    %c0_i32 = arith.constant 0 : i32
    %c0_i32_0 = arith.constant 0 : i32
    %c0_i32_1 = arith.constant 0 : i32
    return %c0_i32, %c0_i32_0 : i32, i32
  }
  func.func @transform_11(%arg0: i32) -> (i32, i32) {
    %c0_i32 = arith.constant 0 : i32
    %c0_i32_0 = arith.constant 0 : i32
    %c0_i32_1 = arith.constant 0 : i32
    return %c0_i32, %c0_i32_0 : i32, i32
  }
  func.func @transform_12(%arg0: i32) -> (i32, i32) {
    %c0_i32 = arith.constant 0 : i32
    %c0_i32_0 = arith.constant 0 : i32
    %c0_i32_1 = arith.constant 0 : i32
    return %c0_i32, %c0_i32_0 : i32, i32
  }
  func.func @transform_13(%arg0: i32) -> (i32, i32) {
    %c0_i32 = arith.constant 0 : i32
    %c0_i32_0 = arith.constant 0 : i32
    %c0_i32_1 = arith.constant 0 : i32
    return %c0_i32, %c0_i32_0 : i32, i32
  }
  func.func @transform_14(%arg0: i32) -> (i32, i32) {
    %c0_i32 = arith.constant 0 : i32
    %c0_i32_0 = arith.constant 0 : i32
    %c0_i32_1 = arith.constant 0 : i32
    return %c0_i32, %c0_i32_0 : i32, i32
  }
  func.func @transform_15(%arg0: i32) -> (i32, i32) {
    %c0_i32 = arith.constant 0 : i32
    %c0_i32_0 = arith.constant 0 : i32
    %c0_i32_1 = arith.constant 0 : i32
    return %c0_i32, %c0_i32_0 : i32, i32
  }
  func.func @transform_16(%arg0: i32) -> (i32, i32) {
    %c0_i32 = arith.constant 0 : i32
    %c0_i32_0 = arith.constant 0 : i32
    %c0_i32_1 = arith.constant 0 : i32
    return %c0_i32, %c0_i32_0 : i32, i32
  }
  func.func @transform_17(%arg0: i32) -> (i32, i32) {
    %c0_i32 = arith.constant 0 : i32
    %c0_i32_0 = arith.constant 0 : i32
    %c0_i32_1 = arith.constant 0 : i32
    return %c0_i32, %c0_i32_0 : i32, i32
  }
  func.func @transform_18(%arg0: i32) -> (i32, i32) {
    %c0_i32 = arith.constant 0 : i32
    %c0_i32_0 = arith.constant 0 : i32
    %c0_i32_1 = arith.constant 0 : i32
    return %c0_i32, %c0_i32_0 : i32, i32
  }
  func.func @transform_19(%arg0: i32) -> (i32, i32, i32) {
    %c0_i32 = arith.constant 0 : i32
    %c0_i32_0 = arith.constant 0 : i32
    %c0_i32_1 = arith.constant 0 : i32
    return %arg0, %c0_i32, %c0_i32_0 : i32, i32, i32
  }
}

</mosaic_0001>

<bundles_post_ra>
// kernel: tpu_custom_call.1
= control target key start
LH: loop header
LB: loop body
LE: loop exit
PB: predicated region body
PF: predicated region fallthrough
CT: control target
= control target key end

     0   :  { %s7213_s0 = inlined_call_operand.hbm [shape: f32[8,8,128], index: 0, kind: input, shape index: {}]   ;;  %s7214_s1 = inlined_call_operand.hbm [shape: f32[8,8,128], index: 1, kind: input, shape index: {}]   ;;  %s7215_s2 = inlined_call_operand.hbm [shape: f32[8,8,128], index: 2, kind: input, shape index: {}]   ;;  %s7216_s3 = inlined_call_operand.hbm [shape: f32[8,8,8], index: 3, kind: input, shape index: {}]   ;;  %s7217_s4 = inlined_call_operand.hbm [shape: bf16[128,128], index: 4, kind: input, shape index: {}]   ;;  %s7218_s5 = inlined_call_operand.hbm [shape: bf16[128,128], index: 5, kind: input, shape index: {}]   ;;  %s7219_s6 = inlined_call_operand.hbm [shape: bf16[128,128], index: 6, kind: input, shape index: {}]   ;;  %s7220_s7 = inlined_call_operand.hbm [shape: bf16[8,16,128], index: 7, kind: input, shape index: {}]   ;;  %s7221_s8 = inlined_call_operand.vmem [shape: f32[1,128], index: 8, kind: input, shape index: {}]   ;;  %s7222_s9 = inlined_call_operand.vmem [shape: f32[1,128], index: 9, kind: input, shape index: {}]   ;;  %s7223_s10 = inlined_call_operand.vmem [shape: f32[1,128], index: 10, kind: input, shape index: {}]   ;;  %s7224_s11 = inlined_call_operand.vmem [shape: f32[1,128], index: 11, kind: input, shape index: {}]   ;;  %s7225_s12 = inlined_call_operand.vmem [shape: f32[1,128], index: 12, kind: input, shape index: {}]   ;;  %s7226_s13 = inlined_call_operand.hbm [shape: bf16[128,512], index: 13, kind: input, shape index: {}]   ;;  %s7227_s14 = inlined_call_operand.vmem [shape: f32[1,512], index: 14, kind: input, shape index: {}]   ;;  %s7228_s15 = inlined_call_operand.hbm [shape: bf16[512,128], index: 15, kind: input, shape index: {}]   ;;  %s7229_s16 = inlined_call_operand.vmem [shape: f32[1,128], index: 16, kind: input, shape index: {}]   ;;  %s7230_s17 = inlined_call_operand.hbm [shape: bf16[128,128], index: 17, kind: input, shape index: {}]   ;;  %s7231_s18 = inlined_call_operand.vmem [shape: f32[1,128], index: 18, kind: input, shape index: {}]   ;;  %s7232_s19 = inlined_call_operand.hbm [shape: f32[8,8,128], index: 19, kind: output, shape index: {}]  }
   0x1   :  { %7256 = sst [smem:[#allocation34_spill]] %s7213_s0 }
   0x2   :  { %7257 = sst [smem:[#allocation35_spill]] %s7214_s1 }
   0x3   :  { %7258 = sst [smem:[#allocation36_spill]] %s7215_s2 }
   0x4   :  { %7259 = sst [smem:[#allocation37_spill]] %s7216_s3 }
   0x5   :  { %7260 = sst [smem:[#allocation38_spill]] %s7217_s4 }
   0x6   :  { %7261 = sst [smem:[#allocation39_spill]] %s7218_s5 }
   0x7   :  { %7262 = sst [smem:[#allocation40_spill]] %s7219_s6 }
   0x8   :  { %7263 = sst [smem:[#allocation41_spill]] %s7220_s7 }
   0x9   :  { %7264 = sst [smem:[#allocation42_spill]] %s7224_s11 }
   0xa   :  { %7265 = sst [smem:[#allocation43_spill]] %s7225_s12 }
   0xb   :  { %7266 = sst [smem:[#allocation44_spill]] %s7226_s13 }
   0xc   :  { %7267 = sst [smem:[#allocation45_spill]] %s7227_s14 }
   0xd   :  { %7268 = sst [smem:[#allocation46_spill]] %s7228_s15 }
   0xe   :  { %7269 = sst [smem:[#allocation47_spill]] %s7229_s16 }
   0xf   :  { %7270 = sst [smem:[#allocation48_spill]] %s7231_s18 }
  0x10   :  { %7271 = sst [smem:[#allocation49_spill]] %s7232_s19 }
  0x11   :  { %24 = vsyncpa [#allocation3], 0 }
  0x12   :  { %26 = vsyncpa [#allocation3 + $0x1], 0 }
  0x13   :  { %27 = vsyncpa [#allocation6], 0 }
  0x14   :  { %29 = vsyncpa [#allocation6 + $0x1], 0 }
  0x15   :  { %30 = vsyncpa [#allocation9], 0 }
  0x16   :  { %32 = vsyncpa [#allocation9 + $0x1], 0 }
  0x17   :  { %33 = vsyncpa [#allocation12], 0 }
  0x18   :  { %34 = vsyncpa [#allocation15], 0 }
  0x19   :  { %35 = vsyncpa [#allocation18], 0 }
  0x1a   :  { %36 = vsyncpa [#allocation4], 0 }
  0x1b   :  { %38 = vsyncpa [#allocation4 + $0x1], 0  ;;  %s5974_s0 = smov 0   ;;  %s5976_s30 = smov 0  }
  0x1c   :  { %s5978_s20 = smov 0   ;;  %s5980_s21 = smov 0  }
  0x1d LB: > { %7272 = sst [smem:[#allocation29_spill]] %s5836_s0  ;;  %s5998_s23 = sadd.s32 4294967295, %s5848_s21   ;;  %s5848_s21 = sphi %s5980_s21, %s7317_s21   ;;  %s5844_s20 = sphi %s5978_s20, %s7321_s20   ;;  %s5840_s30 = sphi %s5976_s30, %s7320_s30   ;;  %s5836_s0 = sphi %s5974_s0, %s7319_s0  }
  0x1e   : > { %s7273_s4 = sld [smem:[#allocation38_spill]]  ;;  %p4478_p0 = scmp.ge.s32.totalorder %s5848_s21, 1 }
  0x1f   : > { %p7249_p1 = scmp.eq.s32.totalorder %s5998_s23, 0  ;;  %p494_p2 = scmp.lt.s32.totalorder %s5848_s21, 3 }
  0x20   : > { %s5850_s25 = smov [#allocation10]   ;;  %s7275_s5 = sld [smem:[#allocation39_spill]] }
  0x21   : > { %p6003_p3 = pnand %p4478_p0, %p494_p2  ;;  %s507_s3 = sshll.u32 %s5850_s25, 4  ;;  %s508_s3 = int_to_ptr.vmem [resolvable:$true] %s507_s3 }
  0x22   : > { %s7277_s7 = sld [smem:[#allocation41_spill]]  ;;  %s7238_s18 = smov 64  }
  0x23   : > { %p5160_p4 = pneg %p6003_p3  ;;  %s7240_s26 = smov 4  }
  0x24   : > { %s505_s2 = sshll.u32 %s7273_s4, 4  ;;  %s5851_s4 = smov [#allocation11]   ;;  %s506_s2 = int_to_ptr.hbm [resolvable:$true] %s505_s2 }
  0x25   : > { %p6015_p6 = pnand %p5160_p4, %p7249_p1  ;;  %s521_s19 = sshll.u32 %s5851_s4, 4  ;;  %s522_s19 = int_to_ptr.vmem [resolvable:$true] %s521_s19 }
  0x26   : > { %s519_s28 = sshll.u32 %s7275_s5, 4  ;;  %s7278_s15 = sld [smem:[#allocation46_spill]]  ;;  %s520_s28 = int_to_ptr.hbm [resolvable:$true] %s519_s28 }
  0x27   : > { %5163 = dma.hbm_to_vmem [thread:$0]  (!%p6015_p6), %s506_s2, 1024, %s508_s3, [#allocation9], %s7238_s18, %s7238_s18, %s7240_s26  }
  0x28   : > { %s547_s25 = sshll.u32 %s7277_s7, 4  ;;  %s5854_s22 = smov [#allocation14]   ;;  %s548_s25 = int_to_ptr.hbm [resolvable:$true] %s547_s25 }
  0x29   : > { %5166 = dma.hbm_to_vmem [thread:$0]  (!%p6015_p6), %s520_s28, 1024, %s522_s19, [#allocation12], %s7238_s18, %s7238_s18, %s7240_s26  }
  0x2a   : > { %s549_s2 = sshll.u32 %s5854_s22, 4  ;;  %s5855_s19 = smov [#allocation17]   ;;  %s550_s2 = int_to_ptr.vmem [resolvable:$true] %s549_s2 }
  0x2b   : > { %5172 = dma.hbm_to_vmem [thread:$0]  (!%p6015_p6), %s548_s25, 1024, %s550_s2, [#allocation15], %s7238_s18, %s7238_s18, %s7240_s26  }
  0x2c   : > { %s593_s1 = sshll.u32 %s7278_s15, 4  ;;  %s595_s3 = sshll.u32 %s5855_s19, 4  ;;  %s594_s1 = int_to_ptr.hbm [resolvable:$true] %s593_s1  ;;  %s596_s3 = int_to_ptr.vmem [resolvable:$true] %s595_s3 }
  0x2d   : > { %5178 = dma.hbm_to_vmem [thread:$0]  (!%p6015_p6), %s594_s1, 4096, %s596_s3, [#allocation18], %s7238_s18, %s7238_s18, %s7240_s26  }
  0x2e   : > { %s4477_s28 = sadd.s32 4294967294, %s5848_s21   ;;  %s6047_s4 = sadd.s32 1, %s5848_s21  }
  0x2f   : > { %7279 = sst [smem:[#allocation30_spill]] %s6047_s4  ;;  %s48_s27 = ssub.s32 %s5848_s21, %s6047_s4 }
  0x30   : > { %s51_s22 = sadd.s32 1, %s5844_s20  ;;  %p49_p7 = scmp.eq.s32.totalorder %s48_s27, 0 }
  0x31   : > { %p58_p8 = scmp.ne.s32.totalorder %s5844_s20, %s5840_s30  ;;  %p59_p9 = scmp.eq.s32.totalorder %s5848_s21, 0 }
  0x32   : > { %p64_p10 = scmp.ne.s32.totalorder %s5840_s30, %s5836_s0  ;;  %p481_p13 = scmp.eq.s32.totalorder %s5998_s23, 1 }
  0x33   : > { %s6058_s25 = scalar_select %p49_p7, %s5844_s20, %s51_s22  }
  0x34   : > { %p60_p11 = por %p59_p9, %p58_p8  ;;  %p6062_p12 = por %p7249_p1, %p64_p10 }
  0x35   : > { %7280 = sst [smem:[#allocation31_spill]] %s6058_s25  ;;  %p487_p0 = scmp.eq.s32.totalorder %s4477_s28, 1 }
  0x36   : > { %p5206_p2 = scmp.lt.s32.totalorder %s5848_s21, 2  ;;  %s7245_s1 = sand.u32 1, %s5844_s20  }
  0x37   : > { %p6069_p4 = por %p481_p13, %p58_p8  ;;  %p6073_p5 = por %p487_p0, %p64_p10 }
  0x38   : > { %s6079_s27 = sshll.u32 %s7245_s1, 5  ;;  %s6082_s22 = sshll.u32 %s5848_s21, 5 }
  0x39   : > { %s7282_s19 = scalar_select %p6069_p4, 1, 0 }
  0x3a   : > { %s7284_s3 = scalar_select %p6073_p5, 1, 0 }
  0x3b   : > { %7283 = sst [smem:[#allocation32_spill]] %s7282_s19  ;;  %p6084_p7 = pnand %p5206_p2, %p60_p11 }
  0x3c   : > { %7285 = sst [smem:[#allocation33_spill]] %s7284_s3  ;;  %s7250_s28 = sand.u32 1, %s5848_s21  }
  0x3d   : > { %s7287_s7 = sld [smem:[#allocation35_spill]]  ;;  %s655_s4 = scalar_lea.vmem [#allocation5], %s6079_s27 }
  0x3e   : > { %s663_s3 = sshll.u32 %s655_s4, 4  ;;  %s6096_s1 = scalar_lea.sflag [#allocation6], %s7250_s28  ;;  %s664_s3 = int_to_ptr.vmem [resolvable:$true] %s663_s3 }
  0x3f   : > { %p5552_p9 = pneg %p6084_p7 }
  0x43   : > { %s660_s15 = scalar_lea.hbm %s7287_s7, %s6082_s22 }
  0x44   : > { %s661_s25 = sshll.u32 %s660_s15, 4  ;;  %s5555_s15 = scalar_lea.hbm %s7287_s7, 64  ;;  %s662_s25 = int_to_ptr.hbm [resolvable:$true] %s661_s25 }
  0x45   : > { %s5548_s0 = sshra.s32 %s662_s25, 4  ;;  %s5549_s0 = int_to_ptr.hbm [resolvable:$true] %s5548_s0 }
  0x46   : > { %s5550_s19 = scalar_lea.hbm %s5549_s0, 32  ;;  %p5556_p13 = scmp.lt.s32.totalorder %s5549_s0, %s7287_s7 }
  0x47   : > { %p5551_p8 = scmp.ne.s32.totalorder %s5549_s0, %s5550_s19  ;;  %p5557_p0 = scmp.lt.s32.totalorder %s5555_s15, %s5550_s19 }
  0x49   : > { %p5553_p10 = pnand %p5552_p9, %p5551_p8  ;;  %p5558_p2 = por %p5557_p0, %p5556_p13 }
  0x4b   : > { %p5554_p11 = pneg %p5553_p10 }
  0x4d   : > { %p5559_p1 = pnand %p5558_p2, %p5554_p11 }
  0x4f   : > { %5562 = shalt.err (!%p5559_p1)
}
  0x50   : > { %s7252_s28 = smov 128   ;;  %s7254_s11 = smov 8  }
  0x51   : > { %5188 = dma.hbm_to_vmem [thread:$0]  (!%p6084_p7), %s662_s25, 512, %s664_s3, %s6096_s1, %s7252_s28, %s7252_s28, %s7254_s11  }
  0x52   : > { %s7288_s6 = sld [smem:[#allocation40_spill]]  ;;  %s5858_s0 = smov [#allocation13]  }
  0x53   : > { %s535_s19 = sshll.u32 %s5858_s0, 4  ;;  %s7289_s13 = sld [smem:[#allocation44_spill]]  ;;  %s536_s19 = int_to_ptr.vmem [resolvable:$true] %s535_s19 }
  0x54   : > { %s7290_s16 = smov 4   ;;  %s7291_s14 = smov 64  }
  0x55   : > { %s5859_s25 = smov [#allocation16]   ;;  %s610_s0 = sshll.u32 %s7230_s17, 4  ;;  %s611_s0 = int_to_ptr.hbm [resolvable:$true] %s610_s0 }
  0x56   : > { %s578_s3 = sshll.u32 %s5859_s25, 4  ;;  %s5860_s15 = smov 256   ;;  %s579_s3 = int_to_ptr.vmem [resolvable:$true] %s578_s3 }
  0x57   : > { %s5861_s4 = smov 16   ;;  %s5862_s28 = smov [#allocation19]  }
  0x58   : > { %s533_s12 = sshll.u32 %s7288_s6, 4  ;;  %s612_s11 = sshll.u32 %s5862_s28, 4  ;;  %s534_s12 = int_to_ptr.hbm [resolvable:$true] %s533_s12  ;;  %s613_s11 = int_to_ptr.vmem [resolvable:$true] %s612_s11 }
  0x59   : > { %s576_s7 = sshll.u32 %s7289_s13, 4  ;;  %s7292_s25 = sld [smem:[#allocation34_spill]]  ;;  %s577_s7 = int_to_ptr.hbm [resolvable:$true] %s576_s7 }
  0x5a   : > { %5169 = dma.hbm_to_vmem [thread:$0]  (!%p6015_p6), %s534_s12, 1024, %s536_s19, [#allocation12], %s7291_s14, %s7291_s14, %s7290_s16  }
  0x5b   : > { %5175 = dma.hbm_to_vmem [thread:$0]  (!%p6015_p6), %s577_s7, 4096, %s579_s3, [#allocation15], %s5860_s15, %s5860_s15, %s5861_s4  }
  0x5c   : > { %5181 = dma.hbm_to_vmem [thread:$0]  (!%p6015_p6), %s611_s0, 1024, %s613_s11, [#allocation18], %s7291_s14, %s7291_s14, %s7290_s16  }
  0x5d   : > { %s633_s26 = scalar_lea.vmem [#allocation2], %s6079_s27  ;;  %s7293_s7 = sand.u32 1, %s5844_s20  }
  0x5e   : > { %s641_s6 = sshll.u32 %s633_s26, 4  ;;  %s630_s3 = scalar_lea.sflag [#allocation3], %s7293_s7  ;;  %s642_s6 = int_to_ptr.vmem [resolvable:$true] %s641_s6 }
  0x5f   : > { %s638_s5 = scalar_lea.hbm %s7292_s25, %s6082_s22  ;;  %s5675_s16 = scalar_lea.hbm %s7292_s25, 64 }
  0x60   : > { %s639_s13 = sshll.u32 %s638_s5, 4  ;;  %s640_s13 = int_to_ptr.hbm [resolvable:$true] %s639_s13 }
  0x61   : > { %s5668_s15 = sshra.s32 %s640_s13, 4  ;;  %s5669_s15 = int_to_ptr.hbm [resolvable:$true] %s5668_s15 }
  0x62   : > { %s5670_s28 = scalar_lea.hbm %s5669_s15, 32  ;;  %p5676_p6 = scmp.lt.s32.totalorder %s5669_s15, %s7292_s25 }
  0x63   : > { %p5671_p1 = scmp.ne.s32.totalorder %s5669_s15, %s5670_s28  ;;  %p5677_p11 = scmp.lt.s32.totalorder %s5675_s16, %s5670_s28 }
  0x65   : > { %p5673_p8 = pnand %p5671_p1, %p5552_p9  ;;  %p5678_p13 = por %p5677_p11, %p5676_p6 }
  0x67   : > { %p5674_p10 = pneg %p5673_p8 }
  0x69   : > { %p5679_p0 = pnand %p5678_p13, %p5674_p10 }
  0x6b   : > { %5682 = shalt.err (!%p5679_p0)
}
  0x6c   : > { %s7294_s4 = smov 8   ;;  %s7295_s12 = smov 128  }
  0x6d   : > { %5185 = dma.hbm_to_vmem [thread:$0]  (!%p6084_p7), %s640_s13, 512, %s642_s6, %s630_s3, %s7295_s12, %s7295_s12, %s7294_s4  }
  0x6e   : > { %s7296_s26 = sld [smem:[#allocation36_spill]]  ;;  %s677_s11 = scalar_lea.vmem [#allocation7], %s6079_s27 }
  0x6f   : > { %s685_s14 = sshll.u32 %s677_s11, 4  ;;  %s686_s14 = int_to_ptr.vmem [resolvable:$true] %s685_s14 }
  0x74   : > { %s682_s7 = scalar_lea.hbm %s7296_s26, %s6082_s22  ;;  %s5705_s6 = scalar_lea.hbm %s7296_s26, 64 }
  0x75   : > { %s683_s15 = sshll.u32 %s682_s7, 4  ;;  %s684_s15 = int_to_ptr.hbm [resolvable:$true] %s683_s15 }
  0x76   : > { %s5698_s28 = sshra.s32 %s684_s15, 4  ;;  %s5699_s28 = int_to_ptr.hbm [resolvable:$true] %s5698_s28 }
  0x77   : > { %s5700_s16 = scalar_lea.hbm %s5699_s28, 32  ;;  %p5706_p10 = scmp.lt.s32.totalorder %s5699_s28, %s7296_s26 }
  0x78   : > { %p5701_p2 = scmp.ne.s32.totalorder %s5699_s28, %s5700_s16  ;;  %p5707_p6 = scmp.lt.s32.totalorder %s5705_s6, %s5700_s16 }
  0x7a   : > { %p5703_p1 = pnand %p5701_p2, %p5552_p9  ;;  %p5708_p11 = por %p5707_p6, %p5706_p10 }
  0x7c   : > { %p5704_p8 = pneg %p5703_p1 }
  0x7e   : > { %p5709_p13 = pnand %p5708_p11, %p5704_p8 }
  0x80   : > { %5712 = shalt.err (!%p5709_p13)
}
  0x81   : > { %5191 = dma.hbm_to_vmem [thread:$0]  (!%p6084_p7), %s684_s15, 512, %s686_s14, %s6096_s1, %s7295_s12, %s7295_s12, %s7294_s4  }
  0x82   : > { %s7297_s7 = sld [smem:[#allocation37_spill]]  ;;  %s699_s28 = scalar_lea.vmem [#allocation8], %s6079_s27 }
  0x83   : > { %s707_s16 = sshll.u32 %s699_s28, 4  ;;  %s7298_s0 = sand.u32 1, %s5848_s21   ;;  %s708_s16 = int_to_ptr.vmem [resolvable:$true] %s707_s16 }
  0x84   : > { %s696_s6 = scalar_lea.sflag [#allocation9], %s7298_s0 }
  0x88   : > { %s704_s11 = scalar_lea.hbm %s7297_s7, %s6082_s22  ;;  %s5735_s15 = scalar_lea.hbm %s7297_s7, 64 }
  0x89   : > { %s705_s29 = sshll.u32 %s704_s11, 4  ;;  %s706_s29 = int_to_ptr.hbm [resolvable:$true] %s705_s29 }
  0x8a   : > { %s5728_s13 = sshra.s32 %s706_s29, 4  ;;  %s5729_s13 = int_to_ptr.hbm [resolvable:$true] %s5728_s13 }
  0x8b   : > { %s5730_s3 = scalar_lea.hbm %s5729_s13, 32  ;;  %p5736_p8 = scmp.lt.s32.totalorder %s5729_s13, %s7297_s7 }
  0x8c   : > { %p5731_p0 = scmp.ne.s32.totalorder %s5729_s13, %s5730_s3  ;;  %p5737_p10 = scmp.lt.s32.totalorder %s5735_s15, %s5730_s3 }
  0x8e   : > { %p5733_p2 = pnand %p5731_p0, %p5552_p9  ;;  %p5738_p6 = por %p5737_p10, %p5736_p8 }
  0x90   : > { %p5734_p1 = pneg %p5733_p2 }
  0x92   : > { %p5739_p11 = pnand %p5738_p6, %p5734_p1 }
  0x94   : > { %5742 = shalt.err (!%p5739_p11)
}
  0x95   : > { %5194 = dma.hbm_to_vmem [thread:$0]  (!%p6084_p7), %s706_s29, 512, %s708_s16, %s696_s6, %s7295_s12, %s7295_s12, %s7294_s4  }
  0x96   : > { %719 = sbr.rel (%p6003_p3) target bundleno = 2788 (0xae4), region = 96  ;;  %s6201_s19 = sand.u32 (!%p6003_p3), 1, %s5840_s30  }
  0x97   : > { %s6204_s5 = sshll.u32 (!%p6003_p3), %s6201_s19, 5  ;;  %s722_s11 = scalar_lea.sflag (!%p6003_p3), [#allocation3], %s6201_s19 }
  0x98   : > { %s6208_s28 = scalar_lea.vmem (!%p6003_p3), [#allocation2], %s6204_s5 }
  0x9b   : > { %5803 = dma.done.wait (%p6062_p12), %s722_s11, 512  }
  0x9c   : > { %5805 = vsyncadd (%p6062_p12), %s722_s11, 4294966784  ;;  %s731_s18 = sand.u32 1, %s5998_s23   ;;  %s6216_s4 = scalar_lea.vmem [#allocation5], %s6204_s5 }
  0x9d   : > { %s732_s24 = scalar_lea.sflag [#allocation6], %s731_s18 }
  0x9e   : > { %5807 = dma.done.wait (%p6062_p12), %s732_s24, 1024  }
  0x9f   : > { %5809 = vsyncadd (%p6062_p12), %s732_s24, 4294966272  ;;  %s6223_s12 = scalar_lea.vmem [#allocation7], %s6204_s5  ;;  %s752_s16 = scalar_lea.sflag [#allocation9], %s731_s18 }
  0xa0   : > { %s6226_s29 = scalar_lea.vmem [#allocation8], %s6204_s5 }
  0xa1   : > { %5811 = dma.done.wait (%p6062_p12), %s752_s16, 512  }
  0xa2   : > { %5813 = vsyncadd (%p6062_p12), %s752_s16, 4294966784  ;;  %p7299_p3 = scmp.eq.s32.totalorder %s5998_s23, 0 }
  0xa4   : > { %5815 = dma.done.wait (%p7299_p3), [#allocation9], 1024   ;;  %p7300_p7 = pmov %p7299_p3 }
  0xa5   : > { %p7301_p9 = pmov %p7299_p3 }
  0xa6   : > { %5817 = vsyncadd (%p7300_p7), [#allocation9], 4294966272 }
  0xa7   : > { %5819 = dma.done.wait (%p7301_p9), [#allocation12], 2048   ;;  %p7302_p13 = pmov %p7299_p3 }
  0xa8   : > { %p7303_p0 = pmov %p7299_p3 }
  0xa9   : > { %5821 = vsyncadd (%p7302_p13), [#allocation12], 4294965248 }
  0xaa   : > { %5823 = dma.done.wait (%p7303_p0), [#allocation15], 5120   ;;  %p7304_p2 = pmov %p7303_p0 }
  0xab   : > { %p7305_p12 = pmov %p7303_p0 }
  0xac   : > { %5825 = vsyncadd (%p7304_p2), [#allocation15], 4294962176 }
  0xad   : > { %5827 = dma.done.wait (%p7305_p12), [#allocation18], 5120   ;;  %p7306_p1 = pmov %p7303_p0 }
  0xae   : > { %v5032_v0 = vld [vmem:[#allocation11 + $0x38] sm:$0xff]  ;;  %v5031_v2 = vld [vmem:[#allocation11 + $0x30] sm:$0xff]  ;;  %v5030_v4 = vld [vmem:[#allocation11 + $0x28] sm:$0xff]  ;;  %vm1158_vm0 = vcmask 130048   ;;  %s5863_s2 = smov 32   ;;  %s5864_s0 = smov 96  }
  0xaf   : > { %5829 = vsyncadd (%p7306_p1), [#allocation18], 4294962176  ;;  %v5040_v1 = vld [vmem:[#allocation13 + $0x38] sm:$0xff]  ;;  %1030 = vmatpush.bf16.msra.mxu1 %v5032_v0  ;;  %v5039_v3 = vld [vmem:[#allocation13 + $0x30] sm:$0xff]  ;;  %s5865_s6 = smov 112   ;;  %s5866_s13 = smov 64  }
  0xb0   : > { %1115 = vmatpush.bf16.msra.mxu2 %v5040_v1  ;;  %v5038_v5 = vld [vmem:[#allocation13 + $0x28] sm:$0xff]  ;;  %v5029_v6 = vld [vmem:[#allocation11 + $0x20] sm:$0xff]  ;;  %v5028_v8 = vld [vmem:[#allocation11 + $0x18] sm:$0xff]  ;;  %s5867_s3 = smov 80   ;;  %s5868_s1 = smov 16   ;;  %vm1935_vm2 = vcmask 64512  }
  0xb1   : > { %v5037_v7 = vld [vmem:[#allocation13 + $0x20] sm:$0xff]  ;;  %v5036_v9 = vld [vmem:[#allocation13 + $0x18] sm:$0xff]  ;;  %v5027_v10 = vld [vmem:[#allocation11 + $0x10] sm:$0xff]  ;;  %s5869_s14 = smov 48   ;;  %vm2323_vm6 = vcmask 1043456   ;;  %s7311_s27 = sld [smem:[#allocation48_spill]] }
  0xb2   : > { %v5035_v11 = vld [vmem:[#allocation13 + $0x10] sm:$0xff]  ;;  %v5026_v12 = vld [vmem:[#allocation11 + $0x8] sm:$0xff]  ;;  %v5025_v14 = vld [vmem:[#allocation11] sm:$0xff]  ;;  %s860_s11 = scalar_lea.vmem [#allocation20], %s6204_s5  ;;  %s4257_s5 = scalar_lea.sflag [#allocation4], %s6201_s19 }
  0xb3   : > { %1031 = vmatpush.bf16.msra.mxu1 %v5031_v2  ;;  %v5034_v13 = vld [vmem:[#allocation13 + $0x8] sm:$0xff]  ;;  %v5033_v15 = vld [vmem:[#allocation13] sm:$0xff]  ;;  %v873_v22 = vld [vmem:[%s6216_s4 + $0x10] sm:$0xff] }
  0xb4   : > { %1116 = vmatpush.bf16.msra.mxu2 %v5039_v3  ;;  %v871_v16 = vld [vmem:[%s6216_s4] sm:$0xff]  ;;  %v872_v17 = vld [vmem:[%s6216_s4 + $0x8] sm:$0xff]  ;;  %v874_v23 = vld [vmem:[%s6216_s4 + $0x18] sm:$0xff] }
  0xb5   : > { %v875_v18 = vld [vmem:[%s6223_s12] sm:$0xff]  ;;  %v876_v19 = vld [vmem:[%s6223_s12 + $0x8] sm:$0xff]  ;;  %v964_v20 = vpack.c.bf16 %v872_v17, %v871_v16  ;;  %v877_v24 = vld [vmem:[%s6223_s12 + $0x10] sm:$0xff]  ;;  %v965_v26 = vpack.c.bf16 %v874_v23, %v873_v22 }
  0xb6   : > { %v1049_v21 = vpack.c.bf16 %v876_v19, %v875_v18  ;;  %v878_v25 = vld [vmem:[%s6223_s12 + $0x18] sm:$0xff]  ;;  %v5023_v55 = vld [vmem:[#allocation10 + $0x30] sm:$0xff]  ;;  %v5022_v58 = vld [vmem:[#allocation10 + $0x28] sm:$0xff] }
  0xb7   : > { %1032 = vmatpush.bf16.msra.mxu1 %v5030_v4  ;;  %v1050_v27 = vpack.c.bf16 %v878_v25, %v877_v24  ;;  %v5024_v54 = vld [vmem:[#allocation10 + $0x38] sm:$0xff]  ;;  %v5021_v59 = vld [vmem:[#allocation10 + $0x20] sm:$0xff]  ;;  %v5019_v63 = vld [vmem:[#allocation10 + $0x10] sm:$0xff] }
  0xb8   : > { %1117 = vmatpush.bf16.msra.mxu2 %v5038_v5  ;;  %945 = vmatpush.bf16.msra.mxu0 %v5024_v54  ;;  %v5020_v61 = vld [vmem:[#allocation10 + $0x18] sm:$0xff]  ;;  %v5018_v0 = vld [vmem:[#allocation10 + $0x8] sm:$0xff]  ;;  %v5017_v1 = vld [vmem:[#allocation10] sm:$0xff] }
  0xb9   : > { %v867_v3 = vld [vmem:[%s6208_s28] sm:$0xff]  ;;  %v868_v4 = vld [vmem:[%s6208_s28 + $0x8] sm:$0xff] }
  0xba   : > { %v879_v5 = vpack.c.bf16 %v868_v4, %v867_v3  ;;  %v1147_v54 = vld [vmem:[%s6226_s29 + $0x8] sm:$0xff] }
  0xbb   : > { %1033 = vmatpush.bf16.msra.mxu1 %v5029_v6  ;;  %vm1151_vm4 = vcmp.eq.f32.partialorder %v1147_v54, 0.0 }
  0xbc   : > { %1118 = vmatpush.bf16.msra.mxu2 %v5037_v7  ;;  %946 = vmatpush.bf16.msra.mxu0 %v5023_v55  ;;  %v869_v7 = vld [vmem:[%s6208_s28 + $0x10] sm:$0xff] }
  0xbf   : > { %1034 = vmatpush.bf16.msra.mxu1 %v5028_v8  ;;  %v870_v8 = vld [vmem:[%s6208_s28 + $0x18] sm:$0xff]  ;;  %s5121_s28 = sshll.u32 %s5998_s23, 5 }
  0xc0   : > { %1119 = vmatpush.bf16.msra.mxu2 %v5036_v9  ;;  %947 = vmatpush.bf16.msra.mxu0 %v5022_v58 }
  0xc3   : > { %1035 = vmatpush.bf16.msra.mxu1 %v5027_v10 }
  0xc4   : > { %1120 = vmatpush.bf16.msra.mxu2 %v5035_v11  ;;  %948 = vmatpush.bf16.msra.mxu0 %v5021_v59  ;;  %v880_v11 = vpack.c.bf16 %v870_v8, %v869_v7 }
  0xc7   : > { %1036 = vmatpush.bf16.msra.mxu1 %v5026_v12 }
  0xc8   : > { %1121 = vmatpush.bf16.msra.mxu2 %v5034_v13  ;;  %949 = vmatpush.bf16.msra.mxu0 %v5020_v61 }
  0xcb   : > { %1037 = vmatpush.bf16.msra.mxu1 %v5025_v14 }
  0xcc   : > { %1122 = vmatpush.bf16.msra.mxu2 %v5033_v15  ;;  %950 = vmatpush.bf16.msra.mxu0 %v5019_v63 }
  0xce   : > { %1038 = vmatmul.bf16.vlgmr.msra.gmra.mxu1 %v964_v20 }
  0xcf   : > { %1123 = vmatmul.bf16.vlgmr.msra.gmra.mxu2 %v1049_v21 }
  0xd0   : > { %951 = vmatpush.bf16.msra.mxu0 %v5018_v0 }
  0xd4   : > { %952 = vmatpush.bf16.msra.mxu0 %v5017_v1 }
  0xd7   : > { %953 = vmatmul.bf16.vlgmr.msra.gmra.mxu0 %v879_v5 }
  0xde   : > { %1043 = vmatmul.bf16.gmra.mxu1 %v965_v26 }
  0xdf   : > { %1128 = vmatmul.bf16.gmra.mxu2 %v1050_v27 }
  0xe7   : > { %958 = vmatmul.bf16.gmra.mxu0 %v880_v11 }
 0x14b   : > { %v1039_v28 = vpop.f32.mrf.mxu1 }
 0x14c   : > { %v1138_v29 = vpack.c.bf16 %v1039_v28, %v1039_v28 }
 0x14e   : > { %v1241_v30 = vunpack.c.l.b16 %v1138_v29  ;;  %v1163_v31 = vsel %vm1158_vm0, %v1138_v29, 0 }
 0x14f   : > { %1172 = vmatpush.bf16.xpose.msra.mxu3 %v1163_v31 }
 0x150   : > { %v1242_v32 = vpack.c.b16 %v1241_v30, %v1241_v30 }
 0x152   : > { %v1124_v33 = vpop.f32.mrf.mxu2  ;;  %1721 = vrot.lane.b32.xlu2 %v1242_v32, %s5863_s2  ;;  %1353 = vrot.lane.b32.xlu1 %v1242_v32, %s5864_s0 }
 0x153   : > { %v1142_v34 = vpack.c.bf16 %v1124_v33, %v1124_v33  ;;  %1243 = vrot.lane.b32.xlu0 %v1242_v32, %s5865_s6  ;;  %v1041_v35 = vpop.f32.mrf.mxu1 }
 0x154   : > { %v1139_v36 = vpack.c.bf16 %v1041_v35, %v1041_v35 }
 0x155   : > { %v1236_v37 = vunpack.c.l.b16 %v1142_v34 }
 0x156   : > { %4608 = vmatmul.msk.bf16.vlgmr.msra.gmra.mxu3 %vm1158_vm0, %v1142_v34  ;;  %v1182_v39 = vsel %vm1158_vm0, %v1139_v36, 0  ;;  %v1270_v41 = vunpack.c.l.b16 %v1139_v36 }
 0x157   : > { %v1237_v38 = vpack.c.b16 %v1236_v37, %v1236_v37  ;;  %1191 = vmatpush.bf16.xpose.msrb.mxu3 %v1182_v39 }
 0x158   : > { %v1271_v45 = vpack.c.b16 %v1270_v41, %v1270_v41 }
 0x15a   : > { %1535 = vrot.lane.b32.xlu2 %v1237_v38, %s5866_s13  ;;  %1537 = vrot.lane.b32.xlu1 %v1242_v32, %s5866_s13  ;;  %v1126_v44 = vpop.f32.mrf.mxu2 }
 0x15b   : > { %1445 = vrot.lane.b32.xlu0 %v1242_v32, %s5867_s3  ;;  %v1044_v40 = vpop.f32.mrf.mxu1  ;;  %v1143_v46 = vpack.c.bf16 %v1126_v44, %v1126_v44 }
 0x15c   : > { %v1140_v42 = vpack.c.bf16 %v1044_v40, %v1044_v40  ;;  %v1146_v40 = vld [vmem:[%s6226_s29] sm:$0xff] }
 0x15d   : > { %v1265_v52 = vunpack.c.l.b16 %v1143_v46  ;;  %vm1150_vm1 = vcmp.eq.f32.partialorder %v1146_v40, 0.0 }
 0x15e   : > { %v1201_v43 = vsel %vm1158_vm0, %v1140_v42, 0  ;;  %v1299_v60 = vunpack.c.l.b16 %v1140_v42  ;;  %v5870_v42 = vmov 0.0  }
 0x15f   : > { %1210 = vmatpush.bf16.xpose.msra.mxu3 %v1201_v43  ;;  %v1266_v53 = vpack.c.b16 %v1265_v52, %v1265_v52  ;;  %v6366_v43 = vsel %vm1150_vm1, -1e+20, %v5870_v42  ;;  %v6393_v59 = vsel %vm1151_vm4, -1e+20, %v5870_v42 }
 0x160   : > { %v6291_v62 = vpack.c.b16 %v1299_v60, %v1299_v60 }
 0x162   : > { %1813 = vrot.lane.b32.xlu1 %v1242_v32, %s5868_s1  ;;  %1272 = vrot.lane.b32.xlu2 %v1271_v45, %s5865_s6  ;;  %v1129_v50 = vpop.f32.mrf.mxu2 }
 0x163   : > { %1629 = vrot.lane.b32.xlu0 %v1242_v32, %s5869_s14  ;;  %v1046_v47 = vpop.f32.mrf.mxu1  ;;  %v1144_v51 = vpack.c.bf16 %v1129_v50, %v1129_v50  ;;  %v1148_v50 = vld [vmem:[%s6226_s29 + $0x10] sm:$0xff] }
 0x164   : > { %v6273_v48 = vpack.c.bf16 %v1046_v47, %v1046_v47  ;;  %vm1152_vm3 = vcmp.eq.f32.partialorder %v1148_v50, 0.0 }
 0x165   : > { %v1294_v2 = vunpack.c.l.b16 %v1144_v51 }
 0x166   : > { %4609 = vmatmul.msk.bf16.vlgmr.msrb.gmra.mxu3 %vm1158_vm0, %v1143_v46  ;;  %v1220_v49 = vsel %vm1158_vm0, %v6273_v48, 0  ;;  %v1328_v9 = vunpack.c.l.b16 %v6273_v48 }
 0x167   : > { %1229 = vmatpush.bf16.xpose.msrb.mxu3 %v1220_v49  ;;  %v6303_v6 = vpack.c.b16 %v1294_v2, %v1294_v2 }
 0x168   : > { %v1329_v12 = vpack.c.b16 %v1328_v9, %v1328_v9 }
 0x16a   : > { %1238 = vrot.lane.b32.xlu1 %v1237_v38, %s5865_s6  ;;  %1376 = vrot.lane.b32.xlu2 %v1271_v45, %s5864_s0  ;;  %v1131_v56 = vpop.f32.mrf.mxu2 }
 0x16b   : > { %1351 = vrot.lane.b32.xlu0 %v1237_v38, %s5864_s0  ;;  %v1145_v57 = vpack.c.bf16 %v1131_v56, %v1131_v56  ;;  %v6388_v56 = vsel %vm1152_vm3, -1e+20, %v5870_v42 }
 0x16d   : > { %v1323_v14 = vunpack.c.l.b16 %v1145_v57 }
 0x16f   : > { %v1324_v17 = vpack.c.b16 %v1323_v14, %v1323_v14  ;;  %v1149_v14 = vld [vmem:[%s6226_s29 + $0x18] sm:$0xff]  ;;  %s4269_s29 = sshll.u32 %s860_s11, 4  ;;  %s4270_s29 = int_to_ptr.vmem [resolvable:$true] %s4269_s29 }
 0x170   : > { %vm1153_vm5 = vcmp.eq.f32.partialorder %v1149_v14, 0.0 }
 0x172   : > { %1627 = vrot.lane.b32.xlu1 %v1237_v38, %s5869_s14  ;;  %1560 = vrot.lane.b32.xlu2 %v1271_v45, %s5866_s13 }
 0x173   : > { %1443 = vrot.lane.b32.xlu0 %v1237_v38, %s5867_s3 }
 0x176   : > { %4610 = vmatmul.msk.bf16.vlgmr.msra.gmra.mxu3 %vm1158_vm0, %v1144_v51 }
 0x17a   : > { %1719 = vrot.lane.b32.xlu1 %v1237_v38, %s5863_s2  ;;  %1650 = vrot.lane.b32.xlu2 %v1266_v53, %s5869_s14 }
 0x17b   : > { %1811 = vrot.lane.b32.xlu0 %v1237_v38, %s5868_s1 }
 0x182   : > { %1468 = vrot.lane.b32.xlu1 %v1271_v45, %s5867_s3  ;;  %1742 = vrot.lane.b32.xlu2 %v1266_v53, %s5863_s2 }
 0x183   : > { %1652 = vrot.lane.b32.xlu0 %v1271_v45, %s5869_s14 }
 0x186   : > { %4611 = vmatmul.msk.bf16.vlgmr.msrb.gmra.mxu3 %vm1158_vm0, %v1145_v57 }
 0x18a   : > { %1744 = vrot.lane.b32.xlu1 %v1271_v45, %s5863_s2  ;;  %1834 = vrot.lane.b32.xlu2 %v1266_v53, %s5868_s1 }
 0x18b   : > { %1836 = vrot.lane.b32.xlu0 %v1271_v45, %s5868_s1 }
 0x192   : > { %1374 = vrot.lane.b32.xlu1 %v1266_v53, %s5864_s0  ;;  %1491 = vrot.lane.b32.xlu2 %v6291_v62, %s5867_s3 }
 0x193   : > { %1267 = vrot.lane.b32.xlu0 %v1266_v53, %s5865_s6 }
 0x19a   : > { %1466 = vrot.lane.b32.xlu1 %v1266_v53, %s5867_s3  ;;  %1675 = vrot.lane.b32.xlu2 %v6291_v62, %s5869_s14 }
 0x19b   : > { %1558 = vrot.lane.b32.xlu0 %v1266_v53, %s5866_s13 }
 0x1a2   : > { %1673 = vrot.lane.b32.xlu2 %v6303_v6, %s5869_s14  ;;  %1399 = vrot.lane.b32.xlu1 %v6291_v62, %s5864_s0 }
 0x1a3   : > { %1301 = vrot.lane.b32.xlu0 %v6291_v62, %s5865_s6 }
 0x1aa   : > { %1765 = vrot.lane.b32.xlu2 %v6303_v6, %s5863_s2  ;;  %1767 = vrot.lane.b32.xlu1 %v6291_v62, %s5863_s2 }
 0x1ab   : > { %1583 = vrot.lane.b32.xlu0 %v6291_v62, %s5866_s13 }
 0x1ac   : > { %v6320_v10 = vpop.permute.xlu2 %1721 }
 0x1ad   : > { %v1727_v1 = vsel %vm1158_vm0, %v6320_v10, 0 }
 0x1b2   : > { %1296 = vrot.lane.b32.xlu1 %v6303_v6, %s5865_s6  ;;  %1330 = vrot.lane.b32.xlu2 %v1329_v12, %s5865_s6 }
 0x1b3   : > { %1397 = vrot.lane.b32.xlu0 %v6303_v6, %s5864_s0 }
 0x1b4   : > { %v6327_v13 = vpop.permute.xlu2 %1535 }
 0x1ba   : > { %1698 = vrot.lane.b32.xlu1 %v1329_v12, %s5869_s14  ;;  %1422 = vrot.lane.b32.xlu2 %v1329_v12, %s5864_s0 }
 0x1bb   : > { %1489 = vrot.lane.b32.xlu0 %v6303_v6, %s5867_s3 }
 0x1bc   : > { %v1273_v15 = vpop.permute.xlu2 %1272 }
 0x1bd   : > { %v1278_v16 = vsel %vm1158_vm0, %v1273_v15, 0 }
 0x1be   : > { %1287 = vmatpush.bf16.xpose.msrb.mxu1 %v1278_v16 }
 0x1c2   : > { %1512 = vrot.lane.b32.xlu1 %v1324_v17, %s5867_s3  ;;  %1790 = vrot.lane.b32.xlu2 %v1329_v12, %s5863_s2 }
 0x1c3   : > { %1581 = vrot.lane.b32.xlu0 %v6303_v6, %s5866_s13 }
 0x1c4   : > { %v1354_v18 = vpop.permute.xlu1 %1353  ;;  %v1377_v19 = vpop.permute.xlu2 %1376 }
 0x1c5   : > { %v1244_v20 = vpop.permute.xlu0 %1243  ;;  %v1382_v21 = vsel %vm1158_vm0, %v1377_v19, 0  ;;  %v1359_v22 = vsel %vm1158_vm0, %v1354_v18, 0 }
 0x1c6   : > { %v1249_v23 = vsel %vm1158_vm0, %v1244_v20, 0  ;;  %1368 = vmatpush.bf16.xpose.msrb.mxu0 %v1359_v22  ;;  %1391 = vmatpush.bf16.xpose.msra.mxu1 %v1382_v21 }
 0x1c7   : > { %1258 = vmatpush.bf16.xpose.msra.mxu3 %v1249_v23 }
 0x1ca   : > { %1788 = vrot.lane.b32.xlu1 %v1324_v17, %s5863_s2  ;;  %1325 = vrot.lane.b32.xlu2 %v1324_v17, %s5865_s6 }
 0x1cb   : > { %1514 = vrot.lane.b32.xlu0 %v1329_v12, %s5867_s3 }
 0x1cc   : > { %v1538_v24 = vpop.permute.xlu1 %1537  ;;  %v6344_v25 = vpop.permute.xlu2 %1560 }
 0x1cd   : > { %v1446_v26 = vpop.permute.xlu0 %1445  ;;  %v1543_v35 = vsel %vm1158_vm0, %v1538_v24, 0  ;;  %v1566_v23 = vsel %vm1158_vm0, %v6344_v25, 0 }
 0x1ce   : > { %v1451_v27 = vsel %vm1158_vm0, %v1446_v26, 0 }
 0x1cf   : > { %1460 = vmatpush.bf16.xpose.msra.mxu0 %v1451_v27 }
 0x1d2   : > { %1420 = vrot.lane.b32.xlu2 %v1324_v17, %s5864_s0 }
 0x1d3   : > { %1606 = vrot.lane.b32.xlu0 %v1329_v12, %s5866_s13 }
 0x1d4   : > { %v6349_v28 = vpop.permute.xlu1 %1813  ;;  %v6351_v29 = vpop.permute.xlu2 %1650 }
 0x1d5   : > { %v1630_v30 = vpop.permute.xlu0 %1629  ;;  %v1819_v15 = vsel %vm1158_vm0, %v6349_v28, 0  ;;  %v954_v28 = vpop.f32.mrf.mxu0 }
 0x1d6   : > { %v1635_v47 = vsel %vm1158_vm0, %v1630_v30, 0 }
 0x1d9   : > { %v1174_v31 = vpop.f32.mrf.mxu3 }
 0x1da   : > { %1604 = vrot.lane.b32.xlu2 %v1324_v17, %s5866_s13  ;;  %v6377_v48 = vadd.f32 %v1174_v31, %v6366_v43  ;;  %v6436_v31 = vpack.c.bf16 %v954_v28, %v954_v28 }
 0x1db   : > { %1696 = vrot.lane.b32.xlu0 %v1324_v17, %s5869_s14 }
 0x1dc   : > { %v1239_v32 = vpop.permute.xlu1 %1238  ;;  %v6355_v33 = vpop.permute.xlu2 %1742  ;;  %v1936_v51 = vsel %vm1935_vm2, %v6377_v48, -inf }
 0x1dd   : > { %v1352_v34 = vpop.permute.xlu0 %1351  ;;  %4612 = vmatmul.msk.bf16.vlgmr.msra.gmra.mxu3 %vm1158_vm0, %v1239_v32  ;;  %v6457_v50 = vpop.f32.mrf.mxu0 }
 0x1de   : > { %4616 = vmatmul.msk.bf16.vlgmr.msrb.gmra.mxu0 %vm1158_vm0, %v1352_v34 }
 0x1df   : > { %1552 = vmatpush.bf16.xpose.msrb.mxu0 %v1543_v35 }
 0x1e1   : > { %v1176_v36 = vpop.f32.mrf.mxu3 }
 0x1e3   : > { %1882 = vrot.lane.b32.xlu0 %v1329_v12, %s5868_s1 }
 0x1e4   : > { %v1628_v37 = vpop.permute.xlu1 %1627  ;;  %v6361_v38 = vpop.permute.xlu2 %1834 }
 0x1e5   : > { %v1444_v39 = vpop.permute.xlu0 %1443 }
 0x1e9   : > { %v1193_v41 = vpop.f32.mrf.mxu3 }
 0x1ea   : > { %v6406_v2 = vadd.f32 %v1193_v41, %v6393_v59 }
 0x1eb   : > { %1857 = vrot.lane.b32.xlu0 %v6303_v6, %s5868_s1 }
 0x1ec   : > { %v6368_v44 = vpop.permute.xlu1 %1719  ;;  %v6370_v45 = vpop.permute.xlu2 %1491  ;;  %v1939_v4 = vsel %vm1935_vm2, %v6406_v2, -inf }
 0x1ed   : > { %v6372_v46 = vpop.permute.xlu0 %1811  ;;  %v1497_v36 = vsel %vm1158_vm0, %v6370_v45, 0 }
 0x1ee   : > { %4620 = vmatmul.msk.bf16.vlgmr.msra.gmra.mxu0 %vm1158_vm0, %v1444_v39 }
 0x1ef   : > { %1644 = vmatpush.bf16.xpose.msra.mxu0 %v1635_v47 }
 0x1f1   : > { %v1195_v49 = vpop.f32.mrf.mxu3 }
 0x1f3   : > { %1880 = vrot.lane.b32.xlu0 %v1324_v17, %s5868_s1  ;;  %v6421_v17 = vsel %vm1153_vm5, -1e+20, %v5870_v42 }
 0x1f4   : > { %v1469_v52 = vpop.permute.xlu1 %1468  ;;  %v6383_v53 = vpop.permute.xlu2 %1675  ;;  %1937 = vmax.xlane.f32.xlu1 %v1936_v51 }
 0x1f5   : > { %v6386_v55 = vpop.permute.xlu0 %1652  ;;  %v1474_v8 = vsel %vm1158_vm0, %v1469_v52, 0  ;;  %v1681_v54 = vsel %vm1158_vm0, %v6383_v53, 0 }
 0x1f6   : > { %v1658_v39 = vsel %vm1158_vm0, %v6386_v55, 0 }
 0x1f9   : > { %v1212_v57 = vpop.f32.mrf.mxu3 }
 0x1fa   : > { %v6391_v58 = vadd.f32 %v1212_v57, %v6388_v56 }
 0x1fc   : > { %v6395_v60 = vpop.permute.xlu1 %1744  ;;  %v6397_v61 = vpop.permute.xlu2 %1673  ;;  %v1942_v63 = vsel %vm1935_vm2, %v6391_v58, -inf }
 0x1fd   : > { %v6401_v0 = vpop.permute.xlu0 %1836  ;;  %1943 = vmax.xlane.f32.xlu1 %v1942_v63  ;;  %v1750_v45 = vsel %vm1158_vm0, %v6395_v60, 0  ;;  %v959_v60 = vpop.f32.mrf.mxu0 }
 0x1fe   : > { %4624 = vmatmul.msk.bf16.vlgmr.msrb.gmra.mxu0 %vm1158_vm0, %v6327_v13  ;;  %v1842_v55 = vsel %vm1158_vm0, %v6401_v0, 0 }
 0x1ff   : > { %1736 = vmatpush.bf16.xpose.msrb.mxu0 %v1727_v1 }
 0x201   : > { %v1214_v3 = vpop.f32.mrf.mxu3 }
 0x203   : > { %1940 = vmax.xlane.f32.xlu2 %v1939_v4 }
 0x204   : > { %v1375_v5 = vpop.permute.xlu1 %1374  ;;  %v6412_v6 = vpop.permute.xlu2 %1765 }
 0x205   : > { %v1268_v7 = vpop.permute.xlu0 %1267  ;;  %v6470_v1 = vpop.f32.mrf.mxu0 }
 0x206   : > { %4613 = vmatmul.msk.bf16.vlgmr.msrb.gmra.mxu1 %vm1158_vm0, %v1268_v7 }
 0x207   : > { %1483 = vmatpush.bf16.xpose.msrb.mxu1 %v1474_v8 }
 0x209   : > { %v1231_v9 = vpop.f32.mrf.mxu3 }
 0x20a   : > { %v6432_v26 = vadd.f32 %v1231_v9, %v6421_v17 }
 0x20c   : > { %v1467_v10 = vpop.permute.xlu1 %1466  ;;  %v1331_v11 = vpop.permute.xlu2 %1330  ;;  %v1945_v27 = vsel %vm1935_vm2, %v6432_v26, -inf }
 0x20d   : > { %v1559_v12 = vpop.permute.xlu0 %1558  ;;  %v1336_v13 = vsel %vm1158_vm0, %v1331_v11, 0 }
 0x20e   : > { %4628 = vmatmul.msk.bf16.vlgmr.msra.gmra.mxu0 %vm1158_vm0, %v1628_v37  ;;  %1345 = vmatpush.bf16.xpose.msrb.mxu3 %v1336_v13 }
 0x20f   : > { %1828 = vmatpush.bf16.xpose.msra.mxu0 %v1819_v15 }
 0x211   : > { %v1233_v16 = vpop.f32.mrf.mxu3 }
 0x214   : > { %v1400_v18 = vpop.permute.xlu1 %1399  ;;  %v1423_v19 = vpop.permute.xlu2 %1422 }
 0x215   : > { %v1405_v20 = vsel %vm1158_vm0, %v1400_v18, 0  ;;  %v1302_v21 = vpop.permute.xlu0 %1301  ;;  %v1428_v22 = vsel %vm1158_vm0, %v1423_v19, 0 }
 0x216   : > { %4617 = vmatmul.msk.bf16.vlgmr.msra.gmra.mxu1 %vm1158_vm0, %v1375_v5  ;;  %v1307_v24 = vsel %vm1158_vm0, %v1302_v21, 0  ;;  %1859 = vrot.lane.b32.xlu1 %v6291_v62, %s5868_s1  ;;  %v2325_v62 = vsel %vm2323_vm6, %v6436_v31, 0 }
 0x217   : > { %1575 = vmatpush.bf16.xpose.msra.mxu1 %v1566_v23  ;;  %1316 = vmatpush.bf16.xpose.msrb.mxu2 %v1307_v24 }
 0x218   : > { %1437 = vmatpush.bf16.xpose.msra.mxu3 %v1428_v22  ;;  %v1136_v22 = vpack.c.bf16 %v959_v60, %v959_v60 }
 0x21a   : > { %v2363_v23 = vsel %vm2323_vm6, %v1136_v22, 0 }
 0x21c   : > { %v1768_v25 = vpop.permute.xlu1 %1767  ;;  %v1791_v30 = vpop.permute.xlu2 %1790 }
 0x21d   : > { %v1584_v32 = vpop.permute.xlu0 %1583  ;;  %1946 = vmax.xlane.f32.xlu0 %v1945_v27  ;;  %v1773_v0 = vsel %vm1158_vm0, %v1768_v25, 0  ;;  %v1796_v3 = vsel %vm1158_vm0, %v1791_v30, 0 }
 0x21e   : > { %4632 = vmatmul.msk.bf16.vlgmr.msrb.gmra.mxu0 %vm1158_vm0, %v6368_v44  ;;  %v1589_v42 = vsel %vm1158_vm0, %v1584_v32, 0 }
 0x21f   : > { %1414 = vmatpush.bf16.xpose.msra.mxu2 %v1405_v20  ;;  %2334 = vmatpush.bf16.msrb.mxu0 %v2325_v62 }
 0x224   : > { %v1297_v34 = vpop.permute.xlu1 %1296  ;;  %v1326_v35 = vpop.permute.xlu2 %1325 }
 0x225   : > { %v1398_v37 = vpop.permute.xlu0 %1397  ;;  %4614 = vmatmul.msk.bf16.vlgmr.msrb.gmra.mxu2 %vm1158_vm0, %v1297_v34  ;;  %4615 = vmatmul.msk.bf16.vlgmr.msrb.gmra.mxu3 %vm1158_vm0, %v1326_v35 }
 0x226   : > { %4621 = vmatmul.msk.bf16.vlgmr.msrb.gmra.mxu1 %vm1158_vm0, %v1467_v10 }
 0x227   : > { %1506 = vmatpush.bf16.xpose.msrb.mxu2 %v1497_v36  ;;  %1667 = vmatpush.bf16.xpose.msrb.mxu1 %v1658_v39 }
 0x22c   : > { %v1421_v41 = vpop.permute.xlu2 %1420  ;;  %v1699_v47 = vpop.permute.xlu1 %1698 }
 0x22d   : > { %v1490_v40 = vpop.permute.xlu0 %1489  ;;  %v1704_v63 = vsel %vm1158_vm0, %v1699_v47, 0 }
 0x22e   : > { %4636 = vmatmul.msk.bf16.vlgmr.msra.gmra.mxu0 %vm1158_vm0, %v6372_v46 }
 0x234   : > { %v1513_v51 = vpop.permute.xlu1 %1512  ;;  %v1605_v53 = vpop.permute.xlu2 %1604 }
 0x235   : > { %v1582_v44 = vpop.permute.xlu0 %1581  ;;  %4618 = vmatmul.msk.bf16.vlgmr.msra.gmra.mxu2 %vm1158_vm0, %v1398_v37  ;;  %4619 = vmatmul.msk.bf16.vlgmr.msra.gmra.mxu3 %vm1158_vm0, %v1421_v41 }
 0x236   : > { %4625 = vmatmul.msk.bf16.vlgmr.msra.gmra.mxu1 %vm1158_vm0, %v1559_v12  ;;  %1598 = vmatpush.bf16.xpose.msra.mxu2 %v1589_v42 }
 0x237   : > { %1759 = vmatpush.bf16.xpose.msra.mxu1 %v1750_v45 }
 0x23c   : > { %v1789_v11 = vpop.permute.xlu1 %1788 }
 0x23d   : > { %v1515_v49 = vpop.permute.xlu0 %1514 }
 0x23e   : > { %v1520_v46 = vsel %vm1158_vm0, %v1515_v49, 0 }
 0x23f   : > { %1529 = vmatpush.bf16.xpose.msrb.mxu3 %v1520_v46 }
 0x245   : > { %v1607_v52 = vpop.permute.xlu0 %1606  ;;  %4622 = vmatmul.msk.bf16.vlgmr.msrb.gmra.mxu2 %vm1158_vm0, %v1490_v40 }
 0x246   : > { %v1612_v57 = vsel %vm1158_vm0, %v1607_v52, 0  ;;  %4623 = vmatmul.msk.bf16.vlgmr.msrb.gmra.mxu3 %vm1158_vm0, %v1513_v51  ;;  %4629 = vmatmul.msk.bf16.vlgmr.msrb.gmra.mxu1 %vm1158_vm0, %v6351_v29 }
 0x247   : > { %1690 = vmatpush.bf16.xpose.msrb.mxu2 %v1681_v54  ;;  %1851 = vmatpush.bf16.xpose.msrb.mxu1 %v1842_v55 }
 0x248   : > { %1621 = vmatpush.bf16.xpose.msra.mxu3 %v1612_v57 }
 0x24d   : > { %v1697_v29 = vpop.permute.xlu0 %1696 }
 0x250   : > { %1713 = vmatpush.bf16.xpose.msrb.mxu3 %v1704_v63 }
 0x255   : > { %4626 = vmatmul.msk.bf16.vlgmr.msra.gmra.mxu2 %vm1158_vm0, %v1582_v44  ;;  %v1883_v7 = vpop.permute.xlu0 %1882 }
 0x256   : > { %4627 = vmatmul.msk.bf16.vlgmr.msra.gmra.mxu3 %vm1158_vm0, %v1605_v53  ;;  %4633 = vmatmul.msk.bf16.vlgmr.msra.gmra.mxu1 %vm1158_vm0, %v6355_v33  ;;  %v1888_v9 = vsel %vm1158_vm0, %v1883_v7, 0  ;;  %v1135_v53 = vpack.c.bf16 %v6457_v50, %v6457_v50 }
 0x257   : > { %1782 = vmatpush.bf16.xpose.msra.mxu2 %v1773_v0 }
 0x258   : > { %1805 = vmatpush.bf16.xpose.msra.mxu3 %v1796_v3 }
 0x25b   : > { %v1370_v4 = vpop.f32.mrf.mxu0 }
 0x25c   : > { %v6510_v32 = vadd.f32 %v1370_v4, %v6366_v43 }
 0x25e   : > { %v1960_v37 = vsel %vm1935_vm2, %v6510_v32, -inf }
 0x260   : > { %v1260_v5 = vpop.f32.mrf.mxu3 }
 0x261   : > { %v6516_v40 = vadd.f32 %v1260_v5, %v6366_v43 }
 0x263   : > { %v1372_v8 = vpop.f32.mrf.mxu0  ;;  %v1948_v44 = vsel %vm1935_vm2, %v6516_v40, -inf }
 0x264   : > { %v2344_v8 = vsel %vm2323_vm6, %v1135_v53, 0 }
 0x265   : > { %4630 = vmatmul.msk.bf16.vlgmr.msrb.gmra.mxu2 %vm1158_vm0, %v6397_v61  ;;  %v1858_v61 = vpop.permute.xlu0 %1857  ;;  %2353 = vmatpush.bf16.msra.mxu1 %v2344_v8 }
 0x266   : > { %4631 = vmatmul.msk.bf16.vlgmr.msrb.gmra.mxu3 %vm1158_vm0, %v1697_v29  ;;  %4637 = vmatmul.msk.bf16.vlgmr.msrb.gmra.mxu1 %vm1158_vm0, %v6361_v38 }
 0x267   : > { %1897 = vmatpush.bf16.xpose.msrb.mxu3 %v1888_v9  ;;  %v1938_v13 = vpop.xlane.xlu1 %1937  ;;  %v2450_v9 = vunpack.c.l.b16 %v1136_v22 }
 0x268   : > { %v1262_v10 = vpop.f32.mrf.mxu3  ;;  %v2032_v15 = vsub.f32 %v6377_v48, %v1938_v13 }
 0x26a   : > { %v2064_v38 = vmul.f32 1.442695, %v2032_v15 }
 0x26b   : > { %v6484_v33 = vpop.f32.mrf.mxu0 }
 0x26c   : > { %5278 = vpow2.f32 %v2064_v38 }
 0x26d   : > { %v1881_v21 = vpop.permute.xlu0 %1880 }
 0x270   : > { %v6492_v16 = vpop.xlane.xlu1 %1943 }
 0x271   : > { %v2034_v13 = vsub.f32 %v6391_v58, %v6492_v16 }
 0x272   : > { %v6502_v27 = vpop.eup %5278 }
 0x273   : > { %v1464_v12 = vpop.f32.mrf.mxu0  ;;  %v2128_v30 = vsel %vm1935_vm2, %v6502_v27, 0.0 }
 0x275   : > { %4634 = vmatmul.msk.bf16.vlgmr.msra.gmra.mxu2 %vm1158_vm0, %v6412_v6 }
 0x276   : > { %4635 = vmatmul.msk.bf16.vlgmr.msra.gmra.mxu3 %vm1158_vm0, %v1789_v11  ;;  %v1941_v45 = vpop.xlane.xlu2 %1940 }
 0x277   : > { %v2033_v47 = vsub.f32 %v6406_v2, %v1941_v45 }
 0x279   : > { %v2066_v51 = vmul.f32 1.442695, %v2033_v47 }
 0x27b   : > { %v6489_v14 = vpop.f32.mrf.mxu0 }
 0x283   : > { %v1289_v18 = vpop.f32.mrf.mxu1  ;;  %v1556_v19 = vpop.f32.mrf.mxu0 }
 0x284   : > { %v6495_v20 = vadd.f32 %v1289_v18, %v6393_v59  ;;  %v2068_v19 = vmul.f32 1.442695, %v2034_v13 }
 0x286   : > { %4639 = vmatmul.msk.bf16.vlgmr.msrb.gmra.mxu3 %vm1158_vm0, %v1881_v21  ;;  %v1951_v6 = vsel %vm1935_vm2, %v6495_v20, -inf  ;;  %v1137_v21 = vpack.c.bf16 %v6470_v1, %v6470_v1 }
 0x287   : > { %1952 = vmax.xlane.f32.xlu2 %v1951_v6 }
 0x288   : > { %v1860_v48 = vpop.permute.xlu1 %1859 }
 0x289   : > { %v1865_v24 = vsel %vm1158_vm0, %v1860_v48, 0 }
 0x28a   : > { %1874 = vmatpush.bf16.xpose.msrb.mxu2 %v1865_v24  ;;  %v2382_v24 = vsel %vm2323_vm6, %v1137_v21, 0 }
 0x28b   : > { %v1291_v28 = vpop.f32.mrf.mxu1  ;;  %v6504_v25 = vpop.f32.mrf.mxu0  ;;  %2391 = vmatpush.bf16.msra.mxu3 %v2382_v24 }
 0x28c   : > { %v6576_v28 = vadd.f32 %v6484_v33, %v6366_v43 }
 0x28f   : > { %2129 = vadd.xlane.f32.xlu2 %v2128_v30 }
 0x290   : > { %v1947_v62 = vpop.xlane.xlu0 %1946 }
 0x291   : > { %4638 = vmatmul.msk.bf16.vlgmr.msrb.gmra.mxu2 %vm1158_vm0, %v1858_v61  ;;  %v2035_v36 = vsub.f32 %v6432_v26, %v1947_v62  ;;  %v6551_v61 = vpack.c.b16 %v2450_v9, %v2450_v9 }
 0x292   : > { %2372 = vmatpush.bf16.msra.mxu2 %v2363_v23 }
 0x293   : > { %v1393_v34 = vpop.f32.mrf.mxu1  ;;  %v1648_v35 = vpop.f32.mrf.mxu0  ;;  %v2070_v39 = vmul.f32 1.442695, %v2035_v36 }
 0x294   : > { %v6560_v22 = vadd.f32 %v1393_v34, %v6393_v59 }
 0x295   : > { %5280 = vpow2.f32 %v2070_v39 }
 0x296   : > { %5282 = vpow2.f32 %v2066_v51  ;;  %v1963_v1 = vsel %vm1935_vm2, %v6560_v22, -inf  ;;  %v2426_v51 = vunpack.c.l.b16 %v1135_v53 }
 0x297   : > { %1961 = vmax.xlane.f32.xlu2 %v1960_v37  ;;  %5284 = vpow2.f32 %v2068_v19  ;;  %v1972_v37 = vsel %vm1935_vm2, %v6576_v28, -inf }
 0x29b   : > { %v1395_v41 = vpop.f32.mrf.mxu1  ;;  %v6518_v42 = vpop.f32.mrf.mxu0 }
 0x29c   : > { %v6523_v26 = vpop.eup %5280 }
 0x29d   : > { %v2137_v52 = vsel %vm1935_vm2, %v6523_v26, 0.0  ;;  %v6536_v0 = vpop.eup %5282 }
 0x29e   : > { %v2131_v7 = vsel %vm1935_vm2, %v6536_v0, 0.0  ;;  %v6578_v30 = vpop.eup %5284 }
 0x29f   : > { %1949 = vmax.xlane.f32.xlu2 %v1948_v44  ;;  %v2134_v36 = vsel %vm1935_vm2, %v6578_v30, 0.0 }
 0x2a3   : > { %v1485_v49 = vpop.f32.mrf.mxu1  ;;  %v1740_v46 = vpop.f32.mrf.mxu0 }
 0x2a4   : > { %v6563_v58 = vadd.f32 %v1485_v49, %v6393_v59 }
 0x2a6   : > { %v1975_v48 = vsel %vm1935_vm2, %v6563_v58, -inf }
 0x2a7   : > { %2138 = vadd.xlane.f32.xlu2 %v2137_v52 }
 0x2a8   : > { %v1318_v54 = vpop.f32.mrf.mxu2  ;;  %v1347_v55 = vpop.f32.mrf.mxu3 }
 0x2a9   : > { %v6528_v57 = vadd.f32 %v1318_v54, %v6388_v56  ;;  %v6544_v10 = vadd.f32 %v1347_v55, %v6421_v17  ;;  %v6600_v55 = vpack.c.b16 %v2426_v51, %v2426_v51 }
 0x2ab   : > { %v1487_v60 = vpop.f32.mrf.mxu1  ;;  %v6530_v63 = vpop.f32.mrf.mxu0  ;;  %v1954_v2 = vsel %vm1935_vm2, %v6528_v57, -inf  ;;  %v1957_v18 = vsel %vm1935_vm2, %v6544_v10, -inf }
 0x2ac   : > { %1955 = vmax.xlane.f32.xlu1 %v1954_v2 }
 0x2b0   : > { %v1320_v3 = vpop.f32.mrf.mxu2  ;;  %v1349_v29 = vpop.f32.mrf.mxu3 }
 0x2b1   : > { %v2474_v3 = vunpack.c.l.b16 %v1137_v21 }
 0x2b3   : > { %v6538_v4 = vpop.f32.mrf.mxu1  ;;  %v1832_v5 = vpop.f32.mrf.mxu0 }
 0x2b4   : > { %2132 = vadd.xlane.f32.xlu1 %v2131_v7  ;;  %v6609_v7 = vpack.c.b16 %v2474_v3, %v2474_v3 }
 0x2b8   : > { %v1416_v11 = vpop.f32.mrf.mxu2  ;;  %v1439_v50 = vpop.f32.mrf.mxu3 }
 0x2b9   : > { %v6547_v12 = vadd.f32 %v1416_v11, %v6388_v56  ;;  %v6585_v39 = vadd.f32 %v1439_v50, %v6421_v17  ;;  %v2402_v50 = vunpack.c.l.b16 %v6436_v31 }
 0x2bb   : > { %v1579_v15 = vpop.f32.mrf.mxu1  ;;  %v1966_v38 = vsel %vm1935_vm2, %v6547_v12, -inf  ;;  %v1969_v45 = vsel %vm1935_vm2, %v6585_v39, -inf }
 0x2bc   : > { %1967 = vmax.xlane.f32.xlu0 %v1966_v38  ;;  %1958 = vmax.xlane.f32.xlu1 %v1957_v18  ;;  %v6622_v38 = vpack.c.b16 %v2402_v50, %v2402_v50 }
 0x2bf   : > { %2452 = vrot.lane.b32.xlu2 %v6551_v61, %s5865_s6 }
 0x2c0   : > { %v1418_v16 = vpop.f32.mrf.mxu2  ;;  %v1441_v6 = vpop.f32.mrf.mxu3 }
 0x2c3   : > { %v6567_v23 = vpop.f32.mrf.mxu1 }
 0x2c4   : > { %1976 = vmax.xlane.f32.xlu0 %v1975_v48  ;;  %1964 = vmax.xlane.f32.xlu1 %v1963_v1 }
 0x2c8   : > { %v1508_v62 = vpop.f32.mrf.mxu2 }
 0x2c9   : > { %v1531_v34 = vpop.f32.mrf.mxu3  ;;  %v6592_v47 = vadd.f32 %v1508_v62, %v6388_v56 }
 0x2ca   : > { %v6605_v29 = vadd.f32 %v1531_v34, %v6421_v17 }
 0x2cb   : > { %v1671_v35 = vpop.f32.mrf.mxu1  ;;  %v1978_v54 = vsel %vm1935_vm2, %v6592_v47, -inf }
 0x2cc   : > { %2135 = vadd.xlane.f32.xlu0 %v2134_v36  ;;  %1973 = vmax.xlane.f32.xlu1 %v1972_v37  ;;  %v1981_v53 = vsel %vm1935_vm2, %v6605_v29, -inf }
 0x2d0   : > { %v1510_v41 = vpop.f32.mrf.mxu2 }
 0x2d1   : > { %v1533_v44 = vpop.f32.mrf.mxu3 }
 0x2d3   : > { %v6587_v33 = vpop.f32.mrf.mxu1 }
 0x2d4   : > { %1970 = vmax.xlane.f32.xlu1 %v1969_v45 }
 0x2d8   : > { %v6594_v49 = vpop.f32.mrf.mxu2 }
 0x2d9   : > { %v6596_v46 = vpop.f32.mrf.mxu3 }
 0x2db   : > { %v1763_v52 = vpop.f32.mrf.mxu1 }
 0x2dc   : > { %1979 = vmax.xlane.f32.xlu1 %v1978_v54 }
 0x2e0   : > { %v1602_v60 = vpop.f32.mrf.mxu2  ;;  %2428 = vrot.lane.b32.xlu0 %v6600_v55, %s5865_s6 }
 0x2e1   : > { %v1625_v2 = vpop.f32.mrf.mxu3 }
 0x2e3   : > { %v6607_v5 = vpop.f32.mrf.mxu1 }
 0x2e8   : > { %1982 = vmax.xlane.f32.xlu2 %v1981_v53  ;;  %v6613_v8 = vpop.f32.mrf.mxu2  ;;  %2476 = vrot.lane.b32.xlu0 %v6609_v7, %s5865_s6 }
 0x2e9   : > { %v6617_v9 = vpop.f32.mrf.mxu3 }
 0x2eb   : > { %v1855_v11 = vpop.f32.mrf.mxu1 }
 0x2f0   : > { %v1694_v13 = vpop.f32.mrf.mxu2  ;;  %2606 = vrot.lane.b32.xlu0 %v6551_v61, %s5864_s0 }
 0x2f1   : > { %v1717_v15 = vpop.f32.mrf.mxu3 }
 0x2f5   : > { %2564 = vrot.lane.b32.xlu1 %v6622_v38, %s5864_s0 }
 0x2f8   : > { %v6626_v18 = vpop.f32.mrf.mxu2 }
 0x2f9   : > { %v6628_v19 = vpop.f32.mrf.mxu3 }
 0x2fa   : > { %v1953_v21 = vpop.xlane.xlu2 %1952 }
 0x2fb   : > { %v2037_v48 = vsub.f32 %v6495_v20, %v1953_v21 }
 0x2fd   : > { %2404 = vrot.lane.b32.xlu1 %v6622_v38, %s5865_s6  ;;  %v2074_v35 = vmul.f32 1.442695, %v2037_v48 }
 0x300   : > { %2585 = vrot.lane.b32.xlu2 %v6600_v55, %s5864_s0  ;;  %v1786_v31 = vpop.f32.mrf.mxu2 }
 0x301   : > { %v1809_v16 = vpop.f32.mrf.mxu3 }
 0x302   : > { %v2130_v6 = vpop.xlane.xlu2 %2129 }
 0x303   : > { %5286 = vrcp.f32 %v2130_v6 }
 0x304   : > { %5288 = vpow2.f32 %v2074_v35 }
 0x309   : > { %v5287_v1 = vpop.eup %5286  ;;  %v6635_v24 = vpop.f32.mrf.mxu3 }
 0x30a   : > { %v2256_v62 = vmul.f32 %v5287_v1, %v6502_v27  ;;  %v1962_v34 = vpop.xlane.xlu2 %1961  ;;  %v6642_v51 = vpop.eup %5288 }
 0x30b   : > { %v2040_v45 = vsub.f32 %v6510_v32, %v1962_v34  ;;  %v2143_v27 = vsel %vm1935_vm2, %v6642_v51, 0.0 }
 0x30c   : > { %v2288_v36 = vpack.c.bf16 %v2256_v62, %v2256_v62 }
 0x30d   : > { %v2080_v52 = vmul.f32 1.442695, %v2040_v45 }
 0x30e   : > { %4640 = vmatmul.msk.bf16.vlgmr.msrb.gmra.mxu0 %vm1935_vm2, %v2288_v36 }
 0x311   : > { %v1901_v37 = vpop.f32.mrf.mxu3 }
 0x312   : > { %v1950_v41 = vpop.xlane.xlu2 %1949 }
 0x313   : > { %v2036_v20 = vsub.f32 %v6516_v40, %v1950_v41 }
 0x314   : > { %v6639_v44 = vpop.f32.mrf.mxu2 }
 0x315   : > { %v2072_v60 = vmul.f32 1.442695, %v2036_v20 }
 0x31a   : > { %v2139_v54 = vpop.xlane.xlu2 %2138  ;;  %2144 = vadd.xlane.f32.xlu0 %v2143_v27 }
 0x31b   : > { %5290 = vrcp.f32 %v2139_v54 }
 0x31c   : > { %v1878_v2 = vpop.f32.mrf.mxu2  ;;  %5292 = vpow2.f32 %v2080_v52 }
 0x31d   : > { %5294 = vpow2.f32 %v2072_v60 }
 0x31f   : > { %v1956_v3 = vpop.xlane.xlu1 %1955 }
 0x320   : > { %v2038_v53 = vsub.f32 %v6528_v57, %v1956_v3 }
 0x321   : > { %v5291_v11 = vpop.eup %5290 }
 0x322   : > { %v2259_v32 = vmul.f32 %v5291_v11, %v6523_v26  ;;  %v2453_v50 = vpop.permute.xlu2 %2452  ;;  %v6649_v13 = vpop.eup %5292  ;;  %v2076_v40 = vmul.f32 1.442695, %v2038_v53 }
 0x323   : > { %v2458_v15 = vsel %vm2323_vm6, %v2453_v50, 0  ;;  %v6652_v31 = vpop.eup %5294  ;;  %v2152_v16 = vsel %vm1935_vm2, %v6649_v13, 0.0 }
 0x324   : > { %v2291_v21 = vpack.c.bf16 %v2259_v32, %v2259_v32  ;;  %2467 = vmatpush.bf16.msrb.mxu2 %v2458_v15  ;;  %5296 = vpow2.f32 %v2076_v40  ;;  %v2140_v26 = vsel %vm1935_vm2, %v6652_v31, 0.0 }
 0x326   : > { %4643 = vmatmul.msk.bf16.vlgmr.msra.gmra.mxu3 %vm1935_vm2, %v2291_v21 }
 0x327   : > { %v2133_v57 = vpop.xlane.xlu1 %2132  ;;  %2153 = vadd.xlane.f32.xlu1 %v2152_v16 }
 0x328   : > { %5298 = vrcp.f32 %v2133_v57 }
 0x329   : > { %2141 = vadd.xlane.f32.xlu2 %v2140_v26 }
 0x32a   : > { %v6659_v6 = vpop.eup %5296 }
 0x32b   : > { %v2146_v36 = vsel %vm1935_vm2, %v6659_v6, 0.0 }
 0x32e   : > { %v5299_v48 = vpop.eup %5298 }
 0x32f   : > { %v2257_v1 = vmul.f32 %v5299_v48, %v6536_v0  ;;  %v1968_v62 = vpop.xlane.xlu0 %1967  ;;  %v1959_v34 = vpop.xlane.xlu1 %1958 }
 0x330   : > { %v2039_v35 = vsub.f32 %v6544_v10, %v1959_v34 }
 0x331   : > { %v2289_v37 = vpack.c.bf16 %v2257_v1, %v2257_v1  ;;  %2147 = vadd.xlane.f32.xlu2 %v2146_v36 }
 0x332   : > { %v2078_v41 = vmul.f32 1.442695, %v2039_v35 }
 0x333   : > { %4641 = vmatmul.msk.bf16.vlgmr.msra.gmra.mxu1 %vm1935_vm2, %v2289_v37 }
 0x334   : > { %5300 = vpow2.f32 %v2078_v41 }
 0x337   : > { %v1977_v45 = vpop.xlane.xlu0 %1976  ;;  %v1965_v20 = vpop.xlane.xlu1 %1964 }
 0x338   : > { %v2045_v52 = vsub.f32 %v6563_v58, %v1977_v45  ;;  %v2041_v27 = vsub.f32 %v6560_v22, %v1965_v20  ;;  %v2042_v58 = vsub.f32 %v6547_v12, %v1968_v62 }
 0x33a   : > { %v2090_v0 = vmul.f32 1.442695, %v2045_v52  ;;  %v2082_v54 = vmul.f32 1.442695, %v2041_v27  ;;  %v6668_v60 = vpop.eup %5300  ;;  %v2084_v21 = vmul.f32 1.442695, %v2042_v58 }
 0x33b   : > { %v2149_v10 = vsel %vm1935_vm2, %v6668_v60, 0.0 }
 0x33c   : > { %5302 = vpow2.f32 %v2090_v0  ;;  %2150 = vadd.xlane.f32.xlu1 %v2149_v10 }
 0x33d   : > { %5304 = vpow2.f32 %v2082_v54 }
 0x33f   : > { %v2136_v2 = vpop.xlane.xlu0 %2135  ;;  %v1974_v3 = vpop.xlane.xlu1 %1973 }
 0x340   : > { %5306 = vrcp.f32 %v2136_v2  ;;  %v2044_v53 = vsub.f32 %v6576_v28, %v1974_v3 }
 0x342   : > { %v6673_v11 = vpop.eup %5302  ;;  %v2088_v22 = vmul.f32 1.442695, %v2044_v53 }
 0x343   : > { %v6676_v32 = vpop.eup %5304  ;;  %v2167_v50 = vsel %vm1935_vm2, %v6673_v11, 0.0 }
 0x344   : > { %5308 = vpow2.f32 %v2088_v22  ;;  %2168 = vadd.xlane.f32.xlu2 %v2167_v50  ;;  %v2155_v40 = vsel %vm1935_vm2, %v6676_v32, 0.0 }
 0x345   : > { %2156 = vadd.xlane.f32.xlu0 %v2155_v40  ;;  %5310 = vpow2.f32 %v2084_v21 }
 0x346   : > { %v5307_v15 = vpop.eup %5306 }
 0x347   : > { %v2258_v28 = vmul.f32 %v5307_v15, %v6578_v30  ;;  %v1971_v16 = vpop.xlane.xlu1 %1970 }
 0x348   : > { %v2043_v58 = vsub.f32 %v6585_v39, %v1971_v16 }
 0x349   : > { %v2290_v57 = vpack.c.bf16 %v2258_v28, %v2258_v28 }
 0x34a   : > { %v6683_v26 = vpop.eup %5308  ;;  %v2086_v22 = vmul.f32 1.442695, %v2043_v58 }
 0x34b   : > { %4642 = vmatmul.msk.bf16.vlgmr.msra.gmra.mxu2 %vm1935_vm2, %v2290_v57  ;;  %v2164_v12 = vsel %vm1935_vm2, %v6683_v26, 0.0  ;;  %v6688_v1 = vpop.eup %5310 }
 0x34c   : > { %2165 = vadd.xlane.f32.xlu1 %v2164_v12  ;;  %v2158_v36 = vsel %vm1935_vm2, %v6688_v1, 0.0  ;;  %v6728_v12 = vadd.f32 %v6567_v23, %v6393_v59  ;;  %v6740_v23 = vadd.f32 %v6594_v49, %v6388_v56 }
 0x34f   : > { %v1980_v48 = vpop.xlane.xlu1 %1979 }
 0x350   : > { %v2046_v62 = vsub.f32 %v6592_v47, %v1980_v48  ;;  %v5041_v48 = vld [vmem:[#allocation14] sm:$0xff] }
 0x352   : > { %v2092_v34 = vmul.f32 1.442695, %v2046_v62  ;;  %v2429_v35 = vpop.permute.xlu0 %2428 }
 0x353   : > { %v2434_v30 = vsel %vm2323_vm6, %v2429_v35, 0 }
 0x354   : > { %5312 = vpow2.f32 %v2092_v34  ;;  %2443 = vmatpush.bf16.msrb.mxu1 %v2434_v30  ;;  %2159 = vadd.xlane.f32.xlu1 %v2158_v36  ;;  %v1999_v34 = vsel %vm1935_vm2, %v6728_v12, -inf  ;;  %v6735_v36 = vadd.f32 %v6538_v4, %v6393_v59  ;;  %v6750_v4 = vadd.f32 %v6617_v9, %v6421_v17 }
 0x358   : > { %2552 = vmatpush.bf16.msra.mxu1 %v5041_v48 }
 0x359   : > { %2627 = vrot.lane.b32.xlu0 %v6609_v7, %s5864_s0 }
 0x35a   : > { %v6696_v37 = vpop.eup %5312  ;;  %v2477_v41 = vpop.permute.xlu0 %2476 }
 0x35b   : > { %v1983_v45 = vpop.xlane.xlu2 %1982  ;;  %v2482_v20 = vsel %vm2323_vm6, %v2477_v41, 0  ;;  %v2170_v47 = vsel %vm1935_vm2, %v6696_v37, 0.0 }
 0x35c   : > { %2709 = vrot.lane.b32.xlu2 %v6600_v55, %s5867_s3  ;;  %2171 = vadd.xlane.f32.xlu1 %v2170_v47  ;;  %v2047_v3 = vsub.f32 %v6605_v29, %v1983_v45  ;;  %v6720_v29 = vadd.f32 %v6596_v46, %v6421_v17  ;;  %v1987_v45 = vsel %vm1935_vm2, %v6735_v36, -inf }
 0x35d   : > { %2491 = vmatpush.bf16.msrb.mxu3 %v2482_v20 }
 0x35e   : > { %v2094_v53 = vmul.f32 1.442695, %v2047_v3  ;;  %v1993_v16 = vsel %vm1935_vm2, %v6720_v29, -inf }
 0x360   : > { %5314 = vpow2.f32 %v2094_v53 }
 0x361   : > { %2688 = vrot.lane.b32.xlu0 %v6622_v38, %s5867_s3  ;;  %5316 = vpow2.f32 %v2086_v22 }
 0x362   : > { %v2607_v15 = vpop.permute.xlu0 %2606 }
 0x363   : > { %v2586_v52 = vpop.permute.xlu2 %2585  ;;  %v2612_v9 = vsel %vm2323_vm6, %v2607_v15, 0 }
 0x364   : > { %v2591_v27 = vsel %vm2323_vm6, %v2586_v52, 0  ;;  %v2005_v52 = vsel %vm1935_vm2, %v6750_v4, -inf }
 0x365   : > { %2600 = vmatpush.bf16.msra.mxu3 %v2591_v27 }
 0x366   : > { %v6712_v50 = vpop.eup %5314 }
 0x367   : > { %v2565_v0 = vpop.permute.xlu1 %2564  ;;  %v2173_v40 = vsel %vm1935_vm2, %v6712_v50, 0.0  ;;  %v6716_v21 = vpop.eup %5316 }
 0x368   : > { %v2570_v54 = vsel %vm2323_vm6, %v2565_v0, 0  ;;  %v2161_v28 = vsel %vm1935_vm2, %v6716_v21, 0.0 }
 0x369   : > { %2579 = vmatpush.bf16.msra.mxu2 %v2570_v54 }
 0x36f   : > { %v2405_v10 = vpop.permute.xlu1 %2404 }
 0x370   : > { %v2410_v2 = vsel %vm2323_vm6, %v2405_v10, 0 }
 0x371   : > { %2419 = vmatpush.bf16.msra.mxu0 %v2410_v2 }
 0x375   : > { %2751 = vrot.lane.b32.xlu1 %v6609_v7, %s5867_s3 }
 0x385   : > { %2174 = vadd.xlane.f32.xlu2 %v2173_v40 }
 0x38b   : > { %v2336_v39 = vpop.f32.mrf.mxu0  ;;  %2162 = vadd.xlane.f32.xlu0 %v2161_v28 }
 0x38d   : > { %1994 = vmax.xlane.f32.xlu2 %v1993_v16  ;;  %v2145_v57 = vpop.xlane.xlu0 %2144 }
 0x38e   : > { %5318 = vrcp.f32 %v2145_v57 }
 0x393   : > { %v2338_v62 = vpop.f32.mrf.mxu0 }
 0x394   : > { %v5319_v46 = vpop.eup %5318 }
 0x395   : > { %v2261_v35 = vmul.f32 %v5319_v46, %v6642_v51  ;;  %2000 = vmax.xlane.f32.xlu2 %v1999_v34  ;;  %v1990_v51 = vsel %vm1935_vm2, %v6740_v23, -inf }
 0x397   : > { %v2293_v30 = vpack.c.bf16 %v2261_v35, %v2261_v35 }
 0x399   : > { %4645 = vmatmul.msk.bf16.vlgmr.msrb.gmra.mxu1 %vm1935_vm2, %v2293_v30 }
 0x39a   : > { %v2154_v0 = vpop.xlane.xlu1 %2153 }
 0x39c   : > { %v2142_v41 = vpop.xlane.xlu2 %2141 }
 0x39d   : > { %5320 = vrcp.f32 %v2142_v41  ;;  %1988 = vmax.xlane.f32.xlu2 %v1987_v45 }
 0x39f   : > { %2730 = vrot.lane.b32.xlu0 %v6551_v61, %s5867_s3  ;;  %1991 = vmax.xlane.f32.xlu1 %v1990_v51 }
 0x3a3   : > { %v5321_v20 = vpop.eup %5320 }
 0x3a4   : > { %v2260_v49 = vmul.f32 %v5321_v20, %v6652_v31  ;;  %v2148_v47 = vpop.xlane.xlu2 %2147 }
 0x3a5   : > { %5322 = vrcp.f32 %v2148_v47  ;;  %2006 = vmax.xlane.f32.xlu2 %v2005_v52 }
 0x3a6   : > { %v2292_v27 = vpack.c.bf16 %v2260_v49, %v2260_v49  ;;  %5324 = vrcp.f32 %v2154_v0  ;;  %v6778_v49 = vadd.f32 %v6504_v25, %v6366_v43 }
 0x3a8   : > { %4644 = vmatmul.msk.bf16.vlgmr.msra.gmra.mxu0 %vm1935_vm2, %v2292_v27  ;;  %v1996_v0 = vsel %vm1935_vm2, %v6778_v49, -inf }
 0x3a9   : > { %v2393_v54 = vpop.f32.mrf.mxu3 }
 0x3ab   : > { %v5323_v10 = vpop.eup %5322 }
 0x3ac   : > { %v2262_v2 = vmul.f32 %v5323_v10, %v6659_v6  ;;  %v5325_v40 = vpop.eup %5324 }
 0x3ad   : > { %v2264_v15 = vmul.f32 %v5325_v40, %v6649_v13  ;;  %v6771_v13 = vadd.f32 %v6489_v14, %v6366_v43 }
 0x3ae   : > { %v2294_v3 = vpack.c.bf16 %v2262_v2, %v2262_v2  ;;  %v6789_v2 = vadd.f32 %v6613_v8, %v6388_v56 }
 0x3af   : > { %v2151_v31 = vpop.xlane.xlu1 %2150  ;;  %v1984_v45 = vsel %vm1935_vm2, %v6771_v13, -inf }
 0x3b0   : > { %4646 = vmatmul.msk.bf16.vlgmr.msrb.gmra.mxu2 %vm1935_vm2, %v2294_v3  ;;  %v2355_v53 = vpop.f32.mrf.mxu1  ;;  %5326 = vrcp.f32 %v2151_v31 }
 0x3b1   : > { %2621 = vmatpush.bf16.msrb.mxu2 %v2612_v9  ;;  %v2397_v58 = vpack.c.bf16 %v2355_v53, %v2336_v39  ;;  %v2395_v22 = vpop.f32.mrf.mxu3  ;;  %v2296_v39 = vpack.c.bf16 %v2264_v15, %v2264_v15  ;;  %v2002_v9 = vsel %vm1935_vm2, %v6789_v2, -inf }
 0x3b3   : > { %4658 = vmatmul.msk.bf16.vlgmr.msra.gmra.mxu1 %vm1158_vm0, %v2397_v58 }
 0x3b6   : > { %v5327_v28 = vpop.eup %5326 }
 0x3b7   : > { %v2169_v16 = vpop.xlane.xlu2 %2168  ;;  %v2263_v57 = vmul.f32 %v5327_v28, %v6668_v60 }
 0x3b8   : > { %v2357_v6 = vpop.f32.mrf.mxu1  ;;  %2812 = vrot.lane.b32.xlu1 %v6622_v38, %s5866_s13  ;;  %v2157_v62 = vpop.xlane.xlu0 %2156 }
 0x3b9   : > { %v2295_v48 = vpack.c.bf16 %v2263_v57, %v2263_v57  ;;  %5328 = vrcp.f32 %v2157_v62 }
 0x3bb   : > { %4647 = vmatmul.msk.bf16.vlgmr.msrb.gmra.mxu3 %vm1935_vm2, %v2295_v48 }
 0x3bf   : > { %v2710_v46 = vpop.permute.xlu2 %2709  ;;  %v2166_v34 = vpop.xlane.xlu1 %2165 }
 0x3c0   : > { %v2715_v35 = vsel %vm2323_vm6, %v2710_v46, 0  ;;  %4660 = vmatmul.msk.bf16.vlgmr.msra.gmra.mxu2 %vm1935_vm2, %v2296_v39  ;;  %2957 = vrot.lane.b32.xlu1 %v6600_v55, %s5869_s14  ;;  %v5329_v60 = vpop.eup %5328 }
 0x3c1   : > { %2724 = vmatpush.bf16.msra.mxu2 %v2715_v35  ;;  %v2265_v30 = vmul.f32 %v5329_v60, %v6676_v32 }
 0x3c3   : > { %v2297_v51 = vpack.c.bf16 %v2265_v30, %v2265_v30  ;;  %v5044_v30 = vld [vmem:[#allocation14 + $0x18] sm:$0xff] }
 0x3c7   : > { %v2160_v41 = vpop.xlane.xlu1 %2159 }
 0x3c8   : > { %5330 = vrcp.f32 %v2160_v41 }
 0x3c9   : > { %1985 = vmax.xlane.f32.xlu0 %v1984_v45  ;;  %5332 = vrcp.f32 %v2166_v34 }
 0x3ca   : > { %5334 = vrcp.f32 %v2169_v16 }
 0x3cb   : > { %v2628_v20 = vpop.permute.xlu0 %2627  ;;  %4661 = vmatmul.msk.bf16.vlgmr.msra.gmra.mxu3 %vm1935_vm2, %v2297_v51 }
 0x3cc   : > { %v2633_v47 = vsel %vm2323_vm6, %v2628_v20, 0 }
 0x3cd   : > { %2642 = vmatpush.bf16.msrb.mxu3 %v2633_v47 }
 0x3ce   : > { %v5331_v14 = vpop.eup %5330  ;;  %v2374_v52 = vpop.f32.mrf.mxu2 }
 0x3cf   : > { %v2266_v32 = vmul.f32 %v5331_v14, %v6688_v1  ;;  %v2398_v27 = vpack.c.bf16 %v2393_v54, %v2374_v52  ;;  %v5333_v54 = vpop.eup %5332  ;;  %v2172_v40 = vpop.xlane.xlu1 %2171 }
 0x3d0   : > { %v5335_v31 = vpop.eup %5334  ;;  %v2268_v53 = vmul.f32 %v5333_v54, %v6683_v26 }
 0x3d1   : > { %v2298_v10 = vpack.c.bf16 %v2266_v32, %v2266_v32  ;;  %1997 = vmax.xlane.f32.xlu0 %v1996_v0  ;;  %4659 = vmatmul.msk.bf16.gmra.mxu1 %vm1158_vm0, %v2398_v27  ;;  %v2269_v58 = vmul.f32 %v5335_v31, %v6673_v11  ;;  %v5042_v11 = vld [vmem:[#allocation14 + $0x8] sm:$0xff]  ;;  %v5043_v27 = vld [vmem:[#allocation14 + $0x10] sm:$0xff] }
 0x3d2   : > { %v2300_v22 = vpack.c.bf16 %v2268_v53, %v2268_v53  ;;  %2521 = vmatpush.bf16.msrb.mxu0 %v5042_v11 }
 0x3d3   : > { %v2689_v25 = vpop.permute.xlu0 %2688  ;;  %4662 = vmatmul.msk.bf16.vlgmr.msrb.gmra.mxu2 %vm1935_vm2, %v2298_v10  ;;  %v2301_v28 = vpack.c.bf16 %v2269_v58, %v2269_v58 }
 0x3d4   : > { %v2694_v3 = vsel %vm2323_vm6, %v2689_v25, 0  ;;  %2796 = vmatpush.bf16.msrb.mxu2 %v5044_v30 }
 0x3d5   : > { %2703 = vmatpush.bf16.msrb.mxu1 %v2694_v3 }
 0x3d6   : > { %v2376_v1 = vpop.f32.mrf.mxu2  ;;  %2672 = vmatpush.bf16.msra.mxu0 %v5043_v27 }
 0x3d9   : > { %2003 = vmax.xlane.f32.xlu0 %v2002_v9 }
 0x3e1   : > { %4670 = vmatmul.msk.bf16.vlgmr.msrb.gmra.mxu1 %vm1935_vm2, %v2300_v22 }
 0x3e3   : > { %4671 = vmatmul.msk.bf16.vlgmr.msra.gmra.mxu2 %vm1935_vm2, %v2301_v28 }
 0x3e7   : > { %v2752_v8 = vpop.permute.xlu1 %2751 }
 0x3e8   : > { %v2757_v16 = vsel %vm2323_vm6, %v2752_v8, 0 }
 0x3e9   : > { %2766 = vmatpush.bf16.msra.mxu1 %v2757_v16 }
 0x3f8   : > { %v2175_v57 = vpop.xlane.xlu2 %2174 }
 0x3f9   : > { %5336 = vrcp.f32 %v2175_v57 }
 0x3fe   : > { %v2163_v6 = vpop.xlane.xlu0 %2162 }
 0x3ff   : > { %v5337_v15 = vpop.eup %5336  ;;  %5338 = vrcp.f32 %v2163_v6 }
 0x400   : > { %v2271_v26 = vmul.f32 %v5337_v15, %v6712_v50  ;;  %5340 = vrcp.f32 %v2172_v40  ;;  %v1995_v58 = vpop.xlane.xlu2 %1994 }
 0x402   : > { %v2303_v48 = vpack.c.bf16 %v2271_v26, %v2271_v26 }
 0x404   : > { %4673 = vmatmul.msk.bf16.vlgmr.msra.gmra.mxu1 %vm1935_vm2, %v2303_v48 }
 0x405   : > { %v5339_v62 = vpop.eup %5338 }
 0x406   : > { %v2267_v39 = vmul.f32 %v5339_v62, %v6716_v21  ;;  %v5341_v34 = vpop.eup %5340 }
 0x407   : > { %v2270_v50 = vmul.f32 %v5341_v34, %v6696_v37 }
 0x408   : > { %v2299_v46 = vpack.c.bf16 %v2267_v39, %v2267_v39  ;;  %v2001_v11 = vpop.xlane.xlu2 %2000 }
 0x409   : > { %v2302_v45 = vpack.c.bf16 %v2270_v50, %v2270_v50  ;;  %v2053_v34 = vsub.f32 %v6728_v12, %v2001_v11  ;;  %v2051_v12 = vsub.f32 %v6720_v29, %v1995_v58 }
 0x40a   : > { %4663 = vmatmul.msk.bf16.vlgmr.msrb.gmra.mxu3 %vm1935_vm2, %v2299_v46 }
 0x40b   : > { %v2106_v50 = vmul.f32 1.442695, %v2053_v34 }
 0x411   : > { %v2731_v35 = vpop.permute.xlu0 %2730 }
 0x412   : > { %v2736_v60 = vsel %vm2323_vm6, %v2731_v35, 0  ;;  %v1992_v21 = vpop.xlane.xlu1 %1991 }
 0x413   : > { %2745 = vmatpush.bf16.msra.mxu3 %v2736_v60  ;;  %v2050_v57 = vsub.f32 %v6740_v23, %v1992_v21 }
 0x415   : > { %v2100_v26 = vmul.f32 1.442695, %v2050_v57 }
 0x416   : > { %v2445_v41 = vpop.f32.mrf.mxu1 }
 0x41a   : > { %4672 = vmatmul.msk.bf16.vlgmr.msra.gmra.mxu3 %vm1935_vm2, %v2302_v45 }
 0x41e   : > { %v2447_v51 = vpop.f32.mrf.mxu1 }
 0x425   : > { %v2421_v20 = vpop.f32.mrf.mxu0 }
 0x426   : > { %v2497_v47 = vpack.c.bf16 %v2445_v41, %v2421_v20 }
 0x428   : > { %4652 = vmatmul.msk.bf16.vlgmr.msrb.gmra.mxu0 %vm1158_vm0, %v2497_v47 }
 0x42a   : > { %v2813_v14 = vpop.permute.xlu1 %2812 }
 0x42b   : > { %v2818_v52 = vsel %vm2323_vm6, %v2813_v14, 0  ;;  %v2102_v14 = vmul.f32 1.442695, %v2051_v12 }
 0x42c   : > { %2827 = vmatpush.bf16.msrb.mxu3 %v2818_v52 }
 0x42d   : > { %v2423_v32 = vpop.f32.mrf.mxu0 }
 0x430   : > { %v6809_v3 = vpop.f32.mrf.mxu1 }
 0x432   : > { %v2958_v0 = vpop.permute.xlu1 %2957 }
 0x433   : > { %v2469_v37 = vpop.f32.mrf.mxu2  ;;  %v2963_v10 = vsel %vm2323_vm6, %v2958_v0, 0 }
 0x434   : > { %2972 = vmatpush.bf16.msra.mxu2 %v2963_v10 }
 0x438   : > { %v6814_v8 = vpop.f32.mrf.mxu1 }
 0x43b   : > { %v2471_v25 = vpop.f32.mrf.mxu2 }
 0x43c   : > { %v1986_v1 = vpop.xlane.xlu0 %1985 }
 0x43d   : > { %v2048_v54 = vsub.f32 %v6771_v13, %v1986_v1 }
 0x43e   : > { %v2493_v31 = vpop.f32.mrf.mxu3 }
 0x43f   : > { %v2096_v9 = vmul.f32 1.442695, %v2048_v54  ;;  %v2498_v53 = vpack.c.bf16 %v2493_v31, %v2469_v37 }
 0x441   : > { %5342 = vpow2.f32 %v2096_v9  ;;  %4653 = vmatmul.msk.bf16.gmra.mxu0 %vm1158_vm0, %v2498_v53  ;;  %v1989_v9 = vpop.xlane.xlu2 %1988 }
 0x442   : > { %v2049_v31 = vsub.f32 %v6735_v36, %v1989_v9  ;;  %v6866_v36 = vadd.f32 %v6626_v18, %v6388_v56 }
 0x443   : > { %v2581_v22 = vpop.f32.mrf.mxu2 }
 0x444   : > { %v1998_v40 = vpop.xlane.xlu0 %1997  ;;  %v2098_v53 = vmul.f32 1.442695, %v2049_v31  ;;  %v6929_v31 = vadd.f32 %v6635_v24, %v6421_v17 }
 0x445   : > { %v2052_v28 = vsub.f32 %v6778_v49, %v1998_v40 }
 0x446   : > { %v2495_v15 = vpop.f32.mrf.mxu3 }
 0x447   : > { %v6816_v16 = vpop.eup %5342  ;;  %v2104_v6 = vmul.f32 1.442695, %v2052_v28 }
 0x448   : > { %v2176_v13 = vsel %vm1935_vm2, %v6816_v16, 0.0 }
 0x449   : > { %5344 = vpow2.f32 %v2104_v6  ;;  %2177 = vadd.xlane.f32.xlu0 %v2176_v13  ;;  %v2007_v15 = vpop.xlane.xlu2 %2006 }
 0x44a   : > { %5346 = vpow2.f32 %v2100_v26  ;;  %v2055_v26 = vsub.f32 %v6750_v4, %v2007_v15  ;;  %v6882_v4 = vadd.f32 %v6518_v42, %v6366_v43  ;;  %v6896_v42 = vadd.f32 %v6530_v63, %v6366_v43 }
 0x44b   : > { %v2583_v48 = vpop.f32.mrf.mxu2 }
 0x44c   : > { %v2004_v62 = vpop.xlane.xlu0 %2003  ;;  %v2014_v48 = vsel %vm1935_vm2, %v6866_v36, -inf  ;;  %v2110_v11 = vmul.f32 1.442695, %v2055_v26 }
 0x44d   : > { %v2054_v39 = vsub.f32 %v6789_v2, %v2004_v62 }
 0x44e   : > { %v6822_v49 = vpop.f32.mrf.mxu1  ;;  %v2602_v35 = vpop.f32.mrf.mxu3 }
 0x44f   : > { %v6824_v46 = vpop.eup %5344  ;;  %v2108_v23 = vmul.f32 1.442695, %v2054_v39  ;;  %v2648_v60 = vpack.c.bf16 %v2602_v35, %v2581_v22 }
 0x450   : > { %v2188_v30 = vsel %vm1935_vm2, %v6824_v46, 0.0  ;;  %v6830_v41 = vpop.eup %5346 }
 0x451   : > { %5348 = vpow2.f32 %v2108_v23  ;;  %2189 = vadd.xlane.f32.xlu2 %v2188_v30  ;;  %4668 = vmatmul.msk.bf16.vlgmr.msra.gmra.mxu0 %vm1158_vm0, %v2648_v60  ;;  %v2182_v20 = vsel %vm1935_vm2, %v6830_v41, 0.0  ;;  %v2008_v60 = vsel %vm1935_vm2, %v6882_v4, -inf  ;;  %v6888_v30 = vadd.f32 %v6607_v5, %v6393_v59 }
 0x452   : > { %5350 = vpow2.f32 %v2106_v50 }
 0x453   : > { %5352 = vpow2.f32 %v2102_v14 }
 0x454   : > { %5354 = vpow2.f32 %v2098_v53 }
 0x455   : > { %5356 = vpow2.f32 %v2110_v11 }
 0x456   : > { %v6832_v2 = vpop.f32.mrf.mxu1  ;;  %v2623_v45 = vpop.f32.mrf.mxu2 }
 0x457   : > { %v6834_v51 = vpop.eup %5348  ;;  %v2604_v21 = vpop.f32.mrf.mxu3 }
 0x458   : > { %v2194_v47 = vsel %vm1935_vm2, %v6834_v51, 0.0  ;;  %v6841_v52 = vpop.eup %5350 }
 0x459   : > { %2183 = vadd.xlane.f32.xlu2 %v2182_v20  ;;  %2195 = vadd.xlane.f32.xlu1 %v2194_v47  ;;  %v2191_v29 = vsel %vm1935_vm2, %v6841_v52, 0.0  ;;  %v6847_v0 = vpop.eup %5352  ;;  %v2020_v20 = vsel %vm1935_vm2, %v6896_v42, -inf }
 0x45a   : > { %v2185_v1 = vsel %vm1935_vm2, %v6847_v0, 0.0  ;;  %v6859_v40 = vpop.eup %5354 }
 0x45b   : > { %v2179_v6 = vsel %vm1935_vm2, %v6859_v40, 0.0  ;;  %v6874_v23 = vpop.eup %5356 }
 0x45c   : > { %v2197_v18 = vsel %vm1935_vm2, %v6874_v23, 0.0 }
 0x45d   : > { %2854 = vrot.lane.b32.xlu0 %v6551_v61, %s5866_s13 }
 0x45e   : > { %v2625_v32 = vpop.f32.mrf.mxu2  ;;  %v2705_v27 = vpop.f32.mrf.mxu1 }
 0x45f   : > { %v6905_v32 = vadd.f32 %v6587_v33, %v6393_v59  ;;  %v6919_v33 = vadd.f32 %v6628_v19, %v6421_v17 }
 0x461   : > { %2192 = vadd.xlane.f32.xlu2 %v2191_v29  ;;  %v2011_v43 = vsel %vm1935_vm2, %v6905_v32, -inf }
 0x465   : > { %2875 = vrot.lane.b32.xlu0 %v6609_v7, %s5866_s13 }
 0x466   : > { %v2707_v37 = vpop.f32.mrf.mxu1  ;;  %v2726_v10 = vpop.f32.mrf.mxu2 }
 0x467   : > { %v2772_v25 = vpack.c.bf16 %v2726_v10, %v2705_v27  ;;  %v6914_v37 = vadd.f32 %v6639_v44, %v6388_v56 }
 0x469   : > { %2186 = vadd.xlane.f32.xlu2 %v2185_v1  ;;  %4678 = vmatmul.msk.bf16.vlgmr.msrb.gmra.mxu2 %vm1158_vm0, %v2772_v25 }
 0x46e   : > { %v2728_v54 = vpop.f32.mrf.mxu2 }
 0x46f   : > { %v2026_v54 = vsel %vm1935_vm2, %v6914_v37, -inf }
 0x472   : > { %2978 = vrot.lane.b32.xlu1 %v6551_v61, %s5869_s14 }
 0x481   : > { %2936 = vrot.lane.b32.xlu2 %v6622_v38, %s5869_s14  ;;  %v2768_v58 = vpop.f32.mrf.mxu1 }
 0x489   : > { %v2770_v22 = vpop.f32.mrf.mxu1 }
 0x48d   : > { %v2644_v28 = vpop.f32.mrf.mxu3 }
 0x48e   : > { %v2649_v57 = vpack.c.bf16 %v2644_v28, %v2623_v45  ;;  %v2023_v45 = vsel %vm1935_vm2, %v6888_v30, -inf }
 0x48f   : > { %2180 = vadd.xlane.f32.xlu0 %v2179_v6 }
 0x490   : > { %4669 = vmatmul.msk.bf16.gmra.mxu0 %vm1158_vm0, %v2649_v57 }
 0x495   : > { %v2646_v13 = vpop.f32.mrf.mxu3 }
 0x49c   : > { %2015 = vmax.xlane.f32.xlu1 %v2014_v48 }
 0x49d   : > { %v2747_v62 = vpop.f32.mrf.mxu3 }
 0x49e   : > { %v2773_v39 = vpack.c.bf16 %v2768_v58, %v2747_v62 }
 0x4a0   : > { %4679 = vmatmul.msk.bf16.gmra.mxu2 %vm1158_vm0, %v2773_v39 }
 0x4a3   : > { %2833 = vrot.lane.b32.xlu0 %v6600_v55, %s5866_s13  ;;  %s7309_s13 = sld [smem:[#allocation42_spill]] }
 0x4a5   : > { %v2749_v34 = vpop.f32.mrf.mxu3  ;;  %v2523_v35 = vpop.f32.mrf.mxu0 }
 0x4aa   : > { %2198 = vadd.xlane.f32.xlu2 %v2197_v18 }
 0x4ab   : > { %2999 = vrot.lane.b32.xlu0 %v6609_v7, %s5869_s14  ;;  %s7310_s14 = sld [smem:[#allocation43_spill]] }
 0x4ad   : > { %v6890_v50 = vpop.f32.mrf.mxu0 }
 0x4b2   : > { %2009 = vmax.xlane.f32.xlu2 %v2008_v60 }
 0x4ba   : > { %2024 = vmax.xlane.f32.xlu2 %v2023_v45 }
 0x4bc   : > { %v2178_v12 = vpop.xlane.xlu0 %2177 }
 0x4bd   : > { %5358 = vrcp.f32 %v2178_v12 }
 0x4be   : > { %v6898_v21 = vpop.f32.mrf.mxu0 }
 0x4c2   : > { %2021 = vmax.xlane.f32.xlu2 %v2020_v20  ;;  %v2560_v20 = vadd.f32 %v6822_v49, %v6898_v21 }
 0x4c3   : > { %v5359_v5 = vpop.eup %5358 }
 0x4c4   : > { %v2272_v47 = vmul.f32 %v5359_v5, %v6816_v16  ;;  %v2190_v14 = vpop.xlane.xlu2 %2189  ;;  %v2555_v16 = vadd.f32 %v6809_v3, %v2523_v35  ;;  %v2017_v3 = vsel %vm1935_vm2, %v6919_v33, -inf }
 0x4c6   : > { %v2304_v27 = vpack.c.bf16 %v2272_v47, %v2272_v47  ;;  %v6907_v29 = vpop.f32.mrf.mxu0 }
 0x4c8   : > { %4680 = vmatmul.msk.bf16.vlgmr.msrb.gmra.mxu3 %vm1935_vm2, %v2304_v27 }
 0x4ca   : > { %2012 = vmax.xlane.f32.xlu2 %v2011_v43 }
 0x4cc   : > { %v2184_v63 = vpop.xlane.xlu2 %2183  ;;  %v2196_v28 = vpop.xlane.xlu1 %2195 }
 0x4cd   : > { %5360 = vrcp.f32 %v2184_v63 }
 0x4ce   : > { %v2674_v59 = vpop.f32.mrf.mxu0 }
 0x4cf   : > { %v2855_v10 = vpop.permute.xlu0 %2854  ;;  %v2684_v1 = vadd.f32 %v2674_v59, %v2555_v16 }
 0x4d0   : > { %v2860_v25 = vsel %vm2323_vm6, %v2855_v10, 0 }
 0x4d1   : > { %2869 = vmatpush.bf16.msrb.mxu1 %v2860_v25 }
 0x4d2   : > { %2027 = vmax.xlane.f32.xlu2 %v2026_v54 }
 0x4d3   : > { %v5361_v9 = vpop.eup %5360 }
 0x4d4   : > { %v2274_v56 = vmul.f32 %v5361_v9, %v6830_v41  ;;  %v2193_v44 = vpop.xlane.xlu2 %2192  ;;  %v2029_v41 = vsel %vm1935_vm2, %v6929_v31, -inf }
 0x4d5   : > { %5362 = vrcp.f32 %v2193_v44  ;;  %2018 = vmax.xlane.f32.xlu0 %v2017_v3 }
 0x4d6   : > { %v2306_v19 = vpack.c.bf16 %v2274_v56, %v2274_v56  ;;  %5364 = vrcp.f32 %v2190_v14  ;;  %v6953_v45 = vpop.f32.mrf.mxu0 }
 0x4d7   : > { %v2876_v53 = vpop.permute.xlu0 %2875 }
 0x4d8   : > { %v2881_v58 = vsel %vm2323_vm6, %v2876_v53, 0  ;;  %4682 = vmatmul.msk.bf16.vlgmr.msrb.gmra.mxu1 %vm1935_vm2, %v2306_v19 }
 0x4d9   : > { %2890 = vmatpush.bf16.msra.mxu3 %v2881_v58 }
 0x4da   : > { %2030 = vmax.xlane.f32.xlu2 %v2029_v41 }
 0x4db   : > { %v5363_v22 = vpop.eup %5362 }
 0x4dc   : > { %v2277_v57 = vmul.f32 %v5363_v22, %v6841_v52  ;;  %v2187_v17 = vpop.xlane.xlu2 %2186  ;;  %v5365_v6 = vpop.eup %5364 }
 0x4dd   : > { %5366 = vrcp.f32 %v2187_v17  ;;  %v2276_v13 = vmul.f32 %v5365_v6, %v6824_v46 }
 0x4de   : > { %v2309_v24 = vpack.c.bf16 %v2277_v57, %v2277_v57  ;;  %5368 = vrcp.f32 %v2196_v28 }
 0x4df   : > { %v2308_v52 = vpack.c.bf16 %v2276_v13, %v2276_v13 }
 0x4e0   : > { %4691 = vmatmul.msk.bf16.vlgmr.msra.gmra.mxu2 %vm1935_vm2, %v2309_v24  ;;  %v5046_v24 = vld [vmem:[#allocation14 + $0x28] sm:$0xff] }
 0x4e1   : > { %3044 = vmatpush.bf16.msrb.mxu2 %v5046_v24 }
 0x4e3   : > { %v5367_v15 = vpop.eup %5366 }
 0x4e4   : > { %v2275_v26 = vmul.f32 %v5367_v15, %v6847_v0  ;;  %v2937_v48 = vpop.permute.xlu2 %2936  ;;  %v2979_v11 = vpop.permute.xlu1 %2978 }
 0x4e5   : > { %v2942_v62 = vsel %vm2323_vm6, %v2937_v48, 0  ;;  %v2984_v39 = vsel %vm2323_vm6, %v2979_v11, 0  ;;  %v5369_v46 = vpop.eup %5368 }
 0x4e6   : > { %v2307_v34 = vpack.c.bf16 %v2275_v26, %v2275_v26  ;;  %2951 = vmatpush.bf16.msra.mxu1 %v2942_v62  ;;  %2993 = vmatpush.bf16.msrb.mxu3 %v2984_v39  ;;  %v2278_v0 = vmul.f32 %v5369_v46, %v6834_v51 }
 0x4e8   : > { %4683 = vmatmul.msk.bf16.vlgmr.msra.gmra.mxu3 %vm1935_vm2, %v2307_v34  ;;  %v2310_v60 = vpack.c.bf16 %v2278_v0, %v2278_v0 }
 0x4e9   : > { %4690 = vmatmul.msk.bf16.vlgmr.msra.gmra.mxu1 %vm1935_vm2, %v2308_v52 }
 0x4ec   : > { %v2798_v18 = vpop.f32.mrf.mxu2 }
 0x4ed   : > { %v6943_v35 = vadd.f32 %v2798_v18, %v2684_v1 }
 0x4f2   : > { %3060 = vrot.lane.b32.xlu2 %v6622_v38, %s5863_s2 }
 0x4f4   : > { %v6963_v49 = vpop.f32.mrf.mxu2 }
 0x4f8   : > { %4692 = vmatmul.msk.bf16.vlgmr.msrb.gmra.mxu3 %vm1935_vm2, %v2310_v60 }
 0x4fa   : > { %3123 = vrot.lane.b32.xlu2 %v6609_v7, %s5863_s2 }
 0x502   : > { %3184 = vrot.lane.b32.xlu2 %v6622_v38, %s5868_s1  ;;  %v2181_v12 = vpop.xlane.xlu0 %2180 }
 0x503   : > { %5370 = vrcp.f32 %v2181_v12 }
 0x509   : > { %v5371_v27 = vpop.eup %5370 }
 0x50a   : > { %v2273_v63 = vmul.f32 %v5371_v27, %v6859_v40 }
 0x50c   : > { %v2305_v10 = vpack.c.bf16 %v2273_v63, %v2273_v63 }
 0x50d   : > { %v2679_v51 = vpop.f32.mrf.mxu0 }
 0x50e   : > { %v2686_v5 = vadd.f32 %v2679_v51, %v2560_v20 }
 0x50f   : > { %v2016_v47 = vpop.xlane.xlu1 %2015 }
 0x510   : > { %v2058_v14 = vsub.f32 %v6866_v36, %v2016_v47 }
 0x512   : > { %v2116_v43 = vmul.f32 1.442695, %v2058_v14 }
 0x514   : > { %5372 = vpow2.f32 %v2116_v43 }
 0x515   : > { %v2834_v16 = vpop.permute.xlu0 %2833 }
 0x516   : > { %v2839_v38 = vsel %vm2323_vm6, %v2834_v16, 0 }
 0x517   : > { %2848 = vmatpush.bf16.msrb.mxu0 %v2839_v38 }
 0x51a   : > { %v6960_v59 = vpop.eup %5372  ;;  %4681 = vmatmul.msk.bf16.vlgmr.msrb.gmra.mxu0 %vm1935_vm2, %v2305_v10 }
 0x51b   : > { %v2206_v21 = vsel %vm1935_vm2, %v6960_v59, 0.0 }
 0x51c   : > { %2207 = vadd.xlane.f32.xlu0 %v2206_v21 }
 0x51d   : > { %v2199_v36 = vpop.xlane.xlu2 %2198  ;;  %v3000_v25 = vpop.permute.xlu0 %2999 }
 0x51e   : > { %5374 = vrcp.f32 %v2199_v36  ;;  %v3005_v40 = vsel %vm2323_vm6, %v3000_v25, 0 }
 0x51f   : > { %3014 = vmatpush.bf16.msrb.mxu1 %v3005_v40 }
 0x523   : > { %v2803_v1 = vpop.f32.mrf.mxu2 }
 0x524   : > { %v5375_v54 = vpop.eup %5374  ;;  %v6968_v9 = vadd.f32 %v2803_v1, %v2686_v5 }
 0x525   : > { %v2279_v56 = vmul.f32 %v5375_v54, %v6874_v23  ;;  %v2010_v44 = vpop.xlane.xlu2 %2009 }
 0x526   : > { %v2056_v3 = vsub.f32 %v6882_v4, %v2010_v44  ;;  %v5045_v44 = vld [vmem:[#allocation14 + $0x20] sm:$0xff] }
 0x527   : > { %v2311_v19 = vpack.c.bf16 %v2279_v56, %v2279_v56  ;;  %2920 = vmatpush.bf16.msra.mxu0 %v5045_v44 }
 0x528   : > { %v2112_v53 = vmul.f32 1.442695, %v2056_v3 }
 0x529   : > { %4693 = vmatmul.msk.bf16.vlgmr.msrb.gmra.mxu1 %vm1935_vm2, %v2311_v19 }
 0x52a   : > { %5376 = vpow2.f32 %v2112_v53 }
 0x52b   : > { %v6998_v12 = vpop.f32.mrf.mxu2 }
 0x52d   : > { %v2025_v58 = vpop.xlane.xlu2 %2024 }
 0x52e   : > { %v2061_v6 = vsub.f32 %v6888_v30, %v2025_v58  ;;  %v7022_v58 = vpop.f32.mrf.mxu0 }
 0x530   : > { %v6973_v41 = vpop.eup %5376  ;;  %v2122_v11 = vmul.f32 1.442695, %v2061_v6 }
 0x531   : > { %v2200_v22 = vsel %vm1935_vm2, %v6973_v41, 0.0 }
 0x532   : > { %2201 = vadd.xlane.f32.xlu1 %v2200_v22 }
 0x535   : > { %v2022_v28 = vpop.xlane.xlu2 %2021 }
 0x53d   : > { %v2013_v57 = vpop.xlane.xlu2 %2012 }
 0x53e   : > { %v2057_v20 = vsub.f32 %v6905_v32, %v2013_v57 }
 0x540   : > { %v2114_v27 = vmul.f32 1.442695, %v2057_v20 }
 0x545   : > { %v2028_v17 = vpop.xlane.xlu2 %2027 }
 0x546   : > { %v2062_v21 = vsub.f32 %v6914_v37, %v2028_v17 }
 0x548   : > { %v2019_v23 = vpop.xlane.xlu0 %2018  ;;  %v2124_v54 = vmul.f32 1.442695, %v2062_v21 }
 0x549   : > { %v2059_v4 = vsub.f32 %v6919_v33, %v2019_v23  ;;  %v2060_v33 = vsub.f32 %v6896_v42, %v2022_v28 }
 0x54b   : > { %v2118_v15 = vmul.f32 1.442695, %v2059_v4  ;;  %3102 = vrot.lane.b32.xlu1 %v6551_v61, %s5863_s2  ;;  %v6981_v13 = vpop.f32.mrf.mxu3  ;;  %v2120_v46 = vmul.f32 1.442695, %v2060_v33 }
 0x54d   : > { %5378 = vpow2.f32 %v2118_v15  ;;  %v2031_v26 = vpop.xlane.xlu2 %2030 }
 0x54e   : > { %v2063_v48 = vsub.f32 %v6929_v31, %v2031_v26 }
 0x550   : > { %v2126_v62 = vmul.f32 1.442695, %v2063_v48 }
 0x552   : > { %5380 = vpow2.f32 %v2126_v62 }
 0x553   : > { %v6984_v39 = vpop.eup %5378  ;;  %5382 = vpow2.f32 %v2122_v11  ;;  %3205 = vrot.lane.b32.xlu1 %v6600_v55, %s5868_s1  ;;  %v2831_v30 = vpop.f32.mrf.mxu3 }
 0x554   : > { %v2209_v34 = vsel %vm1935_vm2, %v6984_v39, 0.0  ;;  %5384 = vpow2.f32 %v2120_v46 }
 0x555   : > { %v3061_v52 = vpop.permute.xlu2 %3060  ;;  %2210 = vadd.xlane.f32.xlu0 %v2209_v34  ;;  %v2871_v18 = vpop.f32.mrf.mxu1  ;;  %5386 = vpow2.f32 %v2114_v27 }
 0x556   : > { %v3066_v31 = vsel %vm2323_vm6, %v3061_v52, 0  ;;  %5388 = vpow2.f32 %v2124_v54 }
 0x557   : > { %3075 = vmatpush.bf16.msra.mxu3 %v3066_v31 }
 0x558   : > { %v6992_v0 = vpop.eup %5380 }
 0x559   : > { %v6994_v60 = vpop.eup %5382  ;;  %v2221_v42 = vsel %vm1935_vm2, %v6992_v0, 0.0 }
 0x55a   : > { %2222 = vadd.xlane.f32.xlu2 %v2221_v42  ;;  %v2215_v51 = vsel %vm1935_vm2, %v6994_v60, 0.0  ;;  %v7004_v43 = vpop.eup %5384 }
 0x55b   : > { %v2212_v16 = vsel %vm1935_vm2, %v7004_v43, 0.0  ;;  %v7008_v10 = vpop.eup %5386 }
 0x55c   : > { %v2203_v40 = vsel %vm1935_vm2, %v7008_v10, 0.0  ;;  %v7014_v3 = vpop.eup %5388 }
 0x55d   : > { %v3124_v5 = vpop.permute.xlu2 %3123  ;;  %2216 = vadd.xlane.f32.xlu0 %v2215_v51  ;;  %v2873_v47 = vpop.f32.mrf.mxu1  ;;  %v2218_v53 = vsel %vm1935_vm2, %v7014_v3, 0.0 }
 0x55e   : > { %v3129_v14 = vsel %vm2323_vm6, %v3124_v5, 0 }
 0x55f   : > { %3138 = vmatpush.bf16.msrb.mxu3 %v3129_v14 }
 0x563   : > { %v2974_v63 = vpop.f32.mrf.mxu2 }
 0x565   : > { %2213 = vadd.xlane.f32.xlu0 %v2212_v16  ;;  %v3185_v26 = vpop.permute.xlu2 %3184 }
 0x566   : > { %v2953_v38 = vpop.f32.mrf.mxu1  ;;  %v3190_v33 = vsel %vm2323_vm6, %v3185_v26, 0 }
 0x567   : > { %v3020_v32 = vpack.c.bf16 %v2974_v63, %v2953_v38 }
 0x569   : > { %4698 = vmatmul.msk.bf16.vlgmr.msrb.gmra.mxu2 %vm1158_vm0, %v3020_v32 }
 0x56b   : > { %v2892_v36 = vpop.f32.mrf.mxu3  ;;  %v2976_v25 = vpop.f32.mrf.mxu2 }
 0x56d   : > { %2204 = vadd.xlane.f32.xlu0 %v2203_v40 }
 0x56e   : > { %v2955_v1 = vpop.f32.mrf.mxu1 }
 0x573   : > { %v2894_v56 = vpop.f32.mrf.mxu3 }
 0x57b   : > { %v2995_v19 = vpop.f32.mrf.mxu3 }
 0x57d   : > { %2219 = vadd.xlane.f32.xlu1 %v2218_v53 }
 0x581   : > { %3081 = vrot.lane.b32.xlu0 %v6600_v55, %s5863_s2  ;;  %v2897_v55 = vpack.c.bf16 %v2892_v36, %v2871_v18  ;;  %s7308_s2 = sld [smem:[#allocation47_spill]] }
 0x583   : > { %v2997_v37 = vpop.f32.mrf.mxu3 }
 0x589   : > { %3226 = vrot.lane.b32.xlu0 %v6551_v61, %s5868_s1 }
 0x58f   : > { %v2208_v15 = vpop.xlane.xlu0 %2207 }
 0x591   : > { %3247 = vrot.lane.b32.xlu0 %v6609_v7, %s5868_s1 }
 0x597   : > { %v2850_v22 = vpop.f32.mrf.mxu0 }
 0x598   : > { %v2896_v28 = vpack.c.bf16 %v2850_v22, %v6981_v13 }
 0x59a   : > { %4688 = vmatmul.msk.bf16.vlgmr.msra.gmra.mxu0 %vm1158_vm0, %v2896_v28  ;;  %v2557_v28 = vadd.f32 %v6814_v8, %v6890_v50 }
 0x59f   : > { %v2852_v57 = vpop.f32.mrf.mxu0 }
 0x5a5   : > { %v2202_v17 = vpop.xlane.xlu1 %2201 }
 0x5a6   : > { %5390 = vrcp.f32 %v2202_v17  ;;  %v3016_v24 = vpop.f32.mrf.mxu1  ;;  %v2685_v17 = vadd.f32 %v6953_v45, %v2557_v28 }
 0x5a7   : > { %v3021_v23 = vpack.c.bf16 %v3016_v24, %v2995_v19  ;;  %5392 = vrcp.f32 %v2208_v15  ;;  %v2562_v15 = vadd.f32 %v6832_v2, %v6907_v29 }
 0x5a8   : > { %v2809_v24 = vadd.f32 %v6963_v49, %v2685_v17 }
 0x5a9   : > { %4699 = vmatmul.msk.bf16.gmra.mxu2 %vm1158_vm0, %v3021_v23 }
 0x5aa   : > { %4689 = vmatmul.msk.bf16.gmra.mxu0 %vm1158_vm0, %v2897_v55 }
 0x5ac   : > { %v5391_v61 = vpop.eup %5390 }
 0x5ad   : > { %v2280_v4 = vmul.f32 %v5391_v61, %v6973_v41  ;;  %v5393_v13 = vpop.eup %5392 }
 0x5ae   : > { %v3018_v6 = vpop.f32.mrf.mxu1  ;;  %v2282_v48 = vmul.f32 %v5393_v13, %v6960_v59  ;;  %v2687_v13 = vadd.f32 %v7022_v58, %v2562_v15 }
 0x5af   : > { %v2312_v7 = vpack.c.bf16 %v2280_v4, %v2280_v4 }
 0x5b0   : > { %v2314_v30 = vpack.c.bf16 %v2282_v48, %v2282_v48  ;;  %v2811_v50 = vadd.f32 %v6998_v12, %v2687_v13 }
 0x5b1   : > { %4700 = vmatmul.msk.bf16.vlgmr.msra.gmra.mxu3 %vm1935_vm2, %v2312_v7 }
 0x5bd   : > { %v3103_v11 = vpop.permute.xlu1 %3102 }
 0x5be   : > { %v3108_v62 = vsel %vm2323_vm6, %v3103_v11, 0 }
 0x5bf   : > { %3117 = vmatpush.bf16.msra.mxu1 %v3108_v62 }
 0x5c2   : > { %4702 = vmatmul.msk.bf16.vlgmr.msra.gmra.mxu1 %vm1935_vm2, %v2314_v30 }
 0x5c3   : > { %3199 = vmatpush.bf16.msrb.mxu1 %v3190_v33  ;;  %v5048_v33 = vld [vmem:[#allocation14 + $0x38] sm:$0xff] }
 0x5c5   : > { %v3206_v41 = vpop.permute.xlu1 %3205 }
 0x5c6   : > { %v3211_v34 = vsel %vm2323_vm6, %v3206_v41, 0 }
 0x5c7   : > { %3220 = vmatpush.bf16.msra.mxu2 %v3211_v34 }
 0x5c8   : > { %v2211_v52 = vpop.xlane.xlu0 %2210 }
 0x5c9   : > { %5394 = vrcp.f32 %v2211_v52 }
 0x5cb   : > { %3292 = vmatpush.bf16.msrb.mxu2 %v5048_v33 }
 0x5cd   : > { %v2223_v21 = vpop.xlane.xlu2 %2222 }
 0x5cf   : > { %v5395_v18 = vpop.eup %5394 }
 0x5d0   : > { %v2283_v31 = vmul.f32 %v5395_v18, %v6984_v39  ;;  %v2217_v59 = vpop.xlane.xlu0 %2216 }
 0x5d1   : > { %5396 = vrcp.f32 %v2217_v59 }
 0x5d2   : > { %v2315_v46 = vpack.c.bf16 %v2283_v31, %v2283_v31 }
 0x5d4   : > { %4703 = vmatmul.msk.bf16.vlgmr.msrb.gmra.mxu3 %vm1935_vm2, %v2315_v46 }
 0x5d7   : > { %v5397_v42 = vpop.eup %5396 }
 0x5d8   : > { %v2285_v20 = vmul.f32 %v5397_v42, %v6994_v60  ;;  %v2214_v51 = vpop.xlane.xlu0 %2213 }
 0x5d9   : > { %5398 = vrcp.f32 %v2214_v51 }
 0x5da   : > { %v2317_v5 = vpack.c.bf16 %v2285_v20, %v2285_v20 }
 0x5dc   : > { %4711 = vmatmul.msk.bf16.vlgmr.msra.gmra.mxu2 %vm1935_vm2, %v2317_v5 }
 0x5df   : > { %v5399_v47 = vpop.eup %5398 }
 0x5e0   : > { %v2284_v14 = vmul.f32 %v5399_v47, %v7004_v43  ;;  %v2205_v39 = vpop.xlane.xlu0 %2204 }
 0x5e1   : > { %5400 = vrcp.f32 %v2205_v39 }
 0x5e2   : > { %v2316_v27 = vpack.c.bf16 %v2284_v14, %v2284_v14 }
 0x5e4   : > { %4710 = vmatmul.msk.bf16.vlgmr.msrb.gmra.mxu1 %vm1935_vm2, %v2316_v27 }
 0x5e7   : > { %v5401_v63 = vpop.eup %5400 }
 0x5e8   : > { %v2281_v38 = vmul.f32 %v5401_v63, %v7008_v10  ;;  %v5271_v63 = vld [vmem:[%s7221_s8] ss:$0 sm:$0xff] }
 0x5ea   : > { %v2313_v36 = vpack.c.bf16 %v2281_v38, %v2281_v38 }
 0x5ec   : > { %v3046_v37 = vpop.f32.mrf.mxu2 }
 0x5f0   : > { %v2220_v16 = vpop.xlane.xlu1 %2219 }
 0x5f1   : > { %5402 = vrcp.f32 %v2220_v16 }
 0x5f2   : > { %5404 = vrcp.f32 %v2223_v21 }
 0x5f3   : > { %v3082_v32 = vpop.permute.xlu0 %3081 }
 0x5f4   : > { %v3087_v60 = vsel %vm2323_vm6, %v3082_v32, 0  ;;  %v3048_v55 = vpop.f32.mrf.mxu2  ;;  %v5424_v32 = vld [vmem:[%s6223_s12] sm:$0xff] }
 0x5f5   : > { %3096 = vmatpush.bf16.msrb.mxu0 %v3087_v60 }
 0x5f7   : > { %v5403_v25 = vpop.eup %5402 }
 0x5f8   : > { %4701 = vmatmul.msk.bf16.vlgmr.msrb.gmra.mxu0 %vm1935_vm2, %v2313_v36  ;;  %v2286_v43 = vmul.f32 %v5403_v25, %v7014_v3  ;;  %v5405_v56 = vpop.eup %5404 }
 0x5f9   : > { %v2287_v10 = vmul.f32 %v5405_v56, %v6992_v0 }
 0x5fa   : > { %v2318_v54 = vpack.c.bf16 %v2286_v43, %v2286_v43 }
 0x5fb   : > { %v3227_v40 = vpop.permute.xlu0 %3226  ;;  %v2319_v53 = vpack.c.bf16 %v2287_v10, %v2287_v10 }
 0x5fc   : > { %v3232_v1 = vsel %vm2323_vm6, %v3227_v40, 0 }
 0x5fd   : > { %3241 = vmatpush.bf16.msra.mxu3 %v3232_v1  ;;  %v5425_v1 = vld [vmem:[%s6223_s12 + $0x8] sm:$0xff] }
 0x600   : > { %4712 = vmatmul.msk.bf16.vlgmr.msra.gmra.mxu3 %vm1935_vm2, %v2318_v54 }
 0x603   : > { %v3248_v44 = vpop.permute.xlu0 %3247 }
 0x604   : > { %v3253_v19 = vsel %vm2323_vm6, %v3248_v44, 0 }
 0x605   : > { %3262 = vmatpush.bf16.msra.mxu1 %v3253_v19 }
 0x608   : > { %4713 = vmatmul.msk.bf16.vlgmr.msra.gmra.mxu1 %vm1935_vm2, %v2319_v53 }
 0x617   : > { %v2922_v22 = vpop.f32.mrf.mxu0 }
 0x618   : > { %v2932_v3 = vadd.f32 %v2922_v22, %v6943_v35  ;;  %v5426_v22 = vld [vmem:[%s6223_s12 + $0x10] sm:$0xff] }
 0x61a   : > { %v3056_v57 = vadd.f32 %v3046_v37, %v2932_v3 }
 0x61f   : > { %v2924_v0 = vpop.f32.mrf.mxu0 }
 0x620   : > { %v2933_v23 = vadd.f32 %v2924_v0, %v2809_v24  ;;  %v5427_v0 = vld [vmem:[%s6223_s12 + $0x18] sm:$0xff]  ;;  %s7307_s12 = sld [smem:[#allocation45_spill]] }
 0x622   : > { %v3057_v61 = vadd.f32 %v3048_v55, %v2933_v23  ;;  %v5871_v55 = vmov 128.0  }
 0x623   : > { %5406 = vrcp.f32 %v5871_v55  ;;  %v4794_v55 = vld [vmem:[#allocation16 + $0x88] sm:$0xf] }
 0x627   : > { %v2927_v4 = vpop.f32.mrf.mxu0 }
 0x628   : > { %v2934_v6 = vadd.f32 %v2927_v4, %v6968_v9  ;;  %v5047_v9 = vld [vmem:[#allocation14 + $0x30] sm:$0xff] }
 0x629   : > { %3168 = vmatpush.bf16.msra.mxu0 %v5047_v9 }
 0x62c   : > { %v3051_v7 = vpop.f32.mrf.mxu2 }
 0x62d   : > { %v3058_v35 = vadd.f32 %v3051_v7, %v2934_v6 }
 0x62f   : > { %v2929_v8 = vpop.f32.mrf.mxu0 }
 0x630   : > { %v2935_v45 = vadd.f32 %v2929_v8, %v2811_v50 }
 0x634   : > { %v3053_v26 = vpop.f32.mrf.mxu2  ;;  %v3077_v49 = vpop.f32.mrf.mxu3 }
 0x635   : > { %v3059_v48 = vadd.f32 %v3053_v26, %v2935_v45 }
 0x63c   : > { %v3079_v11 = vpop.f32.mrf.mxu3 }
 0x63f   : > { %v3119_v62 = vpop.f32.mrf.mxu1 }
 0x647   : > { %v3121_v30 = vpop.f32.mrf.mxu1 }
 0x657   : > { %v3140_v41 = vpop.f32.mrf.mxu3 }
 0x658   : > { %v3145_v20 = vpack.c.bf16 %v3140_v41, %v3119_v62 }
 0x65f   : > { %v3142_v34 = vpop.f32.mrf.mxu3  ;;  %v3222_v2 = vpop.f32.mrf.mxu2 }
 0x661   : > { %v3201_v29 = vpop.f32.mrf.mxu1 }
 0x662   : > { %v3268_v52 = vpack.c.bf16 %v3222_v2, %v3201_v29 }
 0x664   : > { %4718 = vmatmul.msk.bf16.vlgmr.msrb.gmra.mxu2 %vm1158_vm0, %v3268_v52  ;;  %v4834_v52 = vld [vmem:[#allocation16 + $0xe0] sm:$0xf] }
 0x667   : > { %v3224_v58 = vpop.f32.mrf.mxu2 }
 0x668   : > { %v5079_v58 = vld [vmem:[#allocation16 + $0xec] sm:$0xf0] }
 0x669   : > { %v3203_v12 = vpop.f32.mrf.mxu1 }
 0x66a   : > { %v5077_v12 = vld [vmem:[#allocation16 + $0xe4] sm:$0xf] }
 0x675   : > { %v3098_v18 = vpop.f32.mrf.mxu0 }
 0x676   : > { %v3144_v31 = vpack.c.bf16 %v3098_v18, %v3077_v49  ;;  %v4835_v18 = vor.u32 %v5079_v58, %v4834_v52  ;;  %v4754_v58 = vld [vmem:[#allocation16 + $0x40] sm:$0xf] }
 0x678   : > { %4708 = vmatmul.msk.bf16.vlgmr.msra.gmra.mxu0 %vm1158_vm0, %v3144_v31  ;;  %v4836_v31 = vld [vmem:[#allocation16 + $0xf0] sm:$0xf0] }
 0x679   : > { %3627 = vmatpush.bf16.msrb.mxu0 %v4835_v18  ;;  %v5057_v18 = vld [vmem:[#allocation16 + $0x44] sm:$0xf] }
 0x67d   : > { %v3100_v59 = vpop.f32.mrf.mxu0 }
 0x67e   : > { %v4842_v59 = vld [vmem:[#allocation16 + $0xe8] sm:$0xf] }
 0x683   : > { %v3243_v46 = vpop.f32.mrf.mxu3 }
 0x685   : > { %v3264_v42 = vpop.f32.mrf.mxu1 }
 0x686   : > { %v3269_v51 = vpack.c.bf16 %v3264_v42, %v3243_v46  ;;  %v5080_v46 = vld [vmem:[#allocation16 + $0xf4] sm:$0xf0]  ;;  %v4839_v42 = vor.u32 %v5077_v12, %v4836_v31  ;;  %v5059_v12 = vld [vmem:[#allocation16 + $0x4c] sm:$0xf0] }
 0x687   : > { %v4755_v31 = vor.u32 %v5059_v12, %v4754_v58 }
 0x688   : > { %4709 = vmatmul.msk.bf16.gmra.mxu0 %vm1158_vm0, %v3145_v20  ;;  %4719 = vmatmul.msk.bf16.gmra.mxu2 %vm1158_vm0, %v3269_v51  ;;  %v4843_v20 = vor.u32 %v5080_v46, %v4842_v59  ;;  %v5078_v51 = vld [vmem:[#allocation16 + $0xec] sm:$0xf]  ;;  %v4756_v59 = vld [vmem:[#allocation16 + $0x50] sm:$0xf0]  ;;  %v4762_v46 = vld [vmem:[#allocation16 + $0x48] sm:$0xf] }
 0x689   : > { %3646 = vmatpush.bf16.msrb.mxu3 %v4839_v42  ;;  %v5060_v42 = vld [vmem:[#allocation16 + $0x54] sm:$0xf0] }
 0x68a   : > { %3665 = vmatpush.bf16.msrb.mxu1 %v4843_v20  ;;  %v4759_v20 = vor.u32 %v5057_v18, %v4756_v59  ;;  %v5088_v18 = vld [vmem:[#allocation17 + $0x38] sm:$0xff] }
 0x68b   : > { %v3245_v5 = vpop.f32.mrf.mxu3 }
 0x68c   : > { %v4844_v5 = vld [vmem:[#allocation16 + $0xf8] sm:$0xf0] }
 0x68d   : > { %v3266_v47 = vpop.f32.mrf.mxu1 }
 0x68e   : > { %v4847_v47 = vor.u32 %v5078_v51, %v4844_v5  ;;  %v4763_v51 = vor.u32 %v5060_v42, %v4762_v46  ;;  %v5058_v5 = vld [vmem:[#allocation16 + $0x4c] sm:$0xf]  ;;  %v5096_v46 = vld [vmem:[#allocation17 + $0x78] sm:$0xff] }
 0x68f   : > { %v5112_v42 = vld [vmem:[#allocation17 + $0xf8] sm:$0xff] }
 0x690   : > { %3684 = vmatpush.bf16.msra.mxu2 %v4847_v47  ;;  %v4764_v47 = vld [vmem:[#allocation16 + $0x58] sm:$0xf0] }
 0x6e7   : > { %v3294_v14 = vpop.f32.mrf.mxu2 }
 0x6ef   : > { %v3296_v25 = vpop.f32.mrf.mxu2 }
 0x6f5   : > { %v3170_v27 = vpop.f32.mrf.mxu0 }
 0x6f6   : > { %v3180_v39 = vadd.f32 %v3170_v27, %v3056_v57  ;;  %v5075_v27 = vld [vmem:[#allocation16 + $0xcc] sm:$0xf0] }
 0x6f8   : > { %v3304_v16 = vadd.f32 %v3294_v14, %v3180_v39  ;;  %v4818_v14 = vld [vmem:[#allocation16 + $0xc0] sm:$0xf]  ;;  %v5073_v39 = vld [vmem:[#allocation16 + $0xc4] sm:$0xf] }
 0x6fa   : > { %v3312_v38 = vadd.f32 %v5271_v63, %v3304_v16  ;;  %v4820_v16 = vld [vmem:[#allocation16 + $0xd0] sm:$0xf0] }
 0x6fc   : > { %v3316_v60 = vadd.f32 %v5424_v32, %v3312_v38  ;;  %v4826_v38 = vld [vmem:[#allocation16 + $0xc8] sm:$0xf]  ;;  %v5076_v32 = vld [vmem:[#allocation16 + $0xd4] sm:$0xf0] }
 0x6fd   : > { %v3172_v21 = vpop.f32.mrf.mxu0 }
 0x6fe   : > { %v3181_v36 = vadd.f32 %v3172_v21, %v3057_v61  ;;  %3322 = vadd.xlane.f32.xlu0 %v3316_v60  ;;  %v5407_v61 = vpop.eup %5406  ;;  %v4827_v21 = vor.u32 %v5076_v32, %v4826_v38  ;;  %v4740_v38 = vld [vmem:[#allocation16 + $0x30] sm:$0xf0]  ;;  %v4746_v32 = vld [vmem:[#allocation16 + $0x28] sm:$0xf] }
 0x6ff   : > { %v3331_v4 = vmul.f32 128.0, %v5407_v61  ;;  %vm3335_vm7 = vweird.f32 %v5407_v61 }
 0x700   : > { %v3305_v43 = vadd.f32 %v3296_v25, %v3181_v36  ;;  %v5074_v36 = vld [vmem:[#allocation16 + $0xcc] sm:$0xf]  ;;  %v4828_v25 = vld [vmem:[#allocation16 + $0xd8] sm:$0xf0]  ;;  %3666 = vmatpush.bf16.msrb.mxu1 %v4827_v21 }
 0x701   : > { %v3332_v6 = vsub.f32 1.0, %v3331_v4 }
 0x702   : > { %v3313_v40 = vadd.f32 %v5271_v63, %v3305_v43  ;;  %v4831_v43 = vor.u32 %v5074_v36, %v4828_v25 }
 0x703   : > { %v3333_v7 = vmul.f32 %v5407_v61, %v3332_v6 }
 0x704   : > { %v3317_v54 = vadd.f32 %v5425_v1, %v3313_v40  ;;  %v4802_v40 = vld [vmem:[#allocation16 + $0xa0] sm:$0xf]  ;;  %v5071_v1 = vld [vmem:[#allocation16 + $0xac] sm:$0xf0]  ;;  %3685 = vmatpush.bf16.msra.mxu2 %v4831_v43  ;;  %v5054_v43 = vld [vmem:[#allocation16 + $0x2c] sm:$0xf] }
 0x705   : > { %v3175_v56 = vpop.f32.mrf.mxu0  ;;  %v3334_v15 = vadd.f32 %v5407_v61, %v3333_v7  ;;  %v5066_v7 = vld [vmem:[#allocation16 + $0x8c] sm:$0xf] }
 0x706   : > { %3324 = vadd.xlane.f32.xlu1 %v3317_v54  ;;  %v3182_v10 = vadd.f32 %v3175_v56, %v3058_v35  ;;  %v4803_v56 = vor.u32 %v5071_v1, %v4802_v40  ;;  %v4748_v40 = vld [vmem:[#allocation16 + $0x38] sm:$0xf0] }
 0x707   : > { %v7073_v35 = vsel %vm3335_vm7, %v5407_v61, %v3334_v15  ;;  %v5068_v61 = vld [vmem:[#allocation16 + $0x94] sm:$0xf0]  ;;  %v4796_v15 = vld [vmem:[#allocation16 + $0x98] sm:$0xf0] }
 0x708   : > { %v4795_v6 = vor.u32 %v5068_v61, %v4794_v55 }
 0x70b   : > { %v3299_v44 = vpop.f32.mrf.mxu2 }
 0x70c   : > { %v3306_v19 = vadd.f32 %v3299_v44, %v3182_v10  ;;  %v4804_v10 = vld [vmem:[#allocation16 + $0xb0] sm:$0xf0]  ;;  %v4810_v44 = vld [vmem:[#allocation16 + $0xa8] sm:$0xf] }
 0x70d   : > { %v3177_v37 = vpop.f32.mrf.mxu0 }
 0x70e   : > { %v3314_v53 = vadd.f32 %v5271_v63, %v3306_v19  ;;  %v3183_v28 = vadd.f32 %v3177_v37, %v3059_v48  ;;  %v5072_v19 = vld [vmem:[#allocation16 + $0xb4] sm:$0xf0] }
 0x70f   : > { %v4811_v37 = vor.u32 %v5072_v19, %v4810_v44  ;;  %v5049_v44 = vld [vmem:[#allocation16 + $0x4] sm:$0xf] }
 0x710   : > { %v3318_v3 = vadd.f32 %v5426_v22, %v3314_v53  ;;  %v5070_v22 = vld [vmem:[#allocation16 + $0xac] sm:$0xf] }
 0x711   : > { %3667 = vmatpush.bf16.msrb.mxu1 %v4811_v37  ;;  %v4724_v37 = vld [vmem:[#allocation16 + $0x10] sm:$0xf0] }
 0x712   : > { %3326 = vadd.xlane.f32.xlu2 %v3318_v3 }
 0x713   : > { %v3301_v57 = vpop.f32.mrf.mxu2 }
 0x714   : > { %v3307_v17 = vadd.f32 %v3301_v57, %v3183_v28  ;;  %v4786_v57 = vld [vmem:[#allocation16 + $0x80] sm:$0xf] }
 0x715   : > { %3668 = vmatpush.bf16.msrb.mxu1 %v4795_v6 }
 0x716   : > { %v3315_v24 = vadd.f32 %v5271_v63, %v3307_v17  ;;  %v4819_v63 = vor.u32 %v5075_v27, %v4818_v14  ;;  %v5067_v17 = vld [vmem:[#allocation16 + $0x8c] sm:$0xf0]  ;;  %v4767_v14 = vor.u32 %v5058_v5, %v4764_v47  ;;  %v4738_v27 = vld [vmem:[#allocation16 + $0x20] sm:$0xf] }
 0x717   : > { %v5103_v5 = vld [vmem:[#allocation17 + $0xb0] sm:$0xff] }
 0x718   : > { %v3319_v23 = vadd.f32 %v5427_v0, %v3315_v24  ;;  %3628 = vmatpush.bf16.msrb.mxu0 %v4819_v63  ;;  %v5065_v24 = vld [vmem:[#allocation16 + $0x84] sm:$0xf]  ;;  %v4787_v0 = vor.u32 %v5067_v17, %v4786_v57  ;;  %v5050_v57 = vld [vmem:[#allocation16 + $0xc] sm:$0xf]  ;;  %v4732_v17 = vld [vmem:[#allocation16 + $0x18] sm:$0xf0] }
 0x719   : > { %v5053_v63 = vld [vmem:[#allocation16 + $0x24] sm:$0xf] }
 0x71a   : > { %3328 = vadd.xlane.f32.xlu1 %v3319_v23  ;;  %v4743_v36 = vor.u32 %v5053_v63, %v4740_v38  ;;  %v5095_v63 = vld [vmem:[#allocation17 + $0x70] sm:$0xff] }
 0x71c   : > { %3629 = vmatpush.bf16.msrb.mxu0 %v4803_v56  ;;  %v4722_v56 = vld [vmem:[#allocation16] sm:$0xf] }
 0x720   : > { %3630 = vmatpush.bf16.msrb.mxu0 %v4787_v0  ;;  %v4735_v0 = vor.u32 %v5050_v57, %v4732_v17 }
 0x771   : > { %v3323_v13 = vpop.xlane.xlu0 %3322 }
 0x772   : > { %v3337_v8 = vmul.f32 %v7073_v35, %v3323_v13  ;;  %v4799_v13 = vor.u32 %v5066_v7, %v4796_v15 }
 0x774   : > { %v7076_v50 = vsub.f32 %v3316_v60, %v3337_v8  ;;  %v4823_v60 = vor.u32 %v5073_v39, %v4820_v16  ;;  %v4770_v8 = vld [vmem:[#allocation16 + $0x60] sm:$0xf]  ;;  %v5055_v39 = vld [vmem:[#allocation16 + $0x2c] sm:$0xf0] }
 0x775   : > { %v4739_v16 = vor.u32 %v5055_v39, %v4738_v27 }
 0x776   : > { %v3345_v45 = vmul.f32 %v7076_v50, %v7076_v50  ;;  %3647 = vmatpush.bf16.msrb.mxu3 %v4823_v60  ;;  %v5056_v60 = vld [vmem:[#allocation16 + $0x34] sm:$0xf0] }
 0x777   : > { %v4747_v25 = vor.u32 %v5056_v60, %v4746_v32 }
 0x778   : > { %3349 = vadd.xlane.f32.xlu2 %v3345_v45  ;;  %v5063_v45 = vld [vmem:[#allocation16 + $0x6c] sm:$0xf0] }
 0x779   : > { %v3325_v26 = vpop.xlane.xlu1 %3324 }
 0x77a   : > { %v3338_v49 = vmul.f32 %v7073_v35, %v3325_v26  ;;  %v5061_v26 = vld [vmem:[#allocation16 + $0x64] sm:$0xf] }
 0x77c   : > { %v7081_v48 = vsub.f32 %v3317_v54, %v3338_v49  ;;  %v5069_v54 = vld [vmem:[#allocation16 + $0xa4] sm:$0xf]  ;;  %v4771_v49 = vor.u32 %v5063_v45, %v4770_v8 }
 0x77d   : > { %v4807_v53 = vor.u32 %v5069_v54, %v4804_v10  ;;  %v4751_v54 = vor.u32 %v5054_v43, %v4748_v40  ;;  %v5051_v10 = vld [vmem:[#allocation16 + $0xc] sm:$0xf0] }
 0x77e   : > { %v3346_v11 = vmul.f32 %v7081_v48, %v7081_v48  ;;  %3631 = vmatpush.bf16.msrb.mxu0 %v4771_v49 }
 0x77f   : > { %3648 = vmatpush.bf16.msrb.mxu3 %v4807_v53  ;;  %v4723_v53 = vor.u32 %v5051_v10, %v4722_v56  ;;  %v5085_v10 = vld [vmem:[#allocation17 + $0x20] sm:$0xff] }
 0x780   : > { %3351 = vadd.xlane.f32.xlu1 %v3346_v11  ;;  %v4772_v11 = vld [vmem:[#allocation16 + $0x70] sm:$0xf0] }
 0x782   : > { %3632 = vmatpush.bf16.msrb.mxu0 %v4755_v31  ;;  %v5104_v31 = vld [vmem:[#allocation17 + $0xb8] sm:$0xff] }
 0x785   : > { %v3327_v62 = vpop.xlane.xlu2 %3326 }
 0x786   : > { %v3339_v33 = vmul.f32 %v7073_v35, %v3327_v62  ;;  %v4778_v62 = vld [vmem:[#allocation16 + $0x68] sm:$0xf]  ;;  %3633 = vmatpush.bf16.msrb.mxu0 %v4739_v16  ;;  %v5111_v16 = vld [vmem:[#allocation17 + $0xf0] sm:$0xff] }
 0x788   : > { %v7086_v30 = vsub.f32 %v3318_v3, %v3339_v33  ;;  %v4812_v3 = vld [vmem:[#allocation16 + $0xb8] sm:$0xf0]  ;;  %v5064_v33 = vld [vmem:[#allocation16 + $0x74] sm:$0xf0] }
 0x789   : > { %v4815_v28 = vor.u32 %v5070_v22, %v4812_v3  ;;  %v4730_v22 = vld [vmem:[#allocation16 + $0x8] sm:$0xf]  ;;  %v4727_v3 = vor.u32 %v5049_v44, %v4724_v37  ;;  %v5101_v44 = vld [vmem:[#allocation17 + $0xa0] sm:$0xff] }
 0x78a   : > { %v3347_v9 = vmul.f32 %v7086_v30, %v7086_v30  ;;  %3634 = vmatpush.bf16.msrb.mxu0 %v4723_v53 }
 0x78b   : > { %3686 = vmatpush.bf16.msra.mxu2 %v4815_v28  ;;  %v5052_v28 = vld [vmem:[#allocation16 + $0x14] sm:$0xf0] }
 0x78c   : > { %3353 = vadd.xlane.f32.xlu2 %v3347_v9  ;;  %v4775_v9 = vor.u32 %v5061_v26, %v4772_v11 }
 0x78d   : > { %v3329_v41 = vpop.xlane.xlu1 %3328 }
 0x78e   : > { %v3340_v34 = vmul.f32 %v7073_v35, %v3329_v41  ;;  %v4779_v41 = vor.u32 %v5064_v33, %v4778_v62  ;;  %3987 = vmatpush.bf16.msra.mxu0 %v5088_v18  ;;  %v3457_v18 = vld [vmem:[%s7307_s12] sm:$0xf]  ;;  %s7313_s12 = sld [smem:[#allocation49_spill]] }
 0x78f   : > { %3687 = vmatpush.bf16.msra.mxu2 %v4799_v13 }
 0x790   : > { %v7091_v2 = vsub.f32 %v3319_v23, %v3340_v34  ;;  %v4788_v23 = vld [vmem:[#allocation16 + $0x90] sm:$0xf0]  ;;  %v5062_v34 = vld [vmem:[#allocation16 + $0x6c] sm:$0xf]  ;;  %3669 = vmatpush.bf16.msrb.mxu1 %v4779_v41 }
 0x791   : > { %v4791_v4 = vor.u32 %v5065_v24, %v4788_v23  ;;  %v4731_v24 = vor.u32 %v5052_v28, %v4730_v22 }
 0x792   : > { %v3348_v29 = vmul.f32 %v7091_v2, %v7091_v2 }
 0x793   : > { %3649 = vmatpush.bf16.msrb.mxu3 %v4791_v4 }
 0x794   : > { %3355 = vadd.xlane.f32.xlu1 %v3348_v29  ;;  %v4780_v29 = vld [vmem:[#allocation16 + $0x78] sm:$0xf0]  ;;  %3670 = vmatpush.bf16.msrb.mxu1 %v4763_v51  ;;  %v5087_v51 = vld [vmem:[#allocation17 + $0x30] sm:$0xff]  ;;  %s4268_s16 = scalar_lea.hbm %s7313_s12, %s5121_s28  ;;  %s5778_s3 = scalar_lea.hbm %s7313_s12, 64 }
 0x795   : > { %v4783_v52 = vor.u32 %v5062_v34, %v4780_v29  ;;  %v7104_v29 = vld [vmem:[%s7222_s9] ss:$0 sm:$0xff]  ;;  %3988 = vmatpush.bf16.msra.mxu0 %v5087_v51 }
 0x797   : > { %3650 = vmatpush.bf16.msrb.mxu3 %v4775_v9  ;;  %3688 = vmatpush.bf16.msra.mxu2 %v4783_v52 }
 0x798   : > { %3671 = vmatpush.bf16.msrb.mxu1 %v4747_v25 }
 0x79b   : > { %3651 = vmatpush.bf16.msrb.mxu3 %v4759_v20  ;;  %3689 = vmatpush.bf16.msra.mxu2 %v4767_v14 }
 0x79c   : > { %3672 = vmatpush.bf16.msrb.mxu1 %v4731_v24 }
 0x79f   : > { %3652 = vmatpush.bf16.msrb.mxu3 %v4743_v36  ;;  %3690 = vmatpush.bf16.msra.mxu2 %v4751_v54  ;;  %v5102_v36 = vld [vmem:[#allocation17 + $0xa8] sm:$0xff] }
 0x7a0   : > { %4025 = vmatpush.bf16.msra.mxu1 %v5104_v31  ;;  %v5110_v54 = vld [vmem:[#allocation17 + $0xe8] sm:$0xff] }
 0x7a3   : > { %3653 = vmatpush.bf16.msrb.mxu3 %v4727_v3  ;;  %3691 = vmatpush.bf16.msra.mxu2 %v4735_v0 }
 0x7a4   : > { %4026 = vmatpush.bf16.msra.mxu1 %v5103_v5 }
 0x7a7   : > { %4006 = vmatpush.bf16.msra.mxu3 %v5096_v46  ;;  %4044 = vmatpush.bf16.msrb.mxu2 %v5112_v42  ;;  %v3459_v46 = vperm.slane %v3457_v18, 0  ;;  %v3461_v42 = vperm.slane %v3457_v18, 2 }
 0x7a8   : > { %4027 = vmatpush.bf16.msra.mxu1 %v5102_v36 }
 0x7ab   : > { %4007 = vmatpush.bf16.msra.mxu3 %v5095_v63  ;;  %4045 = vmatpush.bf16.msrb.mxu2 %v5111_v16  ;;  %v3462_v63 = vperm.slane %v3457_v18, 3 }
 0x7ac   : > { %4028 = vmatpush.bf16.msra.mxu1 %v5101_v44 }
 0x7af   : > { %4046 = vmatpush.bf16.msrb.mxu2 %v5110_v54 }
 0x7eb   : > { %v3350_v21 = vpop.xlane.xlu2 %3349 }
 0x7ec   : > { %v3357_v1 = vmul.f32 %v3350_v21, %v7073_v35  ;;  %v5086_v21 = vld [vmem:[#allocation17 + $0x28] sm:$0xff] }
 0x7ed   : > { %3989 = vmatpush.bf16.msra.mxu0 %v5086_v21 }
 0x7ee   : > { %v3361_v19 = vadd.f32 1e-05, %v3357_v1  ;;  %v5094_v1 = vld [vmem:[#allocation17 + $0x68] sm:$0xff] }
 0x7ef   : > { %4008 = vmatpush.bf16.msra.mxu3 %v5094_v1 }
 0x7f0   : > { %5408 = vrsqrt.f32 %v3361_v19  ;;  %vm3371_vm9 = vweird.f32 %v3361_v19 }
 0x7f1   : > { %3990 = vmatpush.bf16.msra.mxu0 %v5085_v10 }
 0x7f3   : > { %v3352_v23 = vpop.xlane.xlu1 %3351 }
 0x7f4   : > { %v3358_v55 = vmul.f32 %v3352_v23, %v7073_v35 }
 0x7f6   : > { %v5409_v61 = vpop.eup %5408  ;;  %v3362_v4 = vadd.f32 1e-05, %v3358_v55 }
 0x7f7   : > { %v3366_v6 = vmul.f32 %v5409_v61, %v3361_v19  ;;  %vm3372_vm8 = vweird.f32 %v5409_v61 }
 0x7f8   : > { %5410 = vrsqrt.f32 %v3362_v4  ;;  %vm3373_vm10 = vmor %vm3371_vm9, %vm3372_vm8  ;;  %vm3381_vm12 = vweird.f32 %v3362_v4 }
 0x7f9   : > { %v3367_v7 = vmul.f32 %v5409_v61, %v3366_v6 }
 0x7fb   : > { %v3368_v15 = vmul.f32 0.5, %v3367_v7 }
 0x7fd   : > { %v3369_v13 = vsub.f32 1.5, %v3368_v15  ;;  %v5100_v15 = vld [vmem:[#allocation17 + $0x98] sm:$0xff] }
 0x7fe   : > { %v5411_v8 = vpop.eup %5410  ;;  %4029 = vmatpush.bf16.msra.mxu1 %v5100_v15 }
 0x7ff   : > { %v3370_v45 = vmul.f32 %v5409_v61, %v3369_v13  ;;  %v3376_v26 = vmul.f32 %v5411_v8, %v3362_v4  ;;  %v3354_v49 = vpop.xlane.xlu2 %3353  ;;  %vm3382_vm11 = vweird.f32 %v5411_v8  ;;  %v5109_v13 = vld [vmem:[#allocation17 + $0xe0] sm:$0xff] }
 0x800   : > { %v3359_v11 = vmul.f32 %v3354_v49, %v7073_v35  ;;  %vm3383_vm13 = vmor %vm3381_vm12, %vm3382_vm11  ;;  %4047 = vmatpush.bf16.msrb.mxu2 %v5109_v13  ;;  %v5108_v49 = vld [vmem:[#allocation17 + $0xd8] sm:$0xff] }
 0x801   : > { %v3377_v62 = vmul.f32 %v5411_v8, %v3376_v26  ;;  %v3374_v9 = vsel %vm3373_vm10, %v5409_v61, %v3370_v45  ;;  %v5099_v45 = vld [vmem:[#allocation17 + $0x90] sm:$0xff]  ;;  %v5092_v26 = vld [vmem:[#allocation17 + $0x58] sm:$0xff] }
 0x802   : > { %v7098_v33 = vadd.f32 1e-05, %v3359_v11  ;;  %v3405_v52 = vmul.f32 %v3374_v9, %v7076_v50  ;;  %v5273_v50 = vld [vmem:[%s7223_s10] ss:$0 sm:$0xff]  ;;  %4030 = vmatpush.bf16.msra.mxu1 %v5099_v45  ;;  %v5082_v11 = vld [vmem:[#allocation17 + $0x8] sm:$0xff]  ;;  %v5107_v9 = vld [vmem:[#allocation17 + $0xd0] sm:$0xff] }
 0x803   : > { %v3378_v41 = vmul.f32 0.5, %v3377_v62  ;;  %v5098_v62 = vld [vmem:[#allocation17 + $0x88] sm:$0xff] }
 0x804   : > { %5412 = vrsqrt.f32 %v7098_v33  ;;  %v3412_v14 = vmul.f32 %v7104_v29, %v3405_v52  ;;  %vm3391_vm15 = vweird.f32 %v7098_v33  ;;  %4048 = vmatpush.bf16.msrb.mxu2 %v5108_v49  ;;  %v5106_v52 = vld [vmem:[#allocation17 + $0xc8] sm:$0xff] }
 0x805   : > { %v3379_v34 = vsub.f32 1.5, %v3378_v41  ;;  %v5081_v41 = vld [vmem:[#allocation17] sm:$0xff] }
 0x806   : > { %v7115_v25 = vadd.f32 %v5273_v50, %v3412_v14  ;;  %4031 = vmatpush.bf16.msra.mxu1 %v5098_v62  ;;  %v3460_v14 = vperm.slane %v3457_v18, 1 }
 0x807   : > { %v3380_v58 = vmul.f32 %v5411_v8, %v3379_v34  ;;  %v3356_v12 = vpop.xlane.xlu1 %3355  ;;  %v5097_v34 = vld [vmem:[#allocation17 + $0x80] sm:$0xff] }
 0x808   : > { %v3360_v59 = vmul.f32 %v3356_v12, %v7073_v35  ;;  %4049 = vmatpush.bf16.msrb.mxu2 %v5107_v9  ;;  %v5105_v12 = vld [vmem:[#allocation17 + $0xc0] sm:$0xff] }
 0x809   : > { %v3384_v20 = vsel %vm3383_vm13, %v5411_v8, %v3380_v58  ;;  %v5083_v8 = vld [vmem:[#allocation17 + $0x10] sm:$0xff]  ;;  %v5089_v58 = vld [vmem:[#allocation17 + $0x40] sm:$0xff] }
 0x80a   : > { %v5413_v47 = vpop.eup %5412  ;;  %v3406_v27 = vmul.f32 %v3384_v20, %v7081_v48  ;;  %v3364_v39 = vadd.f32 1e-05, %v3360_v59  ;;  %4032 = vmatpush.bf16.msra.mxu1 %v5097_v34 }
 0x80b   : > { %v3386_v38 = vmul.f32 %v5413_v47, %v7098_v33  ;;  %vm3392_vm14 = vweird.f32 %v5413_v47  ;;  %v5091_v33 = vld [vmem:[#allocation17 + $0x50] sm:$0xff] }
 0x80c   : > { %v3413_v32 = vmul.f32 %v7104_v29, %v3406_v27  ;;  %5414 = vrsqrt.f32 %v3364_v39  ;;  %vm3393_vm0 = vmor %vm3391_vm15, %vm3392_vm14  ;;  %vm3401_vm2 = vweird.f32 %v3364_v39  ;;  %4050 = vmatpush.bf16.msrb.mxu2 %v5106_v52 }
 0x80d   : > { %v3387_v60 = vmul.f32 %v5413_v47, %v3386_v38 }
 0x80e   : > { %v7117_v43 = vadd.f32 %v5273_v50, %v3413_v32 }
 0x80f   : > { %v3388_v48 = vmul.f32 0.5, %v3387_v60 }
 0x810   : > { %v3423_v40 = vpack.c.bf16 %v7117_v43, %v7115_v25  ;;  %4051 = vmatpush.bf16.msrb.mxu2 %v5105_v12 }
 0x811   : > { %v3389_v56 = vsub.f32 1.5, %v3388_v48 }
 0x812   : > { %v5415_v19 = vpop.eup %5414  ;;  %3635 = vmatmul.bf16.vlgmr.msrb.gmra.mxu0 %v3423_v40  ;;  %3654 = vmatmul.bf16.vlgmr.msrb.gmra.mxu3 %v3423_v40 }
 0x813   : > { %v3390_v53 = vmul.f32 %v5413_v47, %v3389_v56  ;;  %v3396_v37 = vmul.f32 %v5415_v19, %v3364_v39  ;;  %3673 = vmatmul.bf16.vlgmr.msrb.gmra.mxu1 %v3423_v40  ;;  %3692 = vmatmul.bf16.vlgmr.msra.gmra.mxu2 %v3423_v40  ;;  %vm3402_vm1 = vweird.f32 %v5415_v19 }
 0x814   : > { %vm3403_vm3 = vmor %vm3401_vm2, %vm3402_vm1 }
 0x815   : > { %v3397_v22 = vmul.f32 %v5415_v19, %v3396_v37  ;;  %v3394_v3 = vsel %vm3393_vm0, %v5413_v47, %v3390_v53 }
 0x816   : > { %v3407_v17 = vmul.f32 %v3394_v3, %v7086_v30  ;;  %v5084_v30 = vld [vmem:[#allocation17 + $0x18] sm:$0xff] }
 0x817   : > { %v3398_v28 = vmul.f32 0.5, %v3397_v22  ;;  %3991 = vmatpush.bf16.msra.mxu0 %v5084_v30 }
 0x818   : > { %v3414_v55 = vmul.f32 %v7104_v29, %v3407_v17 }
 0x819   : > { %v3399_v57 = vsub.f32 1.5, %v3398_v28 }
 0x81a   : > { %v7126_v4 = vadd.f32 %v5273_v50, %v3414_v55 }
 0x81b   : > { %v3400_v24 = vmul.f32 %v5415_v19, %v3399_v57  ;;  %3992 = vmatpush.bf16.msra.mxu0 %v5083_v8 }
 0x81d   : > { %v3404_v0 = vsel %vm3403_vm3, %v5415_v19, %v3400_v24 }
 0x81e   : > { %v3408_v23 = vmul.f32 %v3404_v0, %v7091_v2  ;;  %v5093_v2 = vld [vmem:[#allocation17 + $0x60] sm:$0xff] }
 0x81f   : > { %4009 = vmatpush.bf16.msra.mxu3 %v5093_v2  ;;  %3993 = vmatpush.bf16.msra.mxu0 %v5082_v11 }
 0x820   : > { %v3415_v61 = vmul.f32 %v7104_v29, %v3408_v23  ;;  %v5090_v29 = vld [vmem:[#allocation17 + $0x48] sm:$0xff] }
 0x822   : > { %v7128_v6 = vadd.f32 %v5273_v50, %v3415_v61 }
 0x823   : > { %4010 = vmatpush.bf16.msra.mxu3 %v5092_v26  ;;  %3994 = vmatpush.bf16.msra.mxu0 %v5081_v41 }
 0x824   : > { %v3424_v7 = vpack.c.bf16 %v7128_v6, %v7126_v4 }
 0x826   : > { %3640 = vmatmul.bf16.gmra.mxu0 %v3424_v7  ;;  %3659 = vmatmul.bf16.gmra.mxu3 %v3424_v7 }
 0x827   : > { %3678 = vmatmul.bf16.gmra.mxu1 %v3424_v7  ;;  %3697 = vmatmul.bf16.gmra.mxu2 %v3424_v7 }
 0x828   : > { %4011 = vmatpush.bf16.msra.mxu3 %v5091_v33 }
 0x82c   : > { %4012 = vmatpush.bf16.msra.mxu3 %v5090_v29 }
 0x830   : > { %4013 = vmatpush.bf16.msra.mxu3 %v5089_v58 }
 0x88f   : > { %v3636_v31 = vpop.f32.mrf.mxu0 }
 0x890   : > { %v3674_v59 = vpop.f32.mrf.mxu1  ;;  %v3637_v51 = vadd.f32 %v3636_v31, %v3459_v46 }
 0x891   : > { %v3675_v47 = vadd.f32 %v3674_v59, %v3461_v42 }
 0x892   : > { %v3703_v38 = vmax.f32 %v3637_v51, 0.0 }
 0x893   : > { %v3705_v60 = vmax.f32 %v3675_v47, 0.0 }
 0x895   : > { %v3655_v20 = vpop.f32.mrf.mxu3 }
 0x896   : > { %v3693_v5 = vpop.f32.mrf.mxu2  ;;  %v3656_v36 = vadd.f32 %v3655_v20, %v3460_v14 }
 0x897   : > { %v3638_v50 = vpop.f32.mrf.mxu0  ;;  %v3694_v40 = vadd.f32 %v3693_v5, %v3462_v63 }
 0x898   : > { %v3639_v27 = vadd.f32 %v3638_v50, %v3459_v46  ;;  %v3676_v39 = vpop.f32.mrf.mxu1  ;;  %v3704_v19 = vmax.f32 %v3656_v36, 0.0 }
 0x899   : > { %v3677_v16 = vadd.f32 %v3676_v39, %v3461_v42  ;;  %v3706_v37 = vmax.f32 %v3694_v40, 0.0 }
 0x89a   : > { %v3707_v32 = vmax.f32 %v3639_v27, 0.0 }
 0x89b   : > { %v3709_v21 = vmax.f32 %v3677_v16, 0.0 }
 0x89c   : > { %v3719_v48 = vpack.c.bf16 %v3707_v32, %v3703_v38 }
 0x89d   : > { %v3721_v1 = vpack.c.bf16 %v3709_v21, %v3705_v60  ;;  %v3657_v54 = vpop.f32.mrf.mxu3 }
 0x89e   : > { %v3658_v56 = vadd.f32 %v3657_v54, %v3460_v14  ;;  %v3695_v10 = vpop.f32.mrf.mxu2  ;;  %3995 = vmatmul.bf16.vlgmr.msra.gmra.mxu0 %v3719_v48 }
 0x89f   : > { %v3696_v44 = vadd.f32 %v3695_v10, %v3462_v63  ;;  %4033 = vmatmul.bf16.vlgmr.msra.gmra.mxu1 %v3721_v1 }
 0x8a0   : > { %v3708_v53 = vmax.f32 %v3658_v56, 0.0 }
 0x8a1   : > { %v3710_v22 = vmax.f32 %v3696_v44, 0.0 }
 0x8a2   : > { %v3720_v3 = vpack.c.bf16 %v3708_v53, %v3704_v19 }
 0x8a3   : > { %v3722_v28 = vpack.c.bf16 %v3710_v22, %v3706_v37  ;;  %v3641_v57 = vpop.f32.mrf.mxu0 }
 0x8a4   : > { %v3679_v17 = vpop.f32.mrf.mxu1  ;;  %4014 = vmatmul.bf16.vlgmr.msra.gmra.mxu3 %v3720_v3  ;;  %v3642_v0 = vadd.f32 %v3641_v57, %v3459_v46 }
 0x8a5   : > { %4052 = vmatmul.bf16.vlgmr.msrb.gmra.mxu2 %v3722_v28  ;;  %v3680_v55 = vadd.f32 %v3679_v17, %v3461_v42 }
 0x8a6   : > { %v3711_v2 = vmax.f32 %v3642_v0, 0.0 }
 0x8a7   : > { %v3713_v8 = vmax.f32 %v3680_v55, 0.0 }
 0x8a9   : > { %v3660_v24 = vpop.f32.mrf.mxu3 }
 0x8aa   : > { %v3698_v23 = vpop.f32.mrf.mxu2  ;;  %v3661_v26 = vadd.f32 %v3660_v24, %v3460_v14 }
 0x8ab   : > { %v3643_v61 = vpop.f32.mrf.mxu0  ;;  %v3699_v11 = vadd.f32 %v3698_v23, %v3462_v63 }
 0x8ac   : > { %v3644_v7 = vadd.f32 %v3643_v61, %v3459_v46  ;;  %v3681_v30 = vpop.f32.mrf.mxu1  ;;  %v3712_v29 = vmax.f32 %v3661_v26, 0.0  ;;  %v5274_v46 = vld [vmem:[%s7308_s2] ss:$0 sm:$0xff]  ;;  %s4271_s2 = sshll.u32 %s4268_s16, 4  ;;  %s4272_s2 = int_to_ptr.hbm [resolvable:$true] %s4271_s2 }
 0x8ad   : > { %v3682_v15 = vadd.f32 %v3681_v30, %v3461_v42  ;;  %v3714_v58 = vmax.f32 %v3699_v11, 0.0  ;;  %s5772_s0 = sshra.s32 %s4272_s2, 4  ;;  %s5773_s0 = int_to_ptr.hbm [resolvable:$true] %s5772_s0 }
 0x8ae   : > { %v3715_v13 = vmax.f32 %v3644_v7, 0.0  ;;  %s5774_s6 = scalar_lea.hbm %s5773_s0, 32  ;;  %p5779_p11 = scmp.lt.s32.totalorder %s5773_s0, %s7313_s12 }
 0x8af   : > { %v3717_v45 = vmax.f32 %v3682_v15, 0.0  ;;  %p5775_p8 = scmp.ne.s32.totalorder %s5773_s0, %s5774_s6  ;;  %p5780_p3 = scmp.lt.s32.totalorder %s5778_s3, %s5774_s6 }
 0x8b0   : > { %v3723_v49 = vpack.c.bf16 %v3715_v13, %v3711_v2 }
 0x8b1   : > { %v3725_v62 = vpack.c.bf16 %v3717_v45, %v3713_v8  ;;  %v3662_v33 = vpop.f32.mrf.mxu3  ;;  %p5776_p10 = pnand %p5775_p8, %p6069_p4  ;;  %p5781_p7 = por %p5780_p3, %p5779_p11 }
 0x8b2   : > { %v3663_v9 = vadd.f32 %v3662_v33, %v3460_v14  ;;  %v3700_v41 = vpop.f32.mrf.mxu2  ;;  %4000 = vmatmul.bf16.gmra.mxu0 %v3723_v49  ;;  %v5120_v33 = vld [vmem:[#allocation19 + $0x38] sm:$0xff] }
 0x8b3   : > { %v3701_v34 = vadd.f32 %v3700_v41, %v3462_v63  ;;  %4038 = vmatmul.bf16.gmra.mxu1 %v3725_v62  ;;  %4233 = vmatpush.bf16.msrb.mxu0 %v5120_v33  ;;  %v5118_v41 = vld [vmem:[#allocation19 + $0x28] sm:$0xff]  ;;  %p5777_p6 = pneg %p5776_p10 }
 0x8b4   : > { %v3716_v52 = vmax.f32 %v3663_v9, 0.0  ;;  %v5119_v9 = vld [vmem:[#allocation19 + $0x30] sm:$0xff] }
 0x8b5   : > { %v3718_v12 = vmax.f32 %v3701_v34, 0.0  ;;  %v5117_v34 = vld [vmem:[#allocation19 + $0x20] sm:$0xff]  ;;  %p5782_p9 = pnand %p5781_p7, %p5777_p6 }
 0x8b6   : > { %v3724_v18 = vpack.c.bf16 %v3716_v52, %v3712_v29  ;;  %v5116_v29 = vld [vmem:[#allocation19 + $0x18] sm:$0xff]  ;;  %v5115_v52 = vld [vmem:[#allocation19 + $0x10] sm:$0xff] }
 0x8b7   : > { %v3726_v31 = vpack.c.bf16 %v3718_v12, %v3714_v58  ;;  %4234 = vmatpush.bf16.msrb.mxu0 %v5119_v9  ;;  %v5114_v58 = vld [vmem:[#allocation19 + $0x8] sm:$0xff] }
 0x8b8   : > { %4019 = vmatmul.bf16.gmra.mxu3 %v3724_v18 }
 0x8b9   : > { %4057 = vmatmul.bf16.gmra.mxu2 %v3726_v31 }
 0x8bb   : > { %4235 = vmatpush.bf16.msrb.mxu0 %v5118_v41  ;;  %v5277_v41 = vld [vmem:[%s7311_s27] ss:$0 sm:$0xff] }
 0x8bf   : > { %4236 = vmatpush.bf16.msrb.mxu0 %v5117_v34 }
 0x8c3   : > { %4237 = vmatpush.bf16.msrb.mxu0 %v5116_v29 }
 0x8c7   : > { %4238 = vmatpush.bf16.msrb.mxu0 %v5115_v52 }
 0x8cb   : > { %4239 = vmatpush.bf16.msrb.mxu0 %v5114_v58 }
 0x91b   : > { %v3996_v59 = vpop.f32.mrf.mxu0 }
 0x91c   : > { %v3997_v42 = vadd.f32 %v5274_v46, %v3996_v59  ;;  %v4034_v20 = vpop.f32.mrf.mxu1  ;;  %v5113_v59 = vld [vmem:[#allocation19] sm:$0xff] }
 0x91d   : > { %4240 = vmatpush.bf16.msrb.mxu0 %v5113_v59 }
 0x923   : > { %v3998_v14 = vpop.f32.mrf.mxu0 }
 0x924   : > { %v3999_v39 = vadd.f32 %v5274_v46, %v3998_v14  ;;  %v4036_v32 = vpop.f32.mrf.mxu1 }
 0x927   : > { %v4015_v51 = vpop.f32.mrf.mxu3 }
 0x928   : > { %v4016_v5 = vadd.f32 %v4015_v51, %v3997_v42  ;;  %v4053_v47 = vpop.f32.mrf.mxu2 }
 0x92a   : > { %v4035_v50 = vadd.f32 %v4034_v20, %v4016_v5 }
 0x92c   : > { %v4054_v27 = vadd.f32 %v4053_v47, %v4035_v50 }
 0x92e   : > { %v4063_v63 = vadd.f32 %v4054_v27, %v7115_v25 }
 0x92f   : > { %v4017_v16 = vpop.f32.mrf.mxu3  ;;  %v4001_v48 = vpop.f32.mrf.mxu0 }
 0x930   : > { %v4018_v38 = vadd.f32 %v4017_v16, %v3999_v39  ;;  %4069 = vadd.xlane.f32.xlu2 %v4063_v63  ;;  %v4055_v21 = vpop.f32.mrf.mxu2  ;;  %v4002_v1 = vadd.f32 %v5274_v46, %v4001_v48  ;;  %v4039_v54 = vpop.f32.mrf.mxu1 }
 0x932   : > { %v4037_v60 = vadd.f32 %v4036_v32, %v4018_v38 }
 0x934   : > { %v4056_v36 = vadd.f32 %v4055_v21, %v4037_v60 }
 0x936   : > { %v4064_v40 = vadd.f32 %v4056_v36, %v7117_v43 }
 0x937   : > { %v4003_v53 = vpop.f32.mrf.mxu0 }
 0x938   : > { %4071 = vadd.xlane.f32.xlu1 %v4064_v40  ;;  %v4004_v25 = vadd.f32 %v5274_v46, %v4003_v53  ;;  %v4041_v57 = vpop.f32.mrf.mxu1  ;;  %v5276_v53 = vld [vmem:[%s7310_s14] ss:$0 sm:$0xff] }
 0x93b   : > { %v4020_v56 = vpop.f32.mrf.mxu3 }
 0x93c   : > { %v4021_v10 = vadd.f32 %v4020_v56, %v4002_v1  ;;  %v4058_v44 = vpop.f32.mrf.mxu2 }
 0x93e   : > { %v4040_v19 = vadd.f32 %v4039_v54, %v4021_v10 }
 0x940   : > { %v4059_v37 = vadd.f32 %v4058_v44, %v4040_v19 }
 0x942   : > { %v4065_v22 = vadd.f32 %v4059_v37, %v7126_v4 }
 0x943   : > { %v4022_v3 = vpop.f32.mrf.mxu3 }
 0x944   : > { %v4023_v28 = vadd.f32 %v4022_v3, %v4004_v25  ;;  %4073 = vadd.xlane.f32.xlu2 %v4065_v22  ;;  %v4060_v24 = vpop.f32.mrf.mxu2 }
 0x946   : > { %v4042_v17 = vadd.f32 %v4041_v57, %v4023_v28 }
 0x948   : > { %v4061_v0 = vadd.f32 %v4060_v24, %v4042_v17 }
 0x94a   : > { %v4066_v43 = vadd.f32 %v4061_v0, %v7128_v6 }
 0x94c   : > { %4075 = vadd.xlane.f32.xlu0 %v4066_v43 }
 0x9a3   : > { %v4070_v23 = vpop.xlane.xlu2 %4069 }
 0x9a4   : > { %v4077_v55 = vmul.f32 %v4070_v23, %v7073_v35 }
 0x9a6   : > { %v7143_v61 = vsub.f32 %v4063_v63, %v4077_v55 }
 0x9a8   : > { %v4085_v7 = vmul.f32 %v7143_v61, %v7143_v61 }
 0x9aa   : > { %4089 = vadd.xlane.f32.xlu1 %v4085_v7 }
 0x9ab   : > { %v4072_v4 = vpop.xlane.xlu1 %4071 }
 0x9ac   : > { %v4078_v30 = vmul.f32 %v4072_v4, %v7073_v35 }
 0x9ae   : > { %v7148_v15 = vsub.f32 %v4064_v40, %v4078_v30  ;;  %v5275_v40 = vld [vmem:[%s7309_s13] ss:$0 sm:$0xff] }
 0x9b0   : > { %v4086_v2 = vmul.f32 %v7148_v15, %v7148_v15 }
 0x9b2   : > { %4091 = vadd.xlane.f32.xlu2 %v4086_v2 }
 0x9b7   : > { %v4074_v6 = vpop.xlane.xlu2 %4073 }
 0x9b8   : > { %v4079_v13 = vmul.f32 %v4074_v6, %v7073_v35 }
 0x9ba   : > { %v7153_v8 = vsub.f32 %v4065_v22, %v4079_v13 }
 0x9bc   : > { %v4087_v45 = vmul.f32 %v7153_v8, %v7153_v8 }
 0x9be   : > { %4093 = vadd.xlane.f32.xlu0 %v4087_v45 }
 0x9bf   : > { %v4076_v26 = vpop.xlane.xlu0 %4075 }
 0x9c0   : > { %v4080_v49 = vmul.f32 %v4076_v26, %v7073_v35 }
 0x9c2   : > { %v7158_v11 = vsub.f32 %v4066_v43, %v4080_v49 }
 0x9c4   : > { %v4088_v62 = vmul.f32 %v7158_v11, %v7158_v11 }
 0x9c6   : > { %4095 = vadd.xlane.f32.xlu1 %v4088_v62 }
 0xa1d   : > { %v4090_v12 = vpop.xlane.xlu1 %4089 }
 0xa1e   : > { %v4097_v18 = vmul.f32 %v4090_v12, %v7073_v35 }
 0xa20   : > { %v4101_v31 = vadd.f32 1e-05, %v4097_v18 }
 0xa22   : > { %5416 = vrsqrt.f32 %v4101_v31  ;;  %vm4111_vm5 = vweird.f32 %v4101_v31 }
 0xa25   : > { %v4092_v46 = vpop.xlane.xlu2 %4091 }
 0xa26   : > { %v4098_v42 = vmul.f32 %v4092_v46, %v7073_v35 }
 0xa28   : > { %v5417_v20 = vpop.eup %5416  ;;  %v4102_v51 = vadd.f32 1e-05, %v4098_v42 }
 0xa29   : > { %v4106_v5 = vmul.f32 %v5417_v20, %v4101_v31  ;;  %vm4112_vm4 = vweird.f32 %v5417_v20 }
 0xa2a   : > { %5418 = vrsqrt.f32 %v4102_v51  ;;  %vm4113_vm6 = vmor %vm4111_vm5, %vm4112_vm4  ;;  %vm4121_vm8 = vweird.f32 %v4102_v51 }
 0xa2b   : > { %v4107_v47 = vmul.f32 %v5417_v20, %v4106_v5 }
 0xa2d   : > { %v4108_v50 = vmul.f32 0.5, %v4107_v47 }
 0xa2f   : > { %v4109_v14 = vsub.f32 1.5, %v4108_v50 }
 0xa30   : > { %v5419_v27 = vpop.eup %5418 }
 0xa31   : > { %v4110_v39 = vmul.f32 %v5417_v20, %v4109_v14  ;;  %v4116_v63 = vmul.f32 %v5419_v27, %v4102_v51  ;;  %v4094_v16 = vpop.xlane.xlu0 %4093  ;;  %vm4122_vm7 = vweird.f32 %v5419_v27 }
 0xa32   : > { %v4099_v38 = vmul.f32 %v4094_v16, %v7073_v35  ;;  %vm4123_vm9 = vmor %vm4121_vm8, %vm4122_vm7 }
 0xa33   : > { %v4117_v32 = vmul.f32 %v5419_v27, %v4116_v63  ;;  %v4114_v21 = vsel %vm4113_vm6, %v5417_v20, %v4110_v39 }
 0xa34   : > { %v4103_v60 = vadd.f32 1e-05, %v4099_v38  ;;  %v4145_v1 = vmul.f32 %v4114_v21, %v7143_v61 }
 0xa35   : > { %v4118_v36 = vmul.f32 0.5, %v4117_v32 }
 0xa36   : > { %5420 = vrsqrt.f32 %v4103_v60  ;;  %v4152_v37 = vmul.f32 %v5275_v40, %v4145_v1  ;;  %vm4131_vm11 = vweird.f32 %v4103_v60 }
 0xa37   : > { %v4119_v48 = vsub.f32 1.5, %v4118_v36 }
 0xa38   : > { %v4159_v17 = vadd.f32 %v5276_v53, %v4152_v37 }
 0xa39   : > { %v4120_v54 = vmul.f32 %v5419_v27, %v4119_v48  ;;  %v4096_v56 = vpop.xlane.xlu1 %4095 }
 0xa3a   : > { %v4100_v10 = vmul.f32 %v4096_v56, %v7073_v35 }
 0xa3b   : > { %v4124_v44 = vsel %vm4123_vm9, %v5419_v27, %v4120_v54 }
 0xa3c   : > { %v5421_v19 = vpop.eup %5420  ;;  %v4146_v25 = vmul.f32 %v4124_v44, %v7148_v15  ;;  %v4104_v22 = vadd.f32 1e-05, %v4100_v10 }
 0xa3d   : > { %v4126_v3 = vmul.f32 %v5421_v19, %v4103_v60  ;;  %vm4132_vm10 = vweird.f32 %v5421_v19 }
 0xa3e   : > { %v4153_v28 = vmul.f32 %v5275_v40, %v4146_v25  ;;  %5422 = vrsqrt.f32 %v4104_v22  ;;  %vm4133_vm12 = vmor %vm4131_vm11, %vm4132_vm10  ;;  %vm4141_vm14 = vweird.f32 %v4104_v22 }
 0xa3f   : > { %v4127_v57 = vmul.f32 %v5421_v19, %v4126_v3 }
 0xa40   : > { %v4160_v24 = vadd.f32 %v5276_v53, %v4153_v28 }
 0xa41   : > { %v4128_v0 = vmul.f32 0.5, %v4127_v57 }
 0xa42   : > { %v4163_v43 = vpack.c.bf16 %v4160_v24, %v4159_v17 }
 0xa43   : > { %v4129_v23 = vsub.f32 1.5, %v4128_v0 }
 0xa44   : > { %v5423_v35 = vpop.eup %5422  ;;  %4241 = vmatmul.bf16.vlgmr.msrb.gmra.mxu0 %v4163_v43 }
 0xa45   : > { %v4130_v55 = vmul.f32 %v5421_v19, %v4129_v23  ;;  %v4136_v61 = vmul.f32 %v5423_v35, %v4104_v22  ;;  %vm4142_vm13 = vweird.f32 %v5423_v35 }
 0xa46   : > { %vm4143_vm15 = vmor %vm4141_vm14, %vm4142_vm13 }
 0xa47   : > { %v4137_v7 = vmul.f32 %v5423_v35, %v4136_v61  ;;  %v4134_v4 = vsel %vm4133_vm12, %v5421_v19, %v4130_v55 }
 0xa48   : > { %v4147_v2 = vmul.f32 %v4134_v4, %v7153_v8 }
 0xa49   : > { %v4138_v30 = vmul.f32 0.5, %v4137_v7 }
 0xa4a   : > { %v4154_v26 = vmul.f32 %v5275_v40, %v4147_v2 }
 0xa4b   : > { %v4139_v15 = vsub.f32 1.5, %v4138_v30 }
 0xa4c   : > { %v4161_v62 = vadd.f32 %v5276_v53, %v4154_v26 }
 0xa4d   : > { %v4140_v6 = vmul.f32 %v5423_v35, %v4139_v15 }
 0xa4f   : > { %v4144_v13 = vsel %vm4143_vm15, %v5423_v35, %v4140_v6 }
 0xa50   : > { %v4148_v45 = vmul.f32 %v4144_v13, %v7158_v11 }
 0xa52   : > { %v4155_v49 = vmul.f32 %v5275_v40, %v4148_v45 }
 0xa54   : > { %v4162_v33 = vadd.f32 %v5276_v53, %v4155_v49 }
 0xa56   : > { %v4164_v9 = vpack.c.bf16 %v4162_v33, %v4161_v62 }
 0xa58   : > { %4246 = vmatmul.bf16.gmra.mxu0 %v4164_v9 }
 0xac1   : > { %v4242_v34 = vpop.f32.mrf.mxu0 }
 0xac2   : > { %v4243_v29 = vadd.f32 %v5277_v41, %v4242_v34 }
 0xac4   : > { %4252 = vst [vmem:[%s860_s11] sm:$0xff] %v4243_v29 }
 0xac9   : > { %v4244_v8 = vpop.f32.mrf.mxu0 }
 0xaca   : > { %v4245_v52 = vadd.f32 %v5277_v41, %v4244_v8 }
 0xacc   : > { %4253 = vst [vmem:[%s860_s11 + $0x8] sm:$0xff] %v4245_v52 }
 0xad5   : > { %v4247_v11 = vpop.f32.mrf.mxu0 }
 0xad6   : > { %v4248_v58 = vadd.f32 %v5277_v41, %v4247_v11 }
 0xad8   : > { %4254 = vst [vmem:[%s860_s11 + $0x10] sm:$0xff] %v4248_v58 }
 0xadd   : > { %v4249_v12 = vpop.f32.mrf.mxu0 }
 0xade   : > { %v4250_v18 = vadd.f32 %v5277_v41, %v4249_v12 }
 0xae0   : > { %4255 = vst [vmem:[%s860_s11 + $0x18] sm:$0xff] %v4250_v18 }
 0xae1   : > { %5785 = shalt.err (!%p5782_p9)
}
 0xae2   : > { %s5872_s19 = smov 128   ;;  %s5873_s15 = smov 8  }
 0xae3   : > { %5158 = dma.vmem_to_hbm [thread:$0]  (%p6069_p4), %s4270_s29, 512, %s4272_s2, %s4257_s5, %s5872_s19, %s5872_s19, %s5873_s15  }
 0xae4 PF: > { %s7314_s22 = sld [smem:[#allocation29_spill]]  ;;  %p7316_p13 = scmp.ge.s32.totalorder %s5848_s21, 2 }
 0xae6   : > { %p5196_p0 = pnand %p7316_p13, %p6073_p5 }
 0xae8   : > { %p5197_p2 = pneg %p5196_p0 }
 0xaea   : > { %s4286_s11 = sand.u32 1, %s7314_s22  }
 0xaeb   : > { %s4287_s28 = scalar_lea.sflag [#allocation4], %s4286_s11 }
 0xaec   : > { %5831 = dma.done.wait (%p5197_p2), %s4287_s28, 512  }
 0xaed   : > { %5833 = vsyncadd (%p5197_p2), %s4287_s28, 4294966784  ;;  %s7317_s21 = sld [smem:[#allocation30_spill]]  ;;  %s7319_s0 = smov %s5840_s30 }
 0xaee   : > { %s7318_s24 = sld [smem:[#allocation31_spill]]  ;;  %s7320_s30 = smov %s5844_s20 }
 0xaf3   : > { %p41_p12 = scmp.ge.s32.totalorder %s7317_s21, 4  }
 0xaf4   : > { %s7321_s20 = smov %s7318_s24 }
 0xaf5   :  { %43 = sbr.rel (!%p41_p12) target bundleno = 29 (0x1d), region = 213 }
 0xafa   :  { %4293 = vsyncpa [#allocation3], 1 }
 0xafb   :  { %4295 = vsyncpa [#allocation3 + $0x1], 1 }
 0xafc   :  { %4296 = vsyncpa [#allocation6], 1 }
 0xafd   :  { %4298 = vsyncpa [#allocation6 + $0x1], 1 }
 0xafe   :  { %4299 = vsyncpa [#allocation9], 1 }
 0xaff   :  { %4301 = vsyncpa [#allocation9 + $0x1], 1 }
 0xb00   :  { %4302 = vsyncpa [#allocation12], 1 }
 0xb01   :  { %4303 = vsyncpa [#allocation15], 1 }
 0xb02   :  { %4304 = vsyncpa [#allocation18], 1 }
 0xb03   :  { %4305 = vsyncpa [#allocation4], 1 }
 0xb04   :  { %4307 = vsyncpa [#allocation4 + $0x1], 1 }

</bundles_post_ra>
